<compile_context>
chip_gen: v7x
topology: tpu7x:2x2x1
jax: 0.10.0
libtpu: 0.0.40
codegen_flags: <defaults>
</compile_context>

<pallas_src>
import functools
import math

import jax
import jax.numpy as jnp
from jax import lax
from jax.experimental import pallas as pl
from jax.experimental.pallas import tpu as pltpu


def _gelu(x):
    # exact (erf-based) GELU, matching torch.nn.GELU() default
    return 0.5 * x * (1.0 + lax.erf(x * 0.7071067811865476))


def paramixer_kernel(emb_ref, fw1_ref, fb1_ref, fw2_ref, fb2_ref,
                     gw1_ref, gb1_ref, gw2_ref, gb2_ref, out_ref,
                     *, n_layers, n_W, n_links, seq_len, block_b):
    Bt, S = block_b, seq_len
    E = emb_ref.shape[-1]
    N = Bt * S
    mm_dtype = fw1_ref.dtype          # matmul operand dtype (f32 or bf16 weights)

    # (Bt, S, E) -> (Bt*S, E): S == sublane tile, so this merge is layout-free;
    # every matmul gets M = Bt*S rows on the MXU.
    x2 = emb_ref[...].reshape(N, E)
    x_mm = x2.astype(mm_dtype)

    # ---- hoisted f-MLPs: the W coefficients depend only on the embedding ----
    hw = jnp.dot(x_mm, fw1_ref[...], preferred_element_type=jnp.float32) + fb1_ref[...]
    hw = _gelu(hw)                                                     # (N, L*M*H), f32
    w_all = (jnp.dot(hw.astype(mm_dtype), fw2_ref[...],
                     preferred_element_type=jnp.float32) + fb2_ref[...])  # (N, L*M*K)
    w3 = w_all.reshape(Bt, S, n_layers * n_W * n_links)               # x-only coefficients

    v = x2
    for l in range(n_layers):
        # ---- g MLP: Linear(E->H) -> GELU -> Linear(H->E), on (N, .) tiles ----
        h1 = jnp.dot(v.astype(mm_dtype), gw1_ref[l],
                     preferred_element_type=jnp.float32) + gb1_ref[l]
        h1 = _gelu(h1)
        vg = jnp.dot(h1.astype(mm_dtype), gw2_ref[l],
                     preferred_element_type=jnp.float32) + gb2_ref[l]

        # ---- n_W chord mixing steps: batched sublane rolls over (Bt, S, E) ----
        v3 = vg.reshape(Bt, S, E)                                      # leading-dim split only
        for m in range(n_W):
            col0 = (l * n_W + m) * n_links
            # self link (offset 0) with the residual folded in: (w0 + 1) * V
            acc = (w3[:, :, col0:col0 + 1] + 1.0) * v3
            for k in range(1, n_links):
                off = 2 ** (k - 1)                                     # chord offsets 1, 2, 4, ...
                # gathered[i] = V[(i + off) % S]  ==  roll by (S - off) along the seq axis
                rolled = pltpu.roll(v3, shift=(S - off) % S, axis=1)
                acc = acc + w3[:, :, col0 + k:col0 + k + 1] * rolled
            v3 = acc
        # attn_dropout: identity (eval mode / p=0)
        # TODO(synk): training-mode dropout not modeled
        v = v3.reshape(N, E)

    # single full-tile store (lane/store-slot friendly)
    out_ref[...] = v.reshape(Bt, S, E)


def pack_f_weights(f_w1, f_b1, f_w2, f_b2):
    """Stack the per-(layer, step) f-MLPs into fused weight matrices."""
    L, M, E, H = f_w1.shape
    K = f_w2.shape[-1]
    # columns ordered by lm = l*M + m, matching the kernel's col0 indexing
    fw1_all = jnp.transpose(f_w1, (2, 0, 1, 3)).reshape(E, L * M * H)   # (E, L*M*H)
    fb1_all = f_b1.reshape(1, L * M * H)
    fw2_bd = jnp.zeros((L * M * H, L * M * K), jnp.float32)             # block diagonal
    for idx in range(L * M):
        l, m = divmod(idx, M)
        fw2_bd = fw2_bd.at[idx * H:(idx + 1) * H, idx * K:(idx + 1) * K].set(f_w2[l, m])
    fb2_all = f_b2.reshape(1, L * M * K)
    return fw1_all, fb1_all, fw2_bd, fb2_all


def make_params(key, n_layers, n_W, n_links, E, H):
    ks = jax.random.split(key, 8)
    s = 0.05
    g_w1 = jax.random.normal(ks[0], (n_layers, E, H), jnp.float32) * s
    g_b1 = jax.random.normal(ks[1], (n_layers, 1, H), jnp.float32) * s
    g_w2 = jax.random.normal(ks[2], (n_layers, H, E), jnp.float32) * s
    g_b2 = jax.random.normal(ks[3], (n_layers, 1, E), jnp.float32) * s
    f_w1 = jax.random.normal(ks[4], (n_layers, n_W, E, H), jnp.float32) * s
    f_b1 = jax.random.normal(ks[5], (n_layers, n_W, 1, H), jnp.float32) * s
    f_w2 = jax.random.normal(ks[6], (n_layers, n_W, H, n_links), jnp.float32) * s
    f_b2 = jax.random.normal(ks[7], (n_layers, n_W, 1, n_links), jnp.float32) * s
    return (g_w1, g_b1, g_w2, g_b2, f_w1, f_b1, f_w2, f_b2)


def paramixer_forward(embed, params, *, n_layers, n_W, n_links, block_b=None,
                      use_bf16_matmul=False):
    B, S, E = embed.shape
    assert n_layers >= 1, "Paramixer needs at least one layer"
    if block_b is None:
        block_b = B
    assert B % block_b == 0, "batch must be divisible by the batch tile"
    g_w1, g_b1, g_w2, g_b2, f_w1, f_b1, f_w2, f_b2 = params
    fw1_all, fb1_all, fw2_bd, fb2_all = pack_f_weights(f_w1, f_b1, f_w2, f_b2)

    # Optional bf16 MXU operands (v6e/v7x): cast the packed weights once outside;
    # activations are cast per-dot inside the kernel. GELU / mixing stay f32.
    if use_bf16_matmul:
        mm = jnp.bfloat16
        fw1_all, fw2_bd = fw1_all.astype(mm), fw2_bd.astype(mm)
        g_w1_mm, g_w2_mm = g_w1.astype(mm), g_w2.astype(mm)
    else:
        g_w1_mm, g_w2_mm = g_w1, g_w2

    def full_spec(arr):
        zeros = (0,) * arr.ndim
        return pl.BlockSpec(arr.shape, lambda b, _z=zeros: _z)

    kernel = functools.partial(
        paramixer_kernel, n_layers=n_layers, n_W=n_W, n_links=n_links,
        seq_len=S, block_b=block_b)

    return pl.pallas_call(
        kernel,
        out_shape=jax.ShapeDtypeStruct((B, S, E), jnp.float32),
        grid=(B // block_b,),
        in_specs=[pl.BlockSpec((block_b, S, E), lambda b: (b, 0, 0)),
                  full_spec(fw1_all), full_spec(fb1_all),
                  full_spec(fw2_bd), full_spec(fb2_all),
                  full_spec(g_w1_mm), full_spec(g_b1),
                  full_spec(g_w2_mm), full_spec(g_b2)],
        out_specs=pl.BlockSpec((block_b, S, E), lambda b: (b, 0, 0)),
        compiler_params=pltpu.CompilerParams(
            dimension_semantics=("parallel",)),
    )(embed, fw1_all, fb1_all, fw2_bd, fb2_all,
      g_w1_mm, g_b1, g_w2_mm, g_b2)


def chord_gather_matrices(S, n_links):
    # offsets follow get_chord_indices_assym: [i, i+2^0, ..., i+2^(L-2)] mod S
    offsets = [0] + [2 ** k for k in range(n_links - 1)]
    idx = jnp.arange(S)
    mats = [jax.nn.one_hot((idx + off) % S, S, dtype=jnp.float32) for off in offsets]
    return jnp.stack(mats)  # (L, S, S) — used only by the pure-JAX reference


def paramixer_reference(embed, P, params, *, n_layers, n_W, n_links):
    # pure-JAX reference with the original (one-hot spmm) formulation
    g_w1, g_b1, g_w2, g_b2, f_w1, f_b1, f_w2, f_b2 = params
    x = embed
    V = x
    for l in range(n_layers):
        h = _gelu(jnp.einsum('bse,eh->bsh', V, g_w1[l]) + g_b1[l])
        V = jnp.einsum('bsh,he->bse', h, g_w2[l]) + g_b2[l]
        for m in range(n_W):
            res = V
            hw = _gelu(jnp.einsum('bse,eh->bsh', x, f_w1[l, m]) + f_b1[l, m])
            W = jnp.einsum('bsh,hk->bsk', hw, f_w2[l, m]) + f_b2[l, m]
            gathered = jnp.einsum('ksj,bje->bkse', P, V)
            V = jnp.einsum('bsk,bkse->bse', W, gathered) + res
    return V


if __name__ == "__main__":
    # small config consistent with the module; batch sized so each grid step
    # feeds the MXU Bt*S = 128 rows and grid=(2,) keeps both v7x cores busy.
    B, S, E, H = 32, 8, 32, 32
    n_layers = 2
    n_W = math.ceil(math.log2(S))        # 3
    n_links = n_W + 1                    # 4 (chord protocol)
    block_b = 16                         # Bt*S = 128, grid = (2,)

    key = jax.random.PRNGKey(0)
    k_emb, k_par = jax.random.split(key)
    embed = jax.random.normal(k_emb, (B, S, E), jnp.float32)
    params = make_params(k_par, n_layers, n_W, n_links, E, H)

    out = paramixer_forward(embed, params, n_layers=n_layers, n_W=n_W,
                            n_links=n_links, block_b=block_b,
                            use_bf16_matmul=False)   # f32 keeps the 1e-4 check
    out = jax.block_until_ready(out)

    P = chord_gather_matrices(S, n_links)
    ref = paramixer_reference(embed, P, params,
                              n_layers=n_layers, n_W=n_W, n_links=n_links)
    assert out.shape == (B, S, E)
    assert jnp.max(jnp.abs(out - ref)) < 1e-4

    print("KERNEL_OK")
</pallas_src>

<mosaic_0001>
module attributes {stable_mosaic.version = 11 : i64} {
  func.func @paramixer_kernel(%arg0: i32, %arg1: memref<16x8x32xf32, #tpu.memory_space<vmem>>, %arg2: memref<32x192xf32, #tpu.memory_space<vmem>>, %arg3: memref<1x192xf32, #tpu.memory_space<vmem>>, %arg4: memref<192x24xf32, #tpu.memory_space<vmem>>, %arg5: memref<1x24xf32, #tpu.memory_space<vmem>>, %arg6: memref<2x32x32xf32, #tpu.memory_space<vmem>>, %arg7: memref<2x1x32xf32, #tpu.memory_space<vmem>>, %arg8: memref<2x32x32xf32, #tpu.memory_space<vmem>>, %arg9: memref<2x1x32xf32, #tpu.memory_space<vmem>>, %arg10: memref<16x8x32xf32, #tpu.memory_space<vmem>>) attributes {dimension_semantics = [#tpu.dimension_semantics<parallel>], iteration_bounds = array<i64: 2>, scalar_prefetch = 0 : i64, scratch_operands = 0 : i64, tpu.core_type = #tpu.core_type<tc>, window_params = [{transform_indices = @transform_0, window_bounds = array<i64: 16, 8, 32>}, {pipeline_mode = #tpu.pipeline_mode<synchronous>, transform_indices = @transform_1, window_bounds = array<i64: 32, 192>}, {pipeline_mode = #tpu.pipeline_mode<synchronous>, transform_indices = @transform_2, window_bounds = array<i64: 1, 192>}, {pipeline_mode = #tpu.pipeline_mode<synchronous>, transform_indices = @transform_3, window_bounds = array<i64: 192, 24>}, {pipeline_mode = #tpu.pipeline_mode<synchronous>, transform_indices = @transform_4, window_bounds = array<i64: 1, 24>}, {pipeline_mode = #tpu.pipeline_mode<synchronous>, transform_indices = @transform_5, window_bounds = array<i64: 2, 32, 32>}, {pipeline_mode = #tpu.pipeline_mode<synchronous>, transform_indices = @transform_6, window_bounds = array<i64: 2, 1, 32>}, {pipeline_mode = #tpu.pipeline_mode<synchronous>, transform_indices = @transform_7, window_bounds = array<i64: 2, 32, 32>}, {pipeline_mode = #tpu.pipeline_mode<synchronous>, transform_indices = @transform_8, window_bounds = array<i64: 2, 1, 32>}, {transform_indices = @transform_9, window_bounds = array<i64: 16, 8, 32>}]} {
    %c0 = arith.constant 0 : index
    %c0_0 = arith.constant 0 : index
    %c0_1 = arith.constant 0 : index
    %0 = vector.load %arg1[%c0, %c0_0, %c0_1] : memref<16x8x32xf32, #tpu.memory_space<vmem>>, vector<16x8x32xf32>
    %1 = vector.shape_cast %0 : vector<16x8x32xf32> to vector<128x32xf32>
    %c0_2 = arith.constant 0 : index
    %c0_3 = arith.constant 0 : index
    %2 = vector.load %arg2[%c0_2, %c0_3] : memref<32x192xf32, #tpu.memory_space<vmem>>, vector<32x192xf32>
    %cst = arith.constant dense<0.000000e+00> : vector<128x192xf32>
    %3 = tpu.matmul %1, %2, %cst {dimension_numbers = #tpu.dot_dimension_numbers<[1], [0], [0], [1], [0, 0, 1, 1], [], []>} : vector<128x32xf32>, vector<32x192xf32>, vector<128x192xf32> -> vector<128x192xf32>
    %c0_4 = arith.constant 0 : index
    %c0_5 = arith.constant 0 : index
    %4 = vector.load %arg3[%c0_4, %c0_5] : memref<1x192xf32, #tpu.memory_space<vmem>>, vector<1x192xf32>
    %5 = vector.broadcast %4 : vector<1x192xf32> to vector<128x192xf32>
    %6 = arith.addf %3, %5 : vector<128x192xf32>
    %cst_6 = arith.constant 5.000000e-01 : f32
    %7 = vector.broadcast %cst_6 : f32 to vector<128x192xf32>
    %8 = arith.mulf %7, %6 : vector<128x192xf32>
    %cst_7 = arith.constant 0.707106769 : f32
    %9 = vector.broadcast %cst_7 : f32 to vector<128x192xf32>
    %10 = arith.mulf %6, %9 : vector<128x192xf32>
    %11 = math.erf %10 : vector<128x192xf32>
    %cst_8 = arith.constant 1.000000e+00 : f32
    %12 = vector.broadcast %cst_8 : f32 to vector<128x192xf32>
    %13 = arith.addf %12, %11 : vector<128x192xf32>
    %14 = arith.mulf %8, %13 : vector<128x192xf32>
    %c0_9 = arith.constant 0 : index
    %c0_10 = arith.constant 0 : index
    %15 = vector.load %arg4[%c0_9, %c0_10] : memref<192x24xf32, #tpu.memory_space<vmem>>, vector<192x24xf32>
    %cst_11 = arith.constant dense<0.000000e+00> : vector<128x24xf32>
    %16 = tpu.matmul %14, %15, %cst_11 {dimension_numbers = #tpu.dot_dimension_numbers<[1], [0], [0], [1], [0, 0, 1, 1], [], []>} : vector<128x192xf32>, vector<192x24xf32>, vector<128x24xf32> -> vector<128x24xf32>
    %c0_12 = arith.constant 0 : index
    %c0_13 = arith.constant 0 : index
    %17 = vector.load %arg5[%c0_12, %c0_13] : memref<1x24xf32, #tpu.memory_space<vmem>>, vector<1x24xf32>
    %18 = vector.broadcast %17 : vector<1x24xf32> to vector<128x24xf32>
    %19 = arith.addf %16, %18 : vector<128x24xf32>
    %20 = vector.shape_cast %19 : vector<128x24xf32> to vector<16x8x24xf32>
    %c0_14 = arith.constant 0 : index
    %c0_15 = arith.constant 0 : index
    %c0_16 = arith.constant 0 : index
    %21 = vector.load %arg6[%c0_14, %c0_15, %c0_16] : memref<2x32x32xf32, #tpu.memory_space<vmem>>, vector<1x32x32xf32>
    %22 = vector.shape_cast %21 : vector<1x32x32xf32> to vector<32x32xf32>
    %cst_17 = arith.constant dense<0.000000e+00> : vector<128x32xf32>
    %23 = tpu.matmul %1, %22, %cst_17 {dimension_numbers = #tpu.dot_dimension_numbers<[1], [0], [0], [1], [0, 0, 1, 1], [], []>} : vector<128x32xf32>, vector<32x32xf32>, vector<128x32xf32> -> vector<128x32xf32>
    %c0_18 = arith.constant 0 : index
    %c0_19 = arith.constant 0 : index
    %c0_20 = arith.constant 0 : index
    %24 = vector.load %arg7[%c0_18, %c0_19, %c0_20] : memref<2x1x32xf32, #tpu.memory_space<vmem>>, vector<1x1x32xf32>
    %25 = vector.shape_cast %24 : vector<1x1x32xf32> to vector<1x32xf32>
    %26 = vector.broadcast %25 : vector<1x32xf32> to vector<128x32xf32>
    %27 = arith.addf %23, %26 : vector<128x32xf32>
    %cst_21 = arith.constant 5.000000e-01 : f32
    %28 = vector.broadcast %cst_21 : f32 to vector<128x32xf32>
    %29 = arith.mulf %28, %27 : vector<128x32xf32>
    %cst_22 = arith.constant 0.707106769 : f32
    %30 = vector.broadcast %cst_22 : f32 to vector<128x32xf32>
    %31 = arith.mulf %27, %30 : vector<128x32xf32>
    %32 = math.erf %31 : vector<128x32xf32>
    %cst_23 = arith.constant 1.000000e+00 : f32
    %33 = vector.broadcast %cst_23 : f32 to vector<128x32xf32>
    %34 = arith.addf %33, %32 : vector<128x32xf32>
    %35 = arith.mulf %29, %34 : vector<128x32xf32>
    %c0_24 = arith.constant 0 : index
    %c0_25 = arith.constant 0 : index
    %c0_26 = arith.constant 0 : index
    %36 = vector.load %arg8[%c0_24, %c0_25, %c0_26] : memref<2x32x32xf32, #tpu.memory_space<vmem>>, vector<1x32x32xf32>
    %37 = vector.shape_cast %36 : vector<1x32x32xf32> to vector<32x32xf32>
    %cst_27 = arith.constant dense<0.000000e+00> : vector<128x32xf32>
    %38 = tpu.matmul %35, %37, %cst_27 {dimension_numbers = #tpu.dot_dimension_numbers<[1], [0], [0], [1], [0, 0, 1, 1], [], []>} : vector<128x32xf32>, vector<32x32xf32>, vector<128x32xf32> -> vector<128x32xf32>
    %c0_28 = arith.constant 0 : index
    %c0_29 = arith.constant 0 : index
    %c0_30 = arith.constant 0 : index
    %39 = vector.load %arg9[%c0_28, %c0_29, %c0_30] : memref<2x1x32xf32, #tpu.memory_space<vmem>>, vector<1x1x32xf32>
    %40 = vector.shape_cast %39 : vector<1x1x32xf32> to vector<1x32xf32>
    %41 = vector.broadcast %40 : vector<1x32xf32> to vector<128x32xf32>
    %42 = arith.addf %38, %41 : vector<128x32xf32>
    %43 = vector.shape_cast %42 : vector<128x32xf32> to vector<16x8x32xf32>
    %44 = vector.extract_strided_slice %20 {offsets = [0, 0, 0], sizes = [16, 8, 1], strides = [1, 1, 1]} : vector<16x8x24xf32> to vector<16x8x1xf32>
    %cst_31 = arith.constant 1.000000e+00 : f32
    %45 = vector.broadcast %cst_31 : f32 to vector<16x8x1xf32>
    %46 = arith.addf %44, %45 : vector<16x8x1xf32>
    %47 = vector.broadcast %46 : vector<16x8x1xf32> to vector<16x8x32xf32>
    %48 = arith.mulf %47, %43 : vector<16x8x32xf32>
    %c7_i32 = arith.constant 7 : i32
    %49 = tpu.dynamic_rotate %43 by %c7_i32 dim 1 : vector<16x8x32xf32>, i32 -> vector<16x8x32xf32>
    %50 = vector.extract_strided_slice %20 {offsets = [0, 0, 1], sizes = [16, 8, 1], strides = [1, 1, 1]} : vector<16x8x24xf32> to vector<16x8x1xf32>
    %51 = vector.broadcast %50 : vector<16x8x1xf32> to vector<16x8x32xf32>
    %52 = arith.mulf %51, %49 : vector<16x8x32xf32>
    %53 = arith.addf %48, %52 : vector<16x8x32xf32>
    %c6_i32 = arith.constant 6 : i32
    %54 = tpu.dynamic_rotate %43 by %c6_i32 dim 1 : vector<16x8x32xf32>, i32 -> vector<16x8x32xf32>
    %55 = vector.extract_strided_slice %20 {offsets = [0, 0, 2], sizes = [16, 8, 1], strides = [1, 1, 1]} : vector<16x8x24xf32> to vector<16x8x1xf32>
    %56 = vector.broadcast %55 : vector<16x8x1xf32> to vector<16x8x32xf32>
    %57 = arith.mulf %56, %54 : vector<16x8x32xf32>
    %58 = arith.addf %53, %57 : vector<16x8x32xf32>
    %c4_i32 = arith.constant 4 : i32
    %59 = tpu.dynamic_rotate %43 by %c4_i32 dim 1 : vector<16x8x32xf32>, i32 -> vector<16x8x32xf32>
    %60 = vector.extract_strided_slice %20 {offsets = [0, 0, 3], sizes = [16, 8, 1], strides = [1, 1, 1]} : vector<16x8x24xf32> to vector<16x8x1xf32>
    %61 = vector.broadcast %60 : vector<16x8x1xf32> to vector<16x8x32xf32>
    %62 = arith.mulf %61, %59 : vector<16x8x32xf32>
    %63 = arith.addf %58, %62 : vector<16x8x32xf32>
    %64 = vector.extract_strided_slice %20 {offsets = [0, 0, 4], sizes = [16, 8, 1], strides = [1, 1, 1]} : vector<16x8x24xf32> to vector<16x8x1xf32>
    %cst_32 = arith.constant 1.000000e+00 : f32
    %65 = vector.broadcast %cst_32 : f32 to vector<16x8x1xf32>
    %66 = arith.addf %64, %65 : vector<16x8x1xf32>
    %67 = vector.broadcast %66 : vector<16x8x1xf32> to vector<16x8x32xf32>
    %68 = arith.mulf %67, %63 : vector<16x8x32xf32>
    %c7_i32_33 = arith.constant 7 : i32
    %69 = tpu.dynamic_rotate %63 by %c7_i32_33 dim 1 : vector<16x8x32xf32>, i32 -> vector<16x8x32xf32>
    %70 = vector.extract_strided_slice %20 {offsets = [0, 0, 5], sizes = [16, 8, 1], strides = [1, 1, 1]} : vector<16x8x24xf32> to vector<16x8x1xf32>
    %71 = vector.broadcast %70 : vector<16x8x1xf32> to vector<16x8x32xf32>
    %72 = arith.mulf %71, %69 : vector<16x8x32xf32>
    %73 = arith.addf %68, %72 : vector<16x8x32xf32>
    %c6_i32_34 = arith.constant 6 : i32
    %74 = tpu.dynamic_rotate %63 by %c6_i32_34 dim 1 : vector<16x8x32xf32>, i32 -> vector<16x8x32xf32>
    %75 = vector.extract_strided_slice %20 {offsets = [0, 0, 6], sizes = [16, 8, 1], strides = [1, 1, 1]} : vector<16x8x24xf32> to vector<16x8x1xf32>
    %76 = vector.broadcast %75 : vector<16x8x1xf32> to vector<16x8x32xf32>
    %77 = arith.mulf %76, %74 : vector<16x8x32xf32>
    %78 = arith.addf %73, %77 : vector<16x8x32xf32>
    %c4_i32_35 = arith.constant 4 : i32
    %79 = tpu.dynamic_rotate %63 by %c4_i32_35 dim 1 : vector<16x8x32xf32>, i32 -> vector<16x8x32xf32>
    %80 = vector.extract_strided_slice %20 {offsets = [0, 0, 7], sizes = [16, 8, 1], strides = [1, 1, 1]} : vector<16x8x24xf32> to vector<16x8x1xf32>
    %81 = vector.broadcast %80 : vector<16x8x1xf32> to vector<16x8x32xf32>
    %82 = arith.mulf %81, %79 : vector<16x8x32xf32>
    %83 = arith.addf %78, %82 : vector<16x8x32xf32>
    %84 = vector.extract_strided_slice %20 {offsets = [0, 0, 8], sizes = [16, 8, 1], strides = [1, 1, 1]} : vector<16x8x24xf32> to vector<16x8x1xf32>
    %cst_36 = arith.constant 1.000000e+00 : f32
    %85 = vector.broadcast %cst_36 : f32 to vector<16x8x1xf32>
    %86 = arith.addf %84, %85 : vector<16x8x1xf32>
    %87 = vector.broadcast %86 : vector<16x8x1xf32> to vector<16x8x32xf32>
    %88 = arith.mulf %87, %83 : vector<16x8x32xf32>
    %c7_i32_37 = arith.constant 7 : i32
    %89 = tpu.dynamic_rotate %83 by %c7_i32_37 dim 1 : vector<16x8x32xf32>, i32 -> vector<16x8x32xf32>
    %90 = vector.extract_strided_slice %20 {offsets = [0, 0, 9], sizes = [16, 8, 1], strides = [1, 1, 1]} : vector<16x8x24xf32> to vector<16x8x1xf32>
    %91 = vector.broadcast %90 : vector<16x8x1xf32> to vector<16x8x32xf32>
    %92 = arith.mulf %91, %89 : vector<16x8x32xf32>
    %93 = arith.addf %88, %92 : vector<16x8x32xf32>
    %c6_i32_38 = arith.constant 6 : i32
    %94 = tpu.dynamic_rotate %83 by %c6_i32_38 dim 1 : vector<16x8x32xf32>, i32 -> vector<16x8x32xf32>
    %95 = vector.extract_strided_slice %20 {offsets = [0, 0, 10], sizes = [16, 8, 1], strides = [1, 1, 1]} : vector<16x8x24xf32> to vector<16x8x1xf32>
    %96 = vector.broadcast %95 : vector<16x8x1xf32> to vector<16x8x32xf32>
    %97 = arith.mulf %96, %94 : vector<16x8x32xf32>
    %98 = arith.addf %93, %97 : vector<16x8x32xf32>
    %c4_i32_39 = arith.constant 4 : i32
    %99 = tpu.dynamic_rotate %83 by %c4_i32_39 dim 1 : vector<16x8x32xf32>, i32 -> vector<16x8x32xf32>
    %100 = vector.extract_strided_slice %20 {offsets = [0, 0, 11], sizes = [16, 8, 1], strides = [1, 1, 1]} : vector<16x8x24xf32> to vector<16x8x1xf32>
    %101 = vector.broadcast %100 : vector<16x8x1xf32> to vector<16x8x32xf32>
    %102 = arith.mulf %101, %99 : vector<16x8x32xf32>
    %103 = arith.addf %98, %102 : vector<16x8x32xf32>
    %104 = vector.shape_cast %103 : vector<16x8x32xf32> to vector<128x32xf32>
    %c1 = arith.constant 1 : index
    %c0_40 = arith.constant 0 : index
    %c0_41 = arith.constant 0 : index
    %105 = vector.load %arg6[%c1, %c0_40, %c0_41] : memref<2x32x32xf32, #tpu.memory_space<vmem>>, vector<1x32x32xf32>
    %106 = vector.shape_cast %105 : vector<1x32x32xf32> to vector<32x32xf32>
    %cst_42 = arith.constant dense<0.000000e+00> : vector<128x32xf32>
    %107 = tpu.matmul %104, %106, %cst_42 {dimension_numbers = #tpu.dot_dimension_numbers<[1], [0], [0], [1], [0, 0, 1, 1], [], []>} : vector<128x32xf32>, vector<32x32xf32>, vector<128x32xf32> -> vector<128x32xf32>
    %c1_43 = arith.constant 1 : index
    %c0_44 = arith.constant 0 : index
    %c0_45 = arith.constant 0 : index
    %108 = vector.load %arg7[%c1_43, %c0_44, %c0_45] : memref<2x1x32xf32, #tpu.memory_space<vmem>>, vector<1x1x32xf32>
    %109 = vector.shape_cast %108 : vector<1x1x32xf32> to vector<1x32xf32>
    %110 = vector.broadcast %109 : vector<1x32xf32> to vector<128x32xf32>
    %111 = arith.addf %107, %110 : vector<128x32xf32>
    %cst_46 = arith.constant 5.000000e-01 : f32
    %112 = vector.broadcast %cst_46 : f32 to vector<128x32xf32>
    %113 = arith.mulf %112, %111 : vector<128x32xf32>
    %cst_47 = arith.constant 0.707106769 : f32
    %114 = vector.broadcast %cst_47 : f32 to vector<128x32xf32>
    %115 = arith.mulf %111, %114 : vector<128x32xf32>
    %116 = math.erf %115 : vector<128x32xf32>
    %cst_48 = arith.constant 1.000000e+00 : f32
    %117 = vector.broadcast %cst_48 : f32 to vector<128x32xf32>
    %118 = arith.addf %117, %116 : vector<128x32xf32>
    %119 = arith.mulf %113, %118 : vector<128x32xf32>
    %c1_49 = arith.constant 1 : index
    %c0_50 = arith.constant 0 : index
    %c0_51 = arith.constant 0 : index
    %120 = vector.load %arg8[%c1_49, %c0_50, %c0_51] : memref<2x32x32xf32, #tpu.memory_space<vmem>>, vector<1x32x32xf32>
    %121 = vector.shape_cast %120 : vector<1x32x32xf32> to vector<32x32xf32>
    %cst_52 = arith.constant dense<0.000000e+00> : vector<128x32xf32>
    %122 = tpu.matmul %119, %121, %cst_52 {dimension_numbers = #tpu.dot_dimension_numbers<[1], [0], [0], [1], [0, 0, 1, 1], [], []>} : vector<128x32xf32>, vector<32x32xf32>, vector<128x32xf32> -> vector<128x32xf32>
    %c1_53 = arith.constant 1 : index
    %c0_54 = arith.constant 0 : index
    %c0_55 = arith.constant 0 : index
    %123 = vector.load %arg9[%c1_53, %c0_54, %c0_55] : memref<2x1x32xf32, #tpu.memory_space<vmem>>, vector<1x1x32xf32>
    %124 = vector.shape_cast %123 : vector<1x1x32xf32> to vector<1x32xf32>
    %125 = vector.broadcast %124 : vector<1x32xf32> to vector<128x32xf32>
    %126 = arith.addf %122, %125 : vector<128x32xf32>
    %127 = vector.shape_cast %126 : vector<128x32xf32> to vector<16x8x32xf32>
    %128 = vector.extract_strided_slice %20 {offsets = [0, 0, 12], sizes = [16, 8, 1], strides = [1, 1, 1]} : vector<16x8x24xf32> to vector<16x8x1xf32>
    %cst_56 = arith.constant 1.000000e+00 : f32
    %129 = vector.broadcast %cst_56 : f32 to vector<16x8x1xf32>
    %130 = arith.addf %128, %129 : vector<16x8x1xf32>
    %131 = vector.broadcast %130 : vector<16x8x1xf32> to vector<16x8x32xf32>
    %132 = arith.mulf %131, %127 : vector<16x8x32xf32>
    %c7_i32_57 = arith.constant 7 : i32
    %133 = tpu.dynamic_rotate %127 by %c7_i32_57 dim 1 : vector<16x8x32xf32>, i32 -> vector<16x8x32xf32>
    %134 = vector.extract_strided_slice %20 {offsets = [0, 0, 13], sizes = [16, 8, 1], strides = [1, 1, 1]} : vector<16x8x24xf32> to vector<16x8x1xf32>
    %135 = vector.broadcast %134 : vector<16x8x1xf32> to vector<16x8x32xf32>
    %136 = arith.mulf %135, %133 : vector<16x8x32xf32>
    %137 = arith.addf %132, %136 : vector<16x8x32xf32>
    %c6_i32_58 = arith.constant 6 : i32
    %138 = tpu.dynamic_rotate %127 by %c6_i32_58 dim 1 : vector<16x8x32xf32>, i32 -> vector<16x8x32xf32>
    %139 = vector.extract_strided_slice %20 {offsets = [0, 0, 14], sizes = [16, 8, 1], strides = [1, 1, 1]} : vector<16x8x24xf32> to vector<16x8x1xf32>
    %140 = vector.broadcast %139 : vector<16x8x1xf32> to vector<16x8x32xf32>
    %141 = arith.mulf %140, %138 : vector<16x8x32xf32>
    %142 = arith.addf %137, %141 : vector<16x8x32xf32>
    %c4_i32_59 = arith.constant 4 : i32
    %143 = tpu.dynamic_rotate %127 by %c4_i32_59 dim 1 : vector<16x8x32xf32>, i32 -> vector<16x8x32xf32>
    %144 = vector.extract_strided_slice %20 {offsets = [0, 0, 15], sizes = [16, 8, 1], strides = [1, 1, 1]} : vector<16x8x24xf32> to vector<16x8x1xf32>
    %145 = vector.broadcast %144 : vector<16x8x1xf32> to vector<16x8x32xf32>
    %146 = arith.mulf %145, %143 : vector<16x8x32xf32>
    %147 = arith.addf %142, %146 : vector<16x8x32xf32>
    %148 = vector.extract_strided_slice %20 {offsets = [0, 0, 16], sizes = [16, 8, 1], strides = [1, 1, 1]} : vector<16x8x24xf32> to vector<16x8x1xf32>
    %cst_60 = arith.constant 1.000000e+00 : f32
    %149 = vector.broadcast %cst_60 : f32 to vector<16x8x1xf32>
    %150 = arith.addf %148, %149 : vector<16x8x1xf32>
    %151 = vector.broadcast %150 : vector<16x8x1xf32> to vector<16x8x32xf32>
    %152 = arith.mulf %151, %147 : vector<16x8x32xf32>
    %c7_i32_61 = arith.constant 7 : i32
    %153 = tpu.dynamic_rotate %147 by %c7_i32_61 dim 1 : vector<16x8x32xf32>, i32 -> vector<16x8x32xf32>
    %154 = vector.extract_strided_slice %20 {offsets = [0, 0, 17], sizes = [16, 8, 1], strides = [1, 1, 1]} : vector<16x8x24xf32> to vector<16x8x1xf32>
    %155 = vector.broadcast %154 : vector<16x8x1xf32> to vector<16x8x32xf32>
    %156 = arith.mulf %155, %153 : vector<16x8x32xf32>
    %157 = arith.addf %152, %156 : vector<16x8x32xf32>
    %c6_i32_62 = arith.constant 6 : i32
    %158 = tpu.dynamic_rotate %147 by %c6_i32_62 dim 1 : vector<16x8x32xf32>, i32 -> vector<16x8x32xf32>
    %159 = vector.extract_strided_slice %20 {offsets = [0, 0, 18], sizes = [16, 8, 1], strides = [1, 1, 1]} : vector<16x8x24xf32> to vector<16x8x1xf32>
    %160 = vector.broadcast %159 : vector<16x8x1xf32> to vector<16x8x32xf32>
    %161 = arith.mulf %160, %158 : vector<16x8x32xf32>
    %162 = arith.addf %157, %161 : vector<16x8x32xf32>
    %c4_i32_63 = arith.constant 4 : i32
    %163 = tpu.dynamic_rotate %147 by %c4_i32_63 dim 1 : vector<16x8x32xf32>, i32 -> vector<16x8x32xf32>
    %164 = vector.extract_strided_slice %20 {offsets = [0, 0, 19], sizes = [16, 8, 1], strides = [1, 1, 1]} : vector<16x8x24xf32> to vector<16x8x1xf32>
    %165 = vector.broadcast %164 : vector<16x8x1xf32> to vector<16x8x32xf32>
    %166 = arith.mulf %165, %163 : vector<16x8x32xf32>
    %167 = arith.addf %162, %166 : vector<16x8x32xf32>
    %168 = vector.extract_strided_slice %20 {offsets = [0, 0, 20], sizes = [16, 8, 1], strides = [1, 1, 1]} : vector<16x8x24xf32> to vector<16x8x1xf32>
    %cst_64 = arith.constant 1.000000e+00 : f32
    %169 = vector.broadcast %cst_64 : f32 to vector<16x8x1xf32>
    %170 = arith.addf %168, %169 : vector<16x8x1xf32>
    %171 = vector.broadcast %170 : vector<16x8x1xf32> to vector<16x8x32xf32>
    %172 = arith.mulf %171, %167 : vector<16x8x32xf32>
    %c7_i32_65 = arith.constant 7 : i32
    %173 = tpu.dynamic_rotate %167 by %c7_i32_65 dim 1 : vector<16x8x32xf32>, i32 -> vector<16x8x32xf32>
    %174 = vector.extract_strided_slice %20 {offsets = [0, 0, 21], sizes = [16, 8, 1], strides = [1, 1, 1]} : vector<16x8x24xf32> to vector<16x8x1xf32>
    %175 = vector.broadcast %174 : vector<16x8x1xf32> to vector<16x8x32xf32>
    %176 = arith.mulf %175, %173 : vector<16x8x32xf32>
    %177 = arith.addf %172, %176 : vector<16x8x32xf32>
    %c6_i32_66 = arith.constant 6 : i32
    %178 = tpu.dynamic_rotate %167 by %c6_i32_66 dim 1 : vector<16x8x32xf32>, i32 -> vector<16x8x32xf32>
    %179 = vector.extract_strided_slice %20 {offsets = [0, 0, 22], sizes = [16, 8, 1], strides = [1, 1, 1]} : vector<16x8x24xf32> to vector<16x8x1xf32>
    %180 = vector.broadcast %179 : vector<16x8x1xf32> to vector<16x8x32xf32>
    %181 = arith.mulf %180, %178 : vector<16x8x32xf32>
    %182 = arith.addf %177, %181 : vector<16x8x32xf32>
    %c4_i32_67 = arith.constant 4 : i32
    %183 = tpu.dynamic_rotate %167 by %c4_i32_67 dim 1 : vector<16x8x32xf32>, i32 -> vector<16x8x32xf32>
    %184 = vector.extract_strided_slice %20 {offsets = [0, 0, 23], sizes = [16, 8, 1], strides = [1, 1, 1]} : vector<16x8x24xf32> to vector<16x8x1xf32>
    %185 = vector.broadcast %184 : vector<16x8x1xf32> to vector<16x8x32xf32>
    %186 = arith.mulf %185, %183 : vector<16x8x32xf32>
    %187 = arith.addf %182, %186 : vector<16x8x32xf32>
    %188 = vector.shape_cast %187 : vector<16x8x32xf32> to vector<128x32xf32>
    %189 = vector.shape_cast %188 : vector<128x32xf32> to vector<16x8x32xf32>
    %c0_68 = arith.constant 0 : index
    %c0_69 = arith.constant 0 : index
    %c0_70 = arith.constant 0 : index
    %190 = vector.load %arg10[%c0_68, %c0_69, %c0_70] : memref<16x8x32xf32, #tpu.memory_space<vmem>>, vector<16x8x32xf32>
    tpu.vector_store %arg10[%c0_68, %c0_69, %c0_70], %189 {strides = array<i32>} : memref<16x8x32xf32, #tpu.memory_space<vmem>>, vector<16x8x32xf32>,
    return
  }
  func.func @transform_0(%arg0: i32) -> (i32, i32, i32) {
    %c0_i32 = arith.constant 0 : i32
    %c0_i32_0 = arith.constant 0 : i32
    %c0_i32_1 = arith.constant 0 : i32
    return %arg0, %c0_i32, %c0_i32_0 : i32, i32, i32
  }
  func.func @transform_1(%arg0: i32) -> (i32, i32) {
    %c0_i32 = arith.constant 0 : i32
    %c0_i32_0 = arith.constant 0 : i32
    %c0_i32_1 = arith.constant 0 : i32
    return %c0_i32, %c0_i32_0 : i32, i32
  }
  func.func @transform_2(%arg0: i32) -> (i32, i32) {
    %c0_i32 = arith.constant 0 : i32
    %c0_i32_0 = arith.constant 0 : i32
    %c0_i32_1 = arith.constant 0 : i32
    return %c0_i32, %c0_i32_0 : i32, i32
  }
  func.func @transform_3(%arg0: i32) -> (i32, i32) {
    %c0_i32 = arith.constant 0 : i32
    %c0_i32_0 = arith.constant 0 : i32
    %c0_i32_1 = arith.constant 0 : i32
    return %c0_i32, %c0_i32_0 : i32, i32
  }
  func.func @transform_4(%arg0: i32) -> (i32, i32) {
    %c0_i32 = arith.constant 0 : i32
    %c0_i32_0 = arith.constant 0 : i32
    %c0_i32_1 = arith.constant 0 : i32
    return %c0_i32, %c0_i32_0 : i32, i32
  }
  func.func @transform_5(%arg0: i32) -> (i32, i32, i32) {
    %c0_i32 = arith.constant 0 : i32
    %c0_i32_0 = arith.constant 0 : i32
    %c0_i32_1 = arith.constant 0 : i32
    %c0_i32_2 = arith.constant 0 : i32
    return %c0_i32, %c0_i32_0, %c0_i32_1 : i32, i32, i32
  }
  func.func @transform_6(%arg0: i32) -> (i32, i32, i32) {
    %c0_i32 = arith.constant 0 : i32
    %c0_i32_0 = arith.constant 0 : i32
    %c0_i32_1 = arith.constant 0 : i32
    %c0_i32_2 = arith.constant 0 : i32
    return %c0_i32, %c0_i32_0, %c0_i32_1 : i32, i32, i32
  }
  func.func @transform_7(%arg0: i32) -> (i32, i32, i32) {
    %c0_i32 = arith.constant 0 : i32
    %c0_i32_0 = arith.constant 0 : i32
    %c0_i32_1 = arith.constant 0 : i32
    %c0_i32_2 = arith.constant 0 : i32
    return %c0_i32, %c0_i32_0, %c0_i32_1 : i32, i32, i32
  }
  func.func @transform_8(%arg0: i32) -> (i32, i32, i32) {
    %c0_i32 = arith.constant 0 : i32
    %c0_i32_0 = arith.constant 0 : i32
    %c0_i32_1 = arith.constant 0 : i32
    %c0_i32_2 = arith.constant 0 : i32
    return %c0_i32, %c0_i32_0, %c0_i32_1 : i32, i32, i32
  }
  func.func @transform_9(%arg0: i32) -> (i32, i32, i32) {
    %c0_i32 = arith.constant 0 : i32
    %c0_i32_0 = arith.constant 0 : i32
    %c0_i32_1 = arith.constant 0 : i32
    return %arg0, %c0_i32, %c0_i32_0 : i32, i32, i32
  }
}

</mosaic_0001>

<bundles_post_ra>
// kernel: tpu_custom_call.1
= control target key start
LH: loop header
LB: loop body
LE: loop exit
PB: predicated region body
PF: predicated region fallthrough
CT: control target
= control target key end

     0   :  { %14 = vsyncpa [#allocation3], 0  ;;  %s8182_s0 = inlined_call_operand.hbm [shape: f32[32,8,32], index: 0, kind: input, shape index: {}]   ;;  %s8183_s1 = inlined_call_operand.vmem [shape: f32[32,192], index: 1, kind: input, shape index: {}]   ;;  %s8184_s2 = inlined_call_operand.vmem [shape: f32[1,192], index: 2, kind: input, shape index: {}]   ;;  %s8185_s3 = inlined_call_operand.vmem [shape: f32[192,24], index: 3, kind: input, shape index: {}]   ;;  %s8186_s4 = inlined_call_operand.vmem [shape: f32[1,24], index: 4, kind: input, shape index: {}]   ;;  %s8187_s5 = inlined_call_operand.vmem [shape: f32[2,32,32], index: 5, kind: input, shape index: {}]   ;;  %s8188_s6 = inlined_call_operand.vmem [shape: f32[2,1,32], index: 6, kind: input, shape index: {}]   ;;  %s8189_s7 = inlined_call_operand.vmem [shape: f32[2,32,32], index: 7, kind: input, shape index: {}]   ;;  %s8190_s8 = inlined_call_operand.vmem [shape: f32[2,1,32], index: 8, kind: input, shape index: {}]   ;;  %s8191_s9 = inlined_call_operand.hbm [shape: f32[32,8,32], index: 9, kind: output, shape index: {}]  }
   0x1   :  { %16 = vsyncpa [#allocation3 + $0x1], 0 }
   0x2   :  { %17 = vsyncpa [#allocation4], 0 }
   0x3   :  { %19 = vsyncpa [#allocation4 + $0x1], 0  ;;  %s5580_s30 = smov 0   ;;  %s5582_s10 = smov 0  }
   0x4   :  { %s5584_s11 = smov 0   ;;  %s5586_s12 = smov 0  }
   0x5 LB: > { %s5601_s13 = sadd.s32 4294967295, %s5496_s12   ;;  %s4563_s14 = sadd.s32 4294967294, %s5496_s12   ;;  %s5496_s12 = sphi %s5586_s12, %s8626_s12   ;;  %s5492_s11 = sphi %s5584_s11, %s8625_s11   ;;  %s5488_s10 = sphi %s5582_s10, %s8624_s10   ;;  %s5484_s30 = sphi %s5580_s30, %s8623_s30  }
   0x6   : > { %s5605_s15 = sadd.s32 1, %s5496_s12   ;;  %s32_s16 = sadd.s32 1, %s5492_s11 }
   0x7   : > { %s29_s17 = ssub.s32 %s5496_s12, %s5605_s15  ;;  %p39_p0 = scmp.ne.s32.totalorder %s5492_s11, %s5488_s10 }
   0x8   : > { %p30_p1 = scmp.eq.s32.totalorder %s29_s17, 0  ;;  %p40_p2 = scmp.eq.s32.totalorder %s5496_s12, 0 }
   0x9   : > { %p45_p3 = scmp.ne.s32.totalorder %s5488_s10, %s5484_s30  ;;  %p46_p4 = scmp.eq.s32.totalorder %s5601_s13, 0 }
   0xa   : > { %s5617_s18 = scalar_select %p30_p1, %s5492_s11, %s32_s16  }
   0xb   : > { %p5619_p5 = por %p40_p2, %p39_p0  ;;  %p5623_p6 = por %p46_p4, %p45_p3 }
   0xc   : > { %p237_p7 = scmp.eq.s32.totalorder %s5601_s13, 1  ;;  %p243_p8 = scmp.eq.s32.totalorder %s4563_s14, 1 }
   0xd   : > { %p4990_p10 = scmp.lt.s32.totalorder %s5496_s12, 2  ;;  %s287_s23 = sand.u32 1, %s5492_s11  }
   0xe   : > { %p5630_p11 = por %p237_p7, %p39_p0  ;;  %p5634_p12 = por %p243_p8, %p45_p3 }
   0xf   : > { %s4688_s24 = sshll.u32 %s5496_s12, 11  ;;  %s4566_s25 = sshll.u32 %s287_s23, 7 }
  0x10   : > { %s8285_s21 = scalar_select %p5630_p11, 1, 0 }
  0x11   : > { %s8286_s22 = scalar_select %p5634_p12, 1, 0 }
  0x12   : > { %s5643_s28 = scalar_lea.hbm %s8182_s0, %s4688_s24  ;;  %s291_s29 = scalar_lea.vmem [#allocation2], %s4566_s25 }
  0x13   : > { %s298_s14 = sshll.u32 %s291_s29, 4  ;;  %p5647_p13 = pnand %p4990_p10, %p5619_p5  ;;  %s5651_s14 = int_to_ptr.vmem [resolvable:$true] %s298_s14 }
  0x14   : > { %s5653_s17 = scalar_lea.sflag [#allocation3], %s287_s23  ;;  %s5400_s26 = scalar_lea.hbm %s5643_s28, 2048 }
  0x15   : > { %p5401_p0 = scmp.ne.s32.totalorder %s5643_s28, %s5400_s26  ;;  %p5402_p1 = pneg %p5647_p13 }
  0x16   : > { %s5405_s25 = scalar_lea.hbm %s8182_s0, 4096  ;;  %p5406_p4 = scmp.lt.u32.totalorder %s5643_s28, %s8182_s0 }
  0x17   : > { %p5403_p2 = pnand %p5402_p1, %p5401_p0  ;;  %p5407_p5 = scmp.lt.u32.totalorder %s5405_s25, %s5400_s26 }
  0x18   : > { %p5409_p8 = scmp.lt.u32.totalorder %s5400_s26, %s5643_s28 }
  0x19   : > { %p5404_p3 = pneg %p5403_p2  ;;  %p5408_p7 = por %p5407_p5, %p5406_p4 }
  0x1b   : > { %p5410_p10 = por %p5409_p8, %p5408_p7 }
  0x1d   : > { %p5411_p9 = pnand %p5410_p10, %p5404_p3 }
  0x1f   : > { %5414 = shalt.err (!%p5411_p9)
}
  0x20   : > { %s5415_s23 = scalar_lea.vmem %s5651_s14, 2048  ;;  %s5498_s24 = smov [#allocation2]  }
  0x21   : > { %p5416_p0 = scmp.ne.s32.totalorder %s5651_s14, %s5415_s23  ;;  %s5420_s19 = sshll.u32 %s5498_s24, 4  ;;  %s5421_s19 = int_to_ptr.vmem [resolvable:$false] %s5420_s19 }
  0x22   : > { %s5422_s27 = scalar_lea.vmem %s5421_s19, 4096  ;;  %p5423_p11 = scmp.lt.s32.totalorder %s5651_s14, %s5421_s19 }
  0x23   : > { %p5418_p2 = pnand %p5416_p0, %p5402_p1  ;;  %p5424_p4 = scmp.lt.s32.totalorder %s5422_s27, %s5415_s23 }
  0x25   : > { %p5419_p12 = pneg %p5418_p2  ;;  %p5425_p5 = por %p5424_p4, %p5423_p11 }
  0x27   : > { %p5426_p7 = pnand %p5425_p5, %p5419_p12 }
  0x29   : > { %5429 = shalt.err (!%p5426_p7)
}
  0x2a   : > { %s5499_s26 = smov 128   ;;  %s5500_s25 = smov 8  }
  0x2b   : > { %4985 = dma.hbm_to_vmem [thread:$0]  (!%p5647_p13), %s5643_s28, 2048, %s5651_s14, %s5653_s17, %s5499_s26, %s5499_s26, %s5500_s25  }
  0x2c   : > { %p4569_p9 = scmp.ge.s32.totalorder %s5496_s12, 1  ;;  %p306_p1 = scmp.lt.s32.totalorder %s5496_s12, 3 }
  0x2e   : > { %p307_p3 = pnand %p4569_p9, %p306_p1 }
  0x30   : > { %310 = sbr.rel (%p307_p3) target bundleno = 1664 (0x680), region = 56 }
  0x37   : > { %s5684_s29 = sand.u32 1, %s5488_s10  }
  0x38   : > { %s8193_s23 = sshll.u32 %s5684_s29, 7  ;;  %s313_s24 = scalar_lea.sflag [#allocation3], %s5684_s29 }
  0x39   : > { %s5690_s19 = scalar_lea.vmem [#allocation2], %s8193_s23 }
  0x3a   : > { %5475 = dma.done.wait (%p5623_p6), %s313_s24, 2048  }
  0x3b   : > { %5477 = vsyncadd (%p5623_p6), %s313_s24, 4294965248  ;;  %v5501_v0 = vmov 0.0   ;;  %v5502_v1 = vmov 0.0|0.0   ;;  %v370_v2 = vld [vmem:[%s8183_s1 + $0x8] sm:$0xff]  ;;  %v372_v3 = vld [vmem:[%s8183_s1 + $0x18] sm:$0xff]  ;;  %vm389_vm0 = vcmask 261120  }
  0x3c   : > { %502 = vmatprep.mubr.f32.mxu0 %v5501_v0  ;;  %4906 = vmatprep.subr.bf16.mxu1 %v5502_v1  ;;  %v369_v4 = vld [vmem:[%s8183_s1] sm:$0xff]  ;;  %v4898_v5 = vpack.c.bf16 %v372_v3, %v370_v2  ;;  %v371_v6 = vld [vmem:[%s8183_s1 + $0x10] sm:$0xff]  ;;  %v374_v7 = vld [vmem:[%s8183_s1 + $0x28] sm:$0xff]  ;;  %vm790_vm1 = vcmask 523264   ;;  %s8561_s25 = sshll.u32 %s5684_s29, 7  ;;  %p8620_p11 = scmp.ne.s32.totalorder %s8285_s21, 0 }
  0x3d   : > { %v376_v8 = vld [vmem:[%s8183_s1 + $0x38] sm:$0xff]  ;;  %v4900_v9 = vpack.c.bf16 %v371_v6, %v369_v4  ;;  %v373_v11 = vld [vmem:[%s8183_s1 + $0x20] sm:$0xff]  ;;  %v375_v12 = vld [vmem:[%s8183_s1 + $0x30] sm:$0xff]  ;;  %s7963_s24 = scalar_lea.vmem [#allocation5], %s8561_s25  ;;  %s5527_s20 = smov [#allocation5]  }
  0x3e   : > { %v4902_v10 = vpack.c.bf16 %v376_v8, %v374_v7  ;;  %4899 = vmatprep.subr.bf16.mxu0 %v4898_v5  ;;  %v4904_v13 = vpack.c.bf16 %v375_v12, %v373_v11  ;;  %v984_v14 = vld [vmem:[%s8187_s5] sm:$0xff]  ;;  %v985_v16 = vld [vmem:[%s8187_s5 + $0x8] sm:$0xff]  ;;  %v986_v17 = vld [vmem:[%s8187_s5 + $0x10] sm:$0xff]  ;;  %s4490_s16 = sshll.u32 %s7963_s24, 4  ;;  %s5434_s25 = sshll.u32 %s5527_s20, 4  ;;  %s8136_s16 = int_to_ptr.vmem [resolvable:$true] %s4490_s16  ;;  %s5435_s25 = int_to_ptr.vmem [resolvable:$false] %s5434_s25 }
  0x3f   : > { %4901 = vmatpush1.bf16.msra.mxu0 %v4900_v9  ;;  %v5726_v15 = vld [vmem:[%s5690_s19] sm:$0xff]  ;;  %v5734_v18 = vpack.c.bf16 %v985_v16, %v984_v14  ;;  %v987_v19 = vld [vmem:[%s8187_s5 + $0x18] sm:$0xff]  ;;  %v760_v21 = vld [vmem:[%s8185_s3 + $0x8] sm:$0xff]  ;;  %v379_v14 = vlaneseq  ;;  %s5430_s23 = scalar_lea.vmem %s8136_s16, 2048  ;;  %s5436_s28 = scalar_lea.vmem %s5435_s25, 4096 }
  0x40   : > { %4903 = vmatprep.subr.bf16.mxu0 %v4902_v10  ;;  %v759_v20 = vld [vmem:[%s8185_s3] sm:$0xff]  ;;  %v5745_v22 = vpack.c.bf16 %v987_v19, %v986_v17  ;;  %v761_v24 = vld [vmem:[%s8185_s3 + $0x10] sm:$0xff]  ;;  %v762_v25 = vld [vmem:[%s8185_s3 + $0x18] sm:$0xff]  ;;  %p5431_p6 = scmp.ne.s32.totalorder %s8136_s16, %s5430_s23  ;;  %p5437_p8 = scmp.lt.s32.totalorder %s8136_s16, %s5435_s25 }
  0x41   : > { %v4907_v23 = vpack.c.bf16 %v760_v21, %v759_v20  ;;  %v5758_v26 = vld [vmem:[%s5690_s19 + $0x8] sm:$0xff]  ;;  %v4910_v27 = vpack.c.bf16 %v762_v25, %v761_v24  ;;  %v763_v28 = vld [vmem:[%s8185_s3 + $0x20] sm:$0xff]  ;;  %v5773_v30 = vld [vmem:[%s5690_s19 + $0x10] sm:$0xff]  ;;  %p5438_p10 = scmp.lt.s32.totalorder %s5436_s28, %s5430_s23 }
  0x42   : > { %v764_v29 = vld [vmem:[%s8185_s3 + $0x28] sm:$0xff]  ;;  %v765_v32 = vld [vmem:[%s8185_s3 + $0x30] sm:$0xff]  ;;  %v766_v33 = vld [vmem:[%s8185_s3 + $0x38] sm:$0xff]  ;;  %p5432_p12 = pnand %p5431_p6, %p8620_p11 }
  0x43   : > { %4905 = vmatpush1.bf16.msra.mxu0 %v4904_v13  ;;  %4908 = vmatpush1.bf16.msra.mxu1 %v4907_v23  ;;  %v4913_v31 = vpack.c.bf16 %v764_v29, %v763_v28  ;;  %v356_v34 = vld [vmem:[%s5690_s19 + $0x18] sm:$0xff]  ;;  %v4916_v35 = vpack.c.bf16 %v766_v33, %v765_v32  ;;  %v767_v36 = vld [vmem:[%s8185_s3 + $0x40] sm:$0xff]  ;;  %v768_v37 = vld [vmem:[%s8185_s3 + $0x48] sm:$0xff]  ;;  %p5439_p0 = por %p5438_p10, %p5437_p8 }
  0x44   : > { %4943 = vmatprep.subr.bf16.mxu0 %v5734_v18  ;;  %4909 = vmatprep.subr.bf16.mxu1 %v5502_v1  ;;  %v357_v38 = vld [vmem:[%s5690_s19 + $0x20] sm:$0xff]  ;;  %v4919_v39 = vpack.c.bf16 %v768_v37, %v767_v36  ;;  %v769_v40 = vld [vmem:[%s8185_s3 + $0x50] sm:$0xff]  ;;  %v770_v41 = vld [vmem:[%s8185_s3 + $0x58] sm:$0xff]  ;;  %p5433_p13 = pneg %p5432_p12 }
  0x45   : > { %v358_v42 = vld [vmem:[%s5690_s19 + $0x28] sm:$0xff]  ;;  %v4922_v43 = vpack.c.bf16 %v770_v41, %v769_v40  ;;  %v771_v44 = vld [vmem:[%s8185_s3 + $0x60] sm:$0xff]  ;;  %v359_v46 = vld [vmem:[%s5690_s19 + $0x30] sm:$0xff] }
  0x46   : > { %4572 = vmatmul.mubr.msk.f32.vlgmr.msra.gmra.mrb[0].mxu0 %vm389_vm0, %v5726_v15  ;;  %v772_v45 = vld [vmem:[%s8185_s3 + $0x68] sm:$0xff]  ;;  %v360_v48 = vld [vmem:[%s5690_s19 + $0x38] sm:$0xff]  ;;  %v361_v49 = vld [vmem:[%s5690_s19 + $0x40] sm:$0xff]  ;;  %p5440_p2 = pnand %p5439_p0, %p5433_p13 }
  0x47   : > { %508 = vmatprep.mubr.f32.mxu0 %v5501_v0  ;;  %4945 = vmatpush3.bf16.msra.mxu0 %v5734_v18  ;;  %v4925_v47 = vpack.c.bf16 %v772_v45, %v771_v44  ;;  %v362_v50 = vld [vmem:[%s5690_s19 + $0x48] sm:$0xff]  ;;  %v5831_v51 = vld [vmem:[%s5690_s19 + $0x50] sm:$0xff]  ;;  %v5837_v52 = vld [vmem:[%s5690_s19 + $0x58] sm:$0xff] }
  0x48   : > { %4947 = vmatprep.subr.bf16.mxu0 %v5745_v22  ;;  %4911 = vmatpush1.bf16.msra.mxu1 %v4910_v27  ;;  %v5843_v53 = vld [vmem:[%s5690_s19 + $0x60] sm:$0xff]  ;;  %v5849_v54 = vld [vmem:[%s5690_s19 + $0x68] sm:$0xff]  ;;  %v5855_v55 = vld [vmem:[%s5690_s19 + $0x70] sm:$0xff] }
  0x49   : > { %4912 = vmatprep.subr.bf16.mxu1 %v5502_v1  ;;  %v5861_v56 = vld [vmem:[%s5690_s19 + $0x78] sm:$0xff]  ;;  %v773_v57 = vld [vmem:[%s8185_s3 + $0x70] sm:$0xff]  ;;  %v775_v60 = vld [vmem:[%s8185_s3 + $0x80] sm:$0xff]  ;;  %s4689_s19 = sshll.u32 %s5601_s13, 11  ;;  %s4477_s13 = scalar_lea.sflag [#allocation4], %s5684_s29 }
  0x4a   : > { %4573 = vmatmul.mubr.msk.f32.gmra.mrb[2].mxu0 %vm389_vm0, %v5758_v26  ;;  %v774_v58 = vld [vmem:[%s8185_s3 + $0x78] sm:$0xff]  ;;  %v776_v61 = vld [vmem:[%s8185_s3 + $0x88] sm:$0xff]  ;;  %v777_v63 = vld [vmem:[%s8185_s3 + $0x90] sm:$0xff]  ;;  %s8134_s26 = scalar_lea.hbm %s8191_s9, %s4689_s19 }
  0x4b   : > { %514 = vmatprep.mubr.f32.mxu0 %v5501_v0  ;;  %4949 = vmatpush3.bf16.msra.mxu0 %v5745_v22  ;;  %v4928_v59 = vpack.c.bf16 %v774_v58, %v773_v57  ;;  %v4931_v62 = vpack.c.bf16 %v776_v61, %v775_v60  ;;  %v779_v3 = vld [vmem:[%s8185_s3 + $0xa0] sm:$0xff]  ;;  %v780_v4 = vld [vmem:[%s8185_s3 + $0xa8] sm:$0xff]  ;;  %v781_v6 = vld [vmem:[%s8185_s3 + $0xb0] sm:$0xff] }
  0x4c   : > { %4914 = vmatpush1.bf16.msra.mxu1 %v4913_v31  ;;  %v4937_v5 = vpack.c.bf16 %v780_v4, %v779_v3  ;;  %v782_v7 = vld [vmem:[%s8185_s3 + $0xb8] sm:$0xff]  ;;  %v1220_v9 = vld [vmem:[%s8189_s7] sm:$0xff]  ;;  %v1222_v10 = vld [vmem:[%s8189_s7 + $0x10] sm:$0xff] }
  0x4d   : > { %4915 = vmatprep.subr.bf16.mxu1 %v5502_v1  ;;  %v4940_v8 = vpack.c.bf16 %v782_v7, %v781_v6  ;;  %v1223_v12 = vld [vmem:[%s8189_s7 + $0x18] sm:$0xff]  ;;  %v377_v17 = vld [vmem:[%s8184_s2] sm:$0x3] }
  0x4e   : > { %4574 = vmatmul.mubr.msk.f32.gmra.mrb[4].mxu0 %vm389_vm0, %v5773_v30  ;;  %v4954_v13 = vpack.c.bf16 %v1223_v12, %v1222_v10 }
  0x4f   : > { %520 = vmatprep.mubr.f32.mxu0 %v5501_v0 }
  0x50   : > { %4917 = vmatpush1.bf16.msra.mxu1 %v4916_v35 }
  0x51   : > { %4918 = vmatprep.subr.bf16.mxu1 %v5502_v1 }
  0x52   : > { %4575 = vmatmul.mubr.msk.f32.gmra.mrb[6].mxu0 %vm389_vm0, %v356_v34 }
  0x53   : > { %526 = vmatprep.mubr.f32.mxu0 %v5501_v0 }
  0x54   : > { %4920 = vmatpush1.bf16.msra.mxu1 %v4919_v39 }
  0x55   : > { %4921 = vmatprep.subr.bf16.mxu1 %v5502_v1 }
  0x56   : > { %4576 = vmatmul.mubr.msk.f32.gmra.mrb[8].mxu0 %vm389_vm0, %v357_v38 }
  0x57   : > { %532 = vmatprep.mubr.f32.mxu0 %v5501_v0 }
  0x58   : > { %4923 = vmatpush1.bf16.msra.mxu1 %v4922_v43 }
  0x59   : > { %4924 = vmatprep.subr.bf16.mxu1 %v5502_v1 }
  0x5a   : > { %4577 = vmatmul.mubr.msk.f32.gmra.mrb[10].mxu0 %vm389_vm0, %v358_v42 }
  0x5b   : > { %538 = vmatprep.mubr.f32.mxu0 %v5501_v0 }
  0x5c   : > { %4926 = vmatpush1.bf16.msra.mxu1 %v4925_v47 }
  0x5d   : > { %4927 = vmatprep.subr.bf16.mxu1 %v5502_v1 }
  0x5e   : > { %4578 = vmatmul.mubr.msk.f32.gmra.mrb[12].mxu0 %vm389_vm0, %v359_v46 }
  0x5f   : > { %544 = vmatprep.mubr.f32.mxu0 %v5501_v0 }
  0x60   : > { %4929 = vmatpush1.bf16.msra.mxu1 %v4928_v59 }
  0x61   : > { %4930 = vmatprep.subr.bf16.mxu1 %v5502_v1 }
  0x62   : > { %4579 = vmatmul.mubr.msk.f32.gmra.mrb[14].mxu0 %vm389_vm0, %v360_v48 }
  0x63   : > { %550 = vmatprep.mubr.f32.mxu0 %v5501_v0 }
  0x64   : > { %4932 = vmatpush1.bf16.msra.mxu1 %v4931_v62 }
  0x65   : > { %4933 = vmatprep.subr.bf16.mxu1 %v5502_v1 }
  0x66   : > { %4580 = vmatmul.mubr.msk.f32.gmra.mrb[16].mxu0 %vm389_vm0, %v361_v49 }
  0x67   : > { %556 = vmatprep.mubr.f32.mxu0 %v5501_v0 }
  0x6a   : > { %4581 = vmatmul.mubr.msk.f32.gmra.mrb[18].mxu0 %vm389_vm0, %v362_v50 }
  0x6b   : > { %562 = vmatprep.mubr.f32.mxu0 %v5501_v0 }
  0x6e   : > { %4582 = vmatmul.mubr.msk.f32.gmra.mrb[20].mxu0 %vm389_vm0, %v5831_v51 }
  0x6f   : > { %568 = vmatprep.mubr.f32.mxu0 %v5501_v0 }
  0x72   : > { %4583 = vmatmul.mubr.msk.f32.gmra.mrb[22].mxu0 %vm389_vm0, %v5837_v52 }
  0x73   : > { %574 = vmatprep.mubr.f32.mxu0 %v5501_v0 }
  0x76   : > { %4584 = vmatmul.mubr.msk.f32.gmra.mrb[24].mxu0 %vm389_vm0, %v5843_v53 }
  0x77   : > { %580 = vmatprep.mubr.f32.mxu0 %v5501_v0 }
  0x7a   : > { %4585 = vmatmul.mubr.msk.f32.gmra.mrb[26].mxu0 %vm389_vm0, %v5849_v54 }
  0x7b   : > { %586 = vmatprep.mubr.f32.mxu0 %v5501_v0 }
  0x7e   : > { %4586 = vmatmul.mubr.msk.f32.gmra.mrb[28].mxu0 %vm389_vm0, %v5855_v55 }
  0x7f   : > { %592 = vmatprep.mubr.f32.mxu0 %v5501_v0  ;;  %v778_v0 = vld [vmem:[%s8185_s3 + $0x98] sm:$0xff] }
  0x80   : > { %v4934_v2 = vpack.c.bf16 %v778_v0, %v777_v63 }
  0x82   : > { %4587 = vmatmul.mubr.msk.f32.gmra.mrb[30].mxu0 %vm389_vm0, %v5861_v56  ;;  %4935 = vmatpush1.bf16.msra.mxu1 %v4934_v2 }
  0x83   : > { %4778 = vmatprep.mubr.msk.f32.mxu0 %vm389_vm0, %v5726_v15  ;;  %4936 = vmatprep.subr.bf16.mxu1 %v5502_v1  ;;  %v380_v15 = vshrl.u32 %v379_v14, 7 }
  0x85   : > { %v381_v16 = vsub.s32 0, %v380_v15  ;;  %v385_v19 = vsub.s32 1, %v380_v15 }
  0x86   : > { %4779 = vmatmul.mubr.msk.f32.vlgmr.msra.gmra.mrb[32].mxu0 %vm389_vm0, %v5758_v26  ;;  %4938 = vmatpush1.bf16.msra.mxu1 %v4937_v5 }
  0x87   : > { %4781 = vmatprep.mubr.msk.f32.mxu0 %vm389_vm0, %v5773_v30  ;;  %4939 = vmatprep.subr.bf16.mxu1 %v5502_v1  ;;  %v1221_v1 = vld [vmem:[%s8189_s7 + $0x8] sm:$0xff]  ;;  %v5928_v20 = vrot.slane %v377_v17, %v381_v16  ;;  %v5930_v21 = vrot.slane %v377_v17, %v385_v19 }
  0x88   : > { %v4950_v11 = vpack.c.bf16 %v1221_v1, %v1220_v9 }
  0x8a   : > { %4782 = vmatmul.mubr.msk.f32.gmra.mrb[34].mxu0 %vm389_vm0, %v356_v34  ;;  %4941 = vmatpush1.bf16.msra.mxu1 %v4940_v8 }
  0x8b   : > { %4784 = vmatprep.mubr.msk.f32.mxu0 %vm389_vm0, %v357_v38  ;;  %4974 = vmatprep.subr.bf16.mxu1 %v5734_v18 }
  0x8c   : > { %4951 = vmatprep.subr.bf16.mxu0 %v4950_v11 }
  0x8d   : > { %4953 = vmatpush3.bf16.msra.mxu0 %v4950_v11 }
  0x8e   : > { %4785 = vmatmul.mubr.msk.f32.gmra.mrb[36].mxu0 %vm389_vm0, %v358_v42  ;;  %4955 = vmatprep.subr.bf16.mxu0 %v4954_v13 }
  0x8f   : > { %4787 = vmatprep.mubr.msk.f32.mxu0 %vm389_vm0, %v359_v46 }
  0x91   : > { %4957 = vmatpush3.bf16.msra.mxu0 %v4954_v13 }
  0x92   : > { %4788 = vmatmul.mubr.msk.f32.gmra.mrb[38].mxu0 %vm389_vm0, %v360_v48 }
  0x93   : > { %4790 = vmatprep.mubr.msk.f32.mxu0 %vm389_vm0, %v361_v49 }
  0x96   : > { %4791 = vmatmul.mubr.msk.f32.gmra.mrb[40].mxu0 %vm389_vm0, %v362_v50 }
 0x119   : > { %v504_v23 = vpop.f32.mrb[0].mxu0 }
 0x11a   : > { %v505_v24 = vadd.f32 %v504_v23, %v5928_v20  ;;  %v506_v25 = vpop.f32.mrb[1].mxu0 }
 0x11b   : > { %v507_v26 = vadd.f32 %v506_v25, %v5930_v21 }
 0x11c   : > { %v631_v27 = vmul.f32 0.70710677, %v505_v24  ;;  %v599_v61 = vmul.f32 0.5, %v505_v24 }
 0x11d   : > { %v632_v28 = vmul.f32 0.70710677, %v507_v26  ;;  %v510_v29 = vpop.f32.mrb[2].mxu0  ;;  %v600_v57 = vmul.f32 0.5, %v507_v26 }
 0x11e   : > { %5268 = verf.f32 %v631_v27  ;;  %v511_v30 = vadd.f32 %v510_v29, %v5928_v20  ;;  %v512_v31 = vpop.f32.mrb[3].mxu0 }
 0x11f   : > { %5270 = verf.f32 %v632_v28  ;;  %v513_v32 = vadd.f32 %v512_v31, %v5930_v21 }
 0x120   : > { %v633_v33 = vmul.f32 0.70710677, %v511_v30  ;;  %v601_v62 = vmul.f32 0.5, %v511_v30 }
 0x121   : > { %v634_v34 = vmul.f32 0.70710677, %v513_v32  ;;  %v516_v35 = vpop.f32.mrb[4].mxu0  ;;  %v602_v2 = vmul.f32 0.5, %v513_v32 }
 0x122   : > { %5272 = verf.f32 %v633_v33  ;;  %v517_v36 = vadd.f32 %v516_v35, %v5928_v20  ;;  %v518_v37 = vpop.f32.mrb[5].mxu0 }
 0x123   : > { %5274 = verf.f32 %v634_v34  ;;  %v519_v38 = vadd.f32 %v518_v37, %v5930_v21 }
 0x124   : > { %v635_v39 = vmul.f32 0.70710677, %v517_v36  ;;  %v603_v13 = vmul.f32 0.5, %v517_v36 }
 0x125   : > { %v636_v40 = vmul.f32 0.70710677, %v519_v38  ;;  %v522_v41 = vpop.f32.mrb[6].mxu0  ;;  %v604_v17 = vmul.f32 0.5, %v519_v38 }
 0x126   : > { %5276 = verf.f32 %v635_v39  ;;  %v523_v42 = vadd.f32 %v522_v41, %v5928_v20  ;;  %v524_v43 = vpop.f32.mrb[7].mxu0 }
 0x127   : > { %5278 = verf.f32 %v636_v40  ;;  %v525_v44 = vadd.f32 %v524_v43, %v5930_v21 }
 0x128   : > { %v5269_v45 = vpop.eup %5268  ;;  %v637_v46 = vmul.f32 0.70710677, %v523_v42  ;;  %v605_v31 = vmul.f32 0.5, %v523_v42 }
 0x129   : > { %v5271_v47 = vpop.eup %5270  ;;  %v695_v48 = vadd.f32 1.0, %v5269_v45  ;;  %v638_v49 = vmul.f32 0.70710677, %v525_v44  ;;  %v528_v50 = vpop.f32.mrb[8].mxu0  ;;  %v606_v34 = vmul.f32 0.5, %v525_v44 }
 0x12a   : > { %v696_v58 = vadd.f32 1.0, %v5271_v47  ;;  %5280 = verf.f32 %v637_v46  ;;  %v529_v59 = vadd.f32 %v528_v50, %v5928_v20  ;;  %v530_v60 = vpop.f32.mrb[9].mxu0 }
 0x12b   : > { %5282 = verf.f32 %v638_v49  ;;  %v531_v63 = vadd.f32 %v530_v60, %v5930_v21  ;;  %v727_v7 = vmul.f32 %v695_v48, %v599_v61 }
 0x12c   : > { %v5273_v0 = vpop.eup %5272  ;;  %v728_v3 = vmul.f32 %v696_v58, %v600_v57  ;;  %v639_v4 = vmul.f32 0.70710677, %v529_v59  ;;  %v607_v45 = vmul.f32 0.5, %v529_v59 }
 0x12d   : > { %v5275_v5 = vpop.eup %5274  ;;  %v697_v6 = vadd.f32 1.0, %v5273_v0  ;;  %v640_v8 = vmul.f32 0.70710677, %v531_v63  ;;  %v534_v9 = vpop.f32.mrb[10].mxu0 }
 0x12e   : > { %v698_v1 = vadd.f32 1.0, %v5275_v5  ;;  %4589 = vmatprep.mubr.msk.f32.mxu1 %vm790_vm1, %v728_v3  ;;  %5284 = verf.f32 %v639_v4  ;;  %v535_v10 = vadd.f32 %v534_v9, %v5928_v20  ;;  %v536_v11 = vpop.f32.mrb[11].mxu0 }
 0x12f   : > { %904 = vmatmul.mubr.f32.vlgmr.msra.gmra.mrb[0].mxu1 %v727_v7  ;;  %v729_v12 = vmul.f32 %v697_v6, %v601_v62  ;;  %5286 = verf.f32 %v640_v8  ;;  %v537_v14 = vadd.f32 %v536_v11, %v5930_v21 }
 0x130   : > { %v5277_v15 = vpop.eup %5276  ;;  %v730_v16 = vmul.f32 %v698_v1, %v602_v2  ;;  %v641_v19 = vmul.f32 0.70710677, %v535_v10  ;;  %4976 = vmatpush3.bf16.msra.mxu1 %v5734_v18  ;;  %v609_v59 = vmul.f32 0.5, %v535_v10 }
 0x131   : > { %v5279_v23 = vpop.eup %5278  ;;  %v699_v24 = vadd.f32 1.0, %v5277_v15  ;;  %v642_v25 = vmul.f32 0.70710677, %v537_v14  ;;  %v540_v26 = vpop.f32.mrb[12].mxu0  ;;  %4975 = vmatprep.subr.bf16.mxu1 %v5745_v22  ;;  %v610_v4 = vmul.f32 0.5, %v537_v14 }
 0x132   : > { %4590 = vmatprep.mubr.msk.f32.mxu1 %vm790_vm1, %v730_v16  ;;  %v700_v27 = vadd.f32 1.0, %v5279_v23  ;;  %5288 = verf.f32 %v641_v19  ;;  %v541_v28 = vadd.f32 %v540_v26, %v5928_v20  ;;  %v542_v29 = vpop.f32.mrb[13].mxu0 }
 0x133   : > { %909 = vmatmul.mubr.f32.gmra.mrb[2].mxu1 %v729_v12  ;;  %v731_v30 = vmul.f32 %v699_v24, %v603_v13  ;;  %5290 = verf.f32 %v642_v25  ;;  %v543_v32 = vadd.f32 %v542_v29, %v5930_v21 }
 0x134   : > { %v5281_v18 = vpop.eup %5280  ;;  %v732_v33 = vmul.f32 %v700_v27, %v604_v17  ;;  %v643_v35 = vmul.f32 0.70710677, %v541_v28  ;;  %4977 = vmatpush3.bf16.msra.mxu1 %v5745_v22  ;;  %v608_v22 = vmul.f32 0.5, %v531_v63  ;;  %v611_v10 = vmul.f32 0.5, %v541_v28 }
 0x135   : > { %v5283_v36 = vpop.eup %5282  ;;  %v701_v37 = vadd.f32 1.0, %v5281_v18  ;;  %v644_v38 = vmul.f32 0.70710677, %v543_v32  ;;  %v546_v39 = vpop.f32.mrb[14].mxu0  ;;  %v612_v17 = vmul.f32 0.5, %v543_v32 }
 0x136   : > { %4591 = vmatprep.mubr.msk.f32.mxu1 %vm790_vm1, %v732_v33  ;;  %v702_v40 = vadd.f32 1.0, %v5283_v36  ;;  %5292 = verf.f32 %v643_v35  ;;  %v547_v41 = vadd.f32 %v546_v39, %v5928_v20  ;;  %v548_v42 = vpop.f32.mrb[15].mxu0 }
 0x137   : > { %914 = vmatmul.mubr.f32.gmra.mrb[4].mxu1 %v731_v30  ;;  %v733_v43 = vmul.f32 %v701_v37, %v605_v31  ;;  %5294 = verf.f32 %v644_v38  ;;  %v549_v44 = vadd.f32 %v548_v42, %v5930_v21 }
 0x138   : > { %v5285_v46 = vpop.eup %5284  ;;  %v734_v47 = vmul.f32 %v702_v40, %v606_v34  ;;  %v645_v48 = vmul.f32 0.70710677, %v547_v41  ;;  %v613_v28 = vmul.f32 0.5, %v547_v41 }
 0x139   : > { %v5287_v49 = vpop.eup %5286  ;;  %v703_v50 = vadd.f32 1.0, %v5285_v46  ;;  %v646_v57 = vmul.f32 0.70710677, %v549_v44  ;;  %v552_v58 = vpop.f32.mrb[16].mxu0  ;;  %v614_v34 = vmul.f32 0.5, %v549_v44 }
 0x13a   : > { %4592 = vmatprep.mubr.msk.f32.mxu1 %vm790_vm1, %v734_v47  ;;  %v704_v60 = vadd.f32 1.0, %v5287_v49  ;;  %5296 = verf.f32 %v645_v48  ;;  %v553_v61 = vadd.f32 %v552_v58, %v5928_v20  ;;  %v554_v62 = vpop.f32.mrb[17].mxu0 }
 0x13b   : > { %919 = vmatmul.mubr.f32.gmra.mrb[6].mxu1 %v733_v43  ;;  %5298 = verf.f32 %v646_v57  ;;  %v555_v0 = vadd.f32 %v554_v62, %v5930_v21  ;;  %v735_v2 = vmul.f32 %v703_v50, %v607_v45 }
 0x13c   : > { %v5289_v3 = vpop.eup %5288  ;;  %v736_v63 = vmul.f32 %v704_v60, %v608_v22  ;;  %v647_v5 = vmul.f32 0.70710677, %v553_v61  ;;  %v615_v41 = vmul.f32 0.5, %v553_v61 }
 0x13d   : > { %v5291_v6 = vpop.eup %5290  ;;  %v705_v7 = vadd.f32 1.0, %v5289_v3  ;;  %v648_v8 = vmul.f32 0.70710677, %v555_v0  ;;  %v558_v9 = vpop.f32.mrb[18].mxu0  ;;  %v616_v22 = vmul.f32 0.5, %v555_v0 }
 0x13e   : > { %v706_v1 = vadd.f32 1.0, %v5291_v6  ;;  %5300 = verf.f32 %v647_v5  ;;  %v559_v11 = vadd.f32 %v558_v9, %v5928_v20  ;;  %v560_v12 = vpop.f32.mrb[19].mxu0  ;;  %4593 = vmatprep.mubr.msk.f32.mxu1 %vm790_vm1, %v736_v63 }
 0x13f   : > { %5302 = verf.f32 %v648_v8  ;;  %v561_v13 = vadd.f32 %v560_v12, %v5930_v21  ;;  %924 = vmatmul.mubr.f32.gmra.mrb[8].mxu1 %v735_v2  ;;  %v737_v15 = vmul.f32 %v705_v7, %v609_v59 }
 0x140   : > { %v5293_v16 = vpop.eup %5292  ;;  %v738_v14 = vmul.f32 %v706_v1, %v610_v4  ;;  %v649_v19 = vmul.f32 0.70710677, %v559_v11  ;;  %v617_v61 = vmul.f32 0.5, %v559_v11 }
 0x141   : > { %v5295_v23 = vpop.eup %5294  ;;  %v707_v24 = vadd.f32 1.0, %v5293_v16  ;;  %v650_v25 = vmul.f32 0.70710677, %v561_v13  ;;  %v564_v26 = vpop.f32.mrb[20].mxu0  ;;  %v618_v4 = vmul.f32 0.5, %v561_v13 }
 0x142   : > { %v708_v27 = vadd.f32 1.0, %v5295_v23  ;;  %5304 = verf.f32 %v649_v19  ;;  %v565_v29 = vadd.f32 %v564_v26, %v5928_v20  ;;  %v566_v30 = vpop.f32.mrb[21].mxu0  ;;  %4594 = vmatprep.mubr.msk.f32.mxu1 %vm790_vm1, %v738_v14 }
 0x143   : > { %5306 = verf.f32 %v650_v25  ;;  %v567_v31 = vadd.f32 %v566_v30, %v5930_v21  ;;  %929 = vmatmul.mubr.f32.gmra.mrb[10].mxu1 %v737_v15  ;;  %v739_v18 = vmul.f32 %v707_v24, %v611_v10 }
 0x144   : > { %v5297_v33 = vpop.eup %5296  ;;  %v740_v32 = vmul.f32 %v708_v27, %v612_v17  ;;  %v651_v35 = vmul.f32 0.70710677, %v565_v29  ;;  %v619_v11 = vmul.f32 0.5, %v565_v29 }
 0x145   : > { %v5299_v36 = vpop.eup %5298  ;;  %v709_v37 = vadd.f32 1.0, %v5297_v33  ;;  %v652_v38 = vmul.f32 0.70710677, %v567_v31  ;;  %v570_v39 = vpop.f32.mrb[22].mxu0  ;;  %v620_v17 = vmul.f32 0.5, %v567_v31 }
 0x146   : > { %v710_v40 = vadd.f32 1.0, %v5299_v36  ;;  %5308 = verf.f32 %v651_v35  ;;  %v571_v42 = vadd.f32 %v570_v39, %v5928_v20  ;;  %v572_v43 = vpop.f32.mrb[23].mxu0  ;;  %4595 = vmatprep.mubr.msk.f32.mxu1 %vm790_vm1, %v740_v32 }
 0x147   : > { %5310 = verf.f32 %v652_v38  ;;  %v573_v45 = vadd.f32 %v572_v43, %v5930_v21  ;;  %934 = vmatmul.mubr.f32.gmra.mrb[12].mxu1 %v739_v18  ;;  %v741_v46 = vmul.f32 %v709_v37, %v613_v28 }
 0x148   : > { %v5301_v47 = vpop.eup %5300  ;;  %v742_v44 = vmul.f32 %v710_v40, %v614_v34  ;;  %v653_v48 = vmul.f32 0.70710677, %v571_v42  ;;  %v621_v29 = vmul.f32 0.5, %v571_v42 }
 0x149   : > { %v5303_v49 = vpop.eup %5302  ;;  %v711_v50 = vadd.f32 1.0, %v5301_v47  ;;  %v654_v57 = vmul.f32 0.70710677, %v573_v45  ;;  %v576_v58 = vpop.f32.mrb[24].mxu0  ;;  %v622_v34 = vmul.f32 0.5, %v573_v45 }
 0x14a   : > { %v712_v60 = vadd.f32 1.0, %v5303_v49  ;;  %5312 = verf.f32 %v653_v48  ;;  %v577_v62 = vadd.f32 %v576_v58, %v5928_v20  ;;  %v578_v59 = vpop.f32.mrb[25].mxu0  ;;  %4596 = vmatprep.mubr.msk.f32.mxu1 %vm790_vm1, %v742_v44  ;;  %v5981_v45 = vld [vmem:[%s8188_s6] ss:$0 sm:$0xff] }
 0x14b   : > { %5314 = verf.f32 %v654_v57  ;;  %v579_v2 = vadd.f32 %v578_v59, %v5930_v21  ;;  %939 = vmatmul.mubr.f32.gmra.mrb[14].mxu1 %v741_v46  ;;  %v743_v3 = vmul.f32 %v711_v50, %v615_v41 }
 0x14c   : > { %v5305_v63 = vpop.eup %5304  ;;  %v744_v0 = vmul.f32 %v712_v60, %v616_v22  ;;  %v655_v5 = vmul.f32 0.70710677, %v577_v62  ;;  %v623_v42 = vmul.f32 0.5, %v577_v62 }
 0x14d   : > { %v5307_v6 = vpop.eup %5306  ;;  %v713_v7 = vadd.f32 1.0, %v5305_v63  ;;  %v656_v8 = vmul.f32 0.70710677, %v579_v2  ;;  %v582_v9 = vpop.f32.mrb[26].mxu0  ;;  %v624_v48 = vmul.f32 0.5, %v579_v2 }
 0x14e   : > { %v714_v1 = vadd.f32 1.0, %v5307_v6  ;;  %5316 = verf.f32 %v655_v5  ;;  %v583_v12 = vadd.f32 %v582_v9, %v5928_v20  ;;  %v584_v10 = vpop.f32.mrb[27].mxu0  ;;  %4597 = vmatprep.mubr.msk.f32.mxu1 %vm790_vm1, %v744_v0 }
 0x14f   : > { %5318 = verf.f32 %v656_v8  ;;  %v585_v15 = vadd.f32 %v584_v10, %v5930_v21  ;;  %944 = vmatmul.mubr.f32.gmra.mrb[16].mxu1 %v743_v3  ;;  %v745_v16 = vmul.f32 %v713_v7, %v617_v61 }
 0x150   : > { %v5309_v14 = vpop.eup %5308  ;;  %v746_v13 = vmul.f32 %v714_v1, %v618_v4  ;;  %v657_v19 = vmul.f32 0.70710677, %v583_v12  ;;  %v625_v59 = vmul.f32 0.5, %v583_v12 }
 0x151   : > { %v5311_v23 = vpop.eup %5310  ;;  %v715_v24 = vadd.f32 1.0, %v5309_v14  ;;  %v658_v25 = vmul.f32 0.70710677, %v585_v15  ;;  %v588_v26 = vpop.f32.mrb[28].mxu0  ;;  %v626_v0 = vmul.f32 0.5, %v585_v15 }
 0x152   : > { %v716_v27 = vadd.f32 1.0, %v5311_v23  ;;  %5320 = verf.f32 %v657_v19  ;;  %v589_v30 = vadd.f32 %v588_v26, %v5928_v20  ;;  %v590_v28 = vpop.f32.mrb[29].mxu0  ;;  %4598 = vmatprep.mubr.msk.f32.mxu1 %vm790_vm1, %v746_v13 }
 0x153   : > { %5322 = verf.f32 %v658_v25  ;;  %v591_v18 = vadd.f32 %v590_v28, %v5930_v21  ;;  %949 = vmatmul.mubr.f32.gmra.mrb[18].mxu1 %v745_v16  ;;  %v747_v33 = vmul.f32 %v715_v24, %v619_v11 }
 0x154   : > { %v5313_v32 = vpop.eup %5312  ;;  %v748_v31 = vmul.f32 %v716_v27, %v620_v17  ;;  %v659_v35 = vmul.f32 0.70710677, %v589_v30  ;;  %v627_v12 = vmul.f32 0.5, %v589_v30 }
 0x155   : > { %v5315_v36 = vpop.eup %5314  ;;  %v717_v37 = vadd.f32 1.0, %v5313_v32  ;;  %v660_v38 = vmul.f32 0.70710677, %v591_v18  ;;  %v594_v39 = vpop.f32.mrb[30].mxu0  ;;  %v628_v13 = vmul.f32 0.5, %v591_v18 }
 0x156   : > { %v718_v40 = vadd.f32 1.0, %v5315_v36  ;;  %5324 = verf.f32 %v659_v35  ;;  %v595_v43 = vadd.f32 %v594_v39, %v5928_v20  ;;  %v596_v41 = vpop.f32.mrb[31].mxu0  ;;  %4599 = vmatprep.mubr.msk.f32.mxu1 %vm790_vm1, %v748_v31 }
 0x157   : > { %5326 = verf.f32 %v660_v38  ;;  %v597_v46 = vadd.f32 %v596_v41, %v5930_v21  ;;  %954 = vmatmul.mubr.f32.gmra.mrb[20].mxu1 %v747_v33  ;;  %v749_v47 = vmul.f32 %v717_v37, %v621_v29 }
 0x158   : > { %v5317_v44 = vpop.eup %5316  ;;  %v750_v22 = vmul.f32 %v718_v40, %v622_v34  ;;  %v661_v49 = vmul.f32 0.70710677, %v595_v43  ;;  %v629_v26 = vmul.f32 0.5, %v595_v43 }
 0x159   : > { %v5319_v50 = vpop.eup %5318  ;;  %v719_v20 = vadd.f32 1.0, %v5317_v44  ;;  %v662_v57 = vmul.f32 0.70710677, %v597_v46  ;;  %v4780_v58 = vpop.f32.mrb[32].mxu0  ;;  %v630_v29 = vmul.f32 0.5, %v597_v46 }
 0x15a   : > { %v720_v60 = vadd.f32 1.0, %v5319_v50  ;;  %5328 = verf.f32 %v661_v49  ;;  %v1067_v62 = vadd.f32 %v4780_v58, %v5981_v45  ;;  %v1061_v21 = vpop.f32.mrb[33].mxu0  ;;  %4600 = vmatprep.mubr.msk.f32.mxu1 %vm790_vm1, %v750_v22 }
 0x15b   : > { %5330 = verf.f32 %v662_v57  ;;  %v1062_v61 = vadd.f32 %v5981_v45, %v1061_v21  ;;  %959 = vmatmul.mubr.f32.gmra.mrb[22].mxu1 %v749_v47  ;;  %v751_v3 = vmul.f32 %v719_v20, %v623_v42 }
 0x15c   : > { %v5321_v63 = vpop.eup %5320  ;;  %v752_v2 = vmul.f32 %v720_v60, %v624_v48  ;;  %v1157_v4 = vmul.f32 0.70710677, %v1067_v62  ;;  %v1141_v18 = vmul.f32 0.5, %v1067_v62 }
 0x15d   : > { %v5323_v5 = vpop.eup %5322  ;;  %v721_v6 = vadd.f32 1.0, %v5321_v63  ;;  %v1156_v7 = vmul.f32 0.70710677, %v1062_v61  ;;  %v4783_v8 = vpop.f32.mrb[34].mxu0  ;;  %v1140_v37 = vmul.f32 0.5, %v1062_v61 }
 0x15e   : > { %v722_v9 = vadd.f32 1.0, %v5323_v5  ;;  %5332 = verf.f32 %v1157_v4  ;;  %v1077_v1 = vadd.f32 %v4783_v8, %v5981_v45  ;;  %v1071_v10 = vpop.f32.mrb[35].mxu0  ;;  %4601 = vmatprep.mubr.msk.f32.mxu1 %vm790_vm1, %v752_v2 }
 0x15f   : > { %5334 = verf.f32 %v1156_v7  ;;  %v1072_v11 = vadd.f32 %v5981_v45, %v1071_v10  ;;  %964 = vmatmul.mubr.f32.gmra.mrb[24].mxu1 %v751_v3  ;;  %v753_v16 = vmul.f32 %v721_v6, %v625_v59 }
 0x160   : > { %v5325_v14 = vpop.eup %5324  ;;  %v754_v15 = vmul.f32 %v722_v9, %v626_v0  ;;  %v1159_v17 = vmul.f32 0.70710677, %v1077_v1  ;;  %v1143_v41 = vmul.f32 0.5, %v1077_v1 }
 0x161   : > { %v5327_v19 = vpop.eup %5326  ;;  %v723_v23 = vadd.f32 1.0, %v5325_v14  ;;  %v1158_v24 = vmul.f32 0.70710677, %v1072_v11  ;;  %v1142_v47 = vmul.f32 0.5, %v1072_v11 }
 0x162   : > { %v724_v25 = vadd.f32 1.0, %v5327_v19  ;;  %5336 = verf.f32 %v1159_v17  ;;  %4602 = vmatprep.mubr.msk.f32.mxu1 %vm790_vm1, %v754_v15 }
 0x163   : > { %5338 = verf.f32 %v1158_v24  ;;  %969 = vmatmul.mubr.f32.gmra.mrb[26].mxu1 %v753_v16  ;;  %v755_v27 = vmul.f32 %v723_v23, %v627_v12  ;;  %v6023_v24 = vld [vmem:[%s8186_s4] ss:$0 sm:$0xff] }
 0x164   : > { %v5329_v30 = vpop.eup %5328  ;;  %v756_v28 = vmul.f32 %v724_v25, %v628_v13 }
 0x165   : > { %v5331_v33 = vpop.eup %5330  ;;  %v725_v32 = vadd.f32 1.0, %v5329_v30 }
 0x166   : > { %v726_v31 = vadd.f32 1.0, %v5331_v33  ;;  %4603 = vmatprep.mubr.msk.f32.mxu1 %vm790_vm1, %v756_v28  ;;  %v8214_v33 = vmov 6  }
 0x167   : > { %974 = vmatmul.mubr.f32.gmra.mrb[28].mxu1 %v755_v27  ;;  %v757_v34 = vmul.f32 %v725_v32, %v629_v26  ;;  %v8194_v32 = vmov 3  }
 0x168   : > { %v5333_v35 = vpop.eup %5332  ;;  %v758_v36 = vmul.f32 %v726_v31, %v630_v29 }
 0x169   : > { %v5335_v38 = vpop.eup %5334  ;;  %v1189_v39 = vadd.f32 1.0, %v5333_v35 }
 0x16a   : > { %v1188_v40 = vadd.f32 1.0, %v5335_v38  ;;  %4604 = vmatprep.mubr.msk.f32.mxu1 %vm790_vm1, %v758_v36 }
 0x16b   : > { %v1205_v43 = vmul.f32 %v1189_v39, %v1141_v18  ;;  %979 = vmatmul.mubr.f32.gmra.mrb[30].mxu1 %v757_v34 }
 0x16c   : > { %v5337_v42 = vpop.eup %5336  ;;  %v1204_v46 = vmul.f32 %v1188_v40, %v1140_v37  ;;  %4793 = vmatprep.mubr.msk.f32.mxu1 %vm389_vm0, %v5831_v51  ;;  %v8204_v51 = vmov 2   ;;  %v8218_v40 = vmov 10  }
 0x16d   : > { %v5339_v44 = vpop.eup %5338  ;;  %v1191_v22 = vadd.f32 1.0, %v5337_v42  ;;  %5055 = vset.pattern.permute.xlu1 %v8204_v51 }
 0x16e   : > { %4810 = vmatprep.mubr.msk.f32.mxu0 %vm389_vm0, %v1204_v46  ;;  %v1190_v48 = vadd.f32 1.0, %v5339_v44 }
 0x16f   : > { %4811 = vmatmul.mubr.msk.f32.vlgmr.msra.gmra.mrb[42].mxu0 %vm389_vm0, %v1205_v43  ;;  %v1207_v49 = vmul.f32 %v1191_v22, %v1143_v41  ;;  %4794 = vmatmul.mubr.msk.f32.vlgmr.msra.gmra.mrb[32].mxu1 %vm389_vm0, %v5837_v52  ;;  %v8198_v52 = vmov 1   ;;  %v8196_v43 = vmov 5  }
 0x170   : > { %v1206_v50 = vmul.f32 %v1190_v48, %v1142_v47  ;;  %4796 = vmatprep.mubr.msk.f32.mxu1 %vm389_vm0, %v5843_v53  ;;  %5054 = vset.pattern.permute.xlu0 %v8198_v52  ;;  %v4786_v53 = vpop.f32.mrb[36].mxu0  ;;  %v8202_v48 = vmov 4  }
 0x171   : > { %v1087_v20 = vadd.f32 %v4786_v53, %v5981_v45  ;;  %v1081_v58 = vpop.f32.mrb[37].mxu0 }
 0x172   : > { %4813 = vmatprep.mubr.msk.f32.mxu0 %vm389_vm0, %v1206_v50  ;;  %v4789_v2 = vpop.f32.mrb[38].mxu0 }
 0x173   : > { %4814 = vmatmul.mubr.msk.f32.gmra.mrb[44].mxu0 %vm389_vm0, %v1207_v49  ;;  %4797 = vmatmul.mubr.msk.f32.gmra.mrb[34].mxu1 %vm389_vm0, %v5849_v54  ;;  %v1161_v57 = vmul.f32 0.70710677, %v1087_v20  ;;  %v1082_v54 = vadd.f32 %v5981_v45, %v1081_v58  ;;  %v1145_v62 = vmul.f32 0.5, %v1087_v20  ;;  %v1097_v0 = vadd.f32 %v4789_v2, %v5981_v45  ;;  %v1091_v5 = vpop.f32.mrb[39].mxu0 }
 0x174   : > { %4799 = vmatprep.mubr.msk.f32.mxu1 %vm389_vm0, %v5855_v55  ;;  %v1092_v6 = vadd.f32 %v5981_v45, %v1091_v5  ;;  %v4792_v15 = vpop.f32.mrb[40].mxu0  ;;  %v8212_v49 = vmov 7   ;;  %v8200_v58 = vmov 8  }
 0x175   : > { %5340 = verf.f32 %v1161_v57  ;;  %v1160_v60 = vmul.f32 0.70710677, %v1082_v54  ;;  %v1163_v4 = vmul.f32 0.70710677, %v1097_v0  ;;  %v1147_v9 = vmul.f32 0.5, %v1097_v0  ;;  %v1101_v17 = vpop.f32.mrb[41].mxu0 }
 0x176   : > { %v1162_v7 = vmul.f32 0.70710677, %v1092_v6  ;;  %v1146_v10 = vmul.f32 0.5, %v1092_v6  ;;  %v1107_v13 = vadd.f32 %v4792_v15, %v5981_v45  ;;  %v1102_v19 = vadd.f32 %v5981_v45, %v1101_v17 }
 0x177   : > { %4800 = vmatmul.mubr.msk.f32.gmra.mrb[36].mxu1 %vm389_vm0, %v5861_v56  ;;  %5342 = verf.f32 %v1160_v60  ;;  %v1144_v56 = vmul.f32 0.5, %v1082_v54  ;;  %v8210_v57 = vmov 9  }
 0x178   : > { %5344 = verf.f32 %v1163_v4  ;;  %v1165_v23 = vmul.f32 0.70710677, %v1107_v13  ;;  %v1164_v25 = vmul.f32 0.70710677, %v1102_v19  ;;  %v1149_v18 = vmul.f32 0.5, %v1107_v13 }
 0x179   : > { %5346 = verf.f32 %v1162_v7  ;;  %v1148_v36 = vmul.f32 0.5, %v1102_v19 }
 0x17a   : > { %5348 = verf.f32 %v1165_v23 }
 0x17b   : > { %5350 = verf.f32 %v1164_v25 }
 0x17f   : > { %v5341_v55 = vpop.eup %5340 }
 0x180   : > { %v1193_v21 = vadd.f32 1.0, %v5341_v55 }
 0x181   : > { %v5343_v59 = vpop.eup %5342 }
 0x182   : > { %v1192_v61 = vadd.f32 1.0, %v5343_v59  ;;  %v1209_v3 = vmul.f32 %v1193_v21, %v1145_v62  ;;  %v5345_v8 = vpop.eup %5344  ;;  %v8208_v62 = vmov 11   ;;  %v8206_v21 = vmov 0  }
 0x183   : > { %v1195_v1 = vadd.f32 1.0, %v5345_v8  ;;  %v5347_v12 = vpop.eup %5346 }
 0x184   : > { %v1208_v63 = vmul.f32 %v1192_v61, %v1144_v56  ;;  %v1194_v11 = vadd.f32 1.0, %v5347_v12  ;;  %v5349_v34 = vpop.eup %5348 }
 0x185   : > { %v1211_v16 = vmul.f32 %v1195_v1, %v1147_v9  ;;  %v5351_v37 = vpop.eup %5350  ;;  %v1197_v38 = vadd.f32 1.0, %v5349_v34 }
 0x186   : > { %4816 = vmatprep.mubr.msk.f32.mxu0 %vm389_vm0, %v1208_v63  ;;  %v1210_v14 = vmul.f32 %v1194_v11, %v1146_v10  ;;  %v1196_v39 = vadd.f32 1.0, %v5351_v37  ;;  %v4641_v37 = vld [vmem:[%s8187_s5 + $0x30] sm:$0xff] }
 0x187   : > { %4817 = vmatmul.mubr.msk.f32.gmra.mrb[46].mxu0 %vm389_vm0, %v1209_v3  ;;  %v1213_v42 = vmul.f32 %v1197_v38, %v1149_v18  ;;  %v4642_v38 = vld [vmem:[%s8187_s5 + $0x38] sm:$0xff] }
 0x188   : > { %4819 = vmatprep.mubr.msk.f32.mxu0 %vm389_vm0, %v1210_v14  ;;  %v1212_v47 = vmul.f32 %v1196_v39, %v1148_v36  ;;  %v4962_v39 = vpack.c.bf16 %v4642_v38, %v4641_v37 }
 0x18b   : > { %4820 = vmatmul.mubr.msk.f32.gmra.mrb[48].mxu0 %vm389_vm0, %v1211_v16 }
 0x18c   : > { %4822 = vmatprep.mubr.msk.f32.mxu0 %vm389_vm0, %v1212_v47 }
 0x18f   : > { %4823 = vmatmul.mubr.msk.f32.gmra.mrb[50].mxu0 %vm389_vm0, %v1213_v42 }
 0x202   : > { %v905_v26 = vpop.f32.mrb[0].mxu1 }
 0x203   : > { %v6026_v27 = vadd.f32 %v6023_v24, %v905_v26  ;;  %v907_v30 = vpop.f32.mrb[1].mxu1 }
 0x205   : > { %1681 = vperm.xlu1 %5055, %v6026_v27   ;;  %1554 = vperm.xlu0 %5054, %v6026_v27   ;;  %v6044_v44 = vadd.f32 1.0, %v6026_v27 }
 0x206   : > { %v910_v28 = vpop.f32.mrb[2].mxu1 }
 0x207   : > { %v912_v29 = vpop.f32.mrb[3].mxu1  ;;  %8288 = vst [vmem:[#allocation8_spill] sm:$0xff] %v6044_v44  ;;  %v6062_v60 = vadd.f32 %v6023_v24, %v910_v28  ;;  %v4639_v28 = vld [vmem:[%s8187_s5 + $0x20] sm:$0xff] }
 0x208   : > { %v4640_v29 = vld [vmem:[%s8187_s5 + $0x28] sm:$0xff] }
 0x209   : > { %5058 = vset.pattern.permute.xlu1 %v8214_v33  ;;  %5056 = vset.pattern.permute.xlu0 %v8194_v32  ;;  %8289 = vst [vmem:[#allocation9_spill] sm:$0xff] %v6062_v60  ;;  %v6087_v59 = vadd.f32 1.0, %v6062_v60  ;;  %v4958_v18 = vpack.c.bf16 %v4640_v29, %v4639_v28 }
 0x20a   : > { %2097 = vperm.xlu1 %5058, %v6026_v27   ;;  %1793 = vperm.xlu0 %5056, %v6026_v27   ;;  %v6034_v31 = vpop.f32.mrb[4].mxu1 }
 0x20b   : > { %v917_v35 = vpop.f32.mrb[5].mxu1  ;;  %v6099_v0 = vadd.f32 %v6023_v24, %v6034_v31  ;;  %4959 = vmatprep.subr.bf16.mxu1 %v4958_v18 }
 0x20c   : > { %4961 = vmatpush3.bf16.msra.mxu1 %v4958_v18 }
 0x20d   : > { %8290 = vst [vmem:[#allocation10_spill] sm:$0xff] %v6099_v0  ;;  %4963 = vmatprep.subr.bf16.mxu1 %v4962_v39 }
 0x20e   : > { %5061 = vset.pattern.permute.xlu1 %v8218_v40  ;;  %5057 = vset.pattern.permute.xlu0 %v8196_v43  ;;  %v6038_v41 = vpop.f32.mrb[6].mxu1 }
 0x20f   : > { %2513 = vperm.xlu1 %5061, %v6026_v27   ;;  %1985 = vperm.xlu0 %5057, %v6026_v27   ;;  %v922_v46 = vpop.f32.mrb[7].mxu1  ;;  %v6119_v12 = vadd.f32 %v6023_v24, %v6038_v41 }
 0x210   : > { %4965 = vmatpush3.bf16.msra.mxu1 %v4962_v39 }
 0x212   : > { %v6046_v22 = vpop.f32.mrb[8].mxu1 }
 0x213   : > { %5064 = vset.pattern.permute.xlu1 %v8202_v48  ;;  %5059 = vset.pattern.permute.xlu0 %v8212_v49  ;;  %v927_v50 = vpop.f32.mrb[9].mxu1 }
 0x214   : > { %2209 = vperm.xlu0 %5059, %v6026_v27   ;;  %1889 = vperm.xlu1 %5064, %v6044_v44  }
 0x216   : > { %v6053_v53 = vpop.f32.mrb[10].mxu1 }
 0x217   : > { %v932_v20 = vpop.f32.mrb[11].mxu1 }
 0x218   : > { %5060 = vset.pattern.permute.xlu0 %v8210_v57  ;;  %5065 = vset.pattern.permute.xlu1 %v8200_v58 }
 0x219   : > { %2401 = vperm.xlu0 %5060, %v6026_v27   ;;  %2305 = vperm.xlu1 %5065, %v6044_v44  }
 0x21a   : > { %v6059_v54 = vpop.f32.mrb[12].mxu1 }
 0x21b   : > { %v937_v55 = vpop.f32.mrb[13].mxu1 }
 0x21d   : > { %5062 = vset.pattern.permute.xlu0 %v8208_v62  ;;  %5066 = vset.pattern.permute.xlu1 %v8198_v52 }
 0x21e   : > { %2625 = vperm.xlu0 %5062, %v6026_v27   ;;  %1559 = vperm.xlu1 %5066, %v6062_v60   ;;  %v6084_v56 = vpop.f32.mrb[14].mxu1 }
 0x21f   : > { %v942_v61 = vpop.f32.mrb[15].mxu1 }
 0x222   : > { %5063 = vset.pattern.permute.xlu0 %v8206_v21  ;;  %5068 = vset.pattern.permute.xlu1 %v8194_v32  ;;  %v6093_v3 = vpop.f32.mrb[16].mxu1 }
 0x223   : > { %1797 = vperm.xlu1 %5068, %v6062_v60   ;;  %1442 = vperm.xlu0 %5063, %v6044_v44   ;;  %v947_v63 = vpop.f32.mrb[17].mxu1 }
 0x226   : > { %v6095_v2 = vpop.f32.mrb[18].mxu1 }
 0x227   : > { %5069 = vset.pattern.permute.xlu1 %v8196_v43  ;;  %5067 = vset.pattern.permute.xlu0 %v8204_v51  ;;  %v952_v4 = vpop.f32.mrb[19].mxu1 }
 0x228   : > { %1989 = vperm.xlu1 %5069, %v6062_v60   ;;  %1685 = vperm.xlu0 %5067, %v6062_v60  }
 0x22a   : > { %v6103_v5 = vpop.f32.mrb[20].mxu1 }
 0x22b   : > { %v957_v6 = vpop.f32.mrb[21].mxu1 }
 0x22c   : > { %5071 = vset.pattern.permute.xlu1 %v8212_v49  ;;  %5070 = vset.pattern.permute.xlu0 %v8214_v33 }
 0x22d   : > { %2213 = vperm.xlu1 %5071, %v6062_v60   ;;  %2101 = vperm.xlu0 %5070, %v6062_v60  }
 0x22e   : > { %v6107_v7 = vpop.f32.mrb[22].mxu1 }
 0x22f   : > { %v962_v8 = vpop.f32.mrb[23].mxu1 }
 0x231   : > { %5072 = vset.pattern.permute.xlu1 %v8210_v57  ;;  %5073 = vset.pattern.permute.xlu0 %v8218_v40 }
 0x232   : > { %2405 = vperm.xlu1 %5072, %v6062_v60   ;;  %2517 = vperm.xlu0 %5073, %v6062_v60   ;;  %v6109_v9 = vpop.f32.mrb[24].mxu1 }
 0x233   : > { %v967_v1 = vpop.f32.mrb[25].mxu1 }
 0x236   : > { %5074 = vset.pattern.permute.xlu1 %v8208_v62  ;;  %5075 = vset.pattern.permute.xlu0 %v8206_v21  ;;  %v6115_v10 = vpop.f32.mrb[26].mxu1 }
 0x237   : > { %2629 = vperm.xlu1 %5074, %v6062_v60   ;;  %1447 = vperm.xlu0 %5075, %v6087_v59   ;;  %v972_v16 = vpop.f32.mrb[27].mxu1 }
 0x238   : > { %v6177_v16 = vadd.f32 %v6023_v24, %v6046_v22 }
 0x23a   : > { %v6125_v15 = vpop.f32.mrb[28].mxu1  ;;  %8291 = vst [vmem:[#allocation11_spill] sm:$0xff] %v6177_v16  ;;  %v6195_v18 = vadd.f32 1.0, %v6177_v16 }
 0x23b   : > { %5078 = vset.pattern.permute.xlu1 %v8198_v52  ;;  %5076 = vset.pattern.permute.xlu0 %v8202_v48  ;;  %v977_v13 = vpop.f32.mrb[29].mxu1 }
 0x23c   : > { %1564 = vperm.xlu1 %5078, %v6099_v0   ;;  %1893 = vperm.xlu0 %5076, %v6087_v59  }
 0x23e   : > { %v6129_v17 = vpop.f32.mrb[30].mxu1 }
 0x23f   : > { %v982_v23 = vpop.f32.mrb[31].mxu1 }
 0x240   : > { %5079 = vset.pattern.permute.xlu1 %v8204_v51  ;;  %5077 = vset.pattern.permute.xlu0 %v8200_v58  ;;  %v6184_v23 = vadd.f32 1.0, %v6099_v0 }
 0x241   : > { %1689 = vperm.xlu1 %5079, %v6099_v0   ;;  %2309 = vperm.xlu0 %5077, %v6087_v59  }
 0x242   : > { %v6121_v11 = vpop.f32.mrb[42].mxu0  ;;  %v4795_v26 = vpop.f32.mrb[32].mxu1  ;;  %8292 = vst [vmem:[#allocation12_spill] sm:$0xff] %v6184_v23 }
 0x243   : > { %v6123_v14 = vpop.f32.mrb[43].mxu0  ;;  %v1111_v30 = vpop.f32.mrb[33].mxu1  ;;  %v1117_v34 = vadd.f32 %v4795_v26, %v5981_v45 }
 0x244   : > { %v1112_v31 = vadd.f32 %v5981_v45, %v1111_v30 }
 0x245   : > { %5080 = vset.pattern.permute.xlu1 %v8194_v32  ;;  %5090 = vset.pattern.permute.xlu0 %v8198_v52  ;;  %v1167_v36 = vmul.f32 0.70710677, %v1117_v34  ;;  %v1151_v46 = vmul.f32 0.5, %v1117_v34 }
 0x246   : > { %1801 = vperm.xlu1 %5080, %v6099_v0   ;;  %1569 = vperm.xlu0 %5090, %v6119_v12   ;;  %v6133_v19 = vpop.f32.mrb[44].mxu0  ;;  %v1166_v35 = vmul.f32 0.70710677, %v1112_v31  ;;  %v1150_v41 = vmul.f32 0.5, %v1112_v31  ;;  %v4798_v63 = vpop.f32.mrb[34].mxu1 }
 0x247   : > { %v6135_v25 = vpop.f32.mrb[45].mxu0  ;;  %v1127_v4 = vadd.f32 %v4798_v63, %v5981_v45  ;;  %v1121_v6 = vpop.f32.mrb[35].mxu1 }
 0x248   : > { %5352 = verf.f32 %v1166_v35  ;;  %v1122_v1 = vadd.f32 %v5981_v45, %v1121_v6 }
 0x249   : > { %5354 = verf.f32 %v1167_v36  ;;  %v1169_v8 = vmul.f32 0.70710677, %v1127_v4  ;;  %v1153_v28 = vmul.f32 0.5, %v1127_v4  ;;  %v6213_v36 = vadd.f32 %v6023_v24, %v6053_v53 }
 0x24a   : > { %5081 = vset.pattern.permute.xlu1 %v8196_v43  ;;  %5092 = vset.pattern.permute.xlu0 %v8194_v32  ;;  %v1168_v13 = vmul.f32 0.70710677, %v1122_v1  ;;  %v1152_v26 = vmul.f32 0.5, %v1122_v1 }
 0x24b   : > { %1993 = vperm.xlu1 %5081, %v6099_v0   ;;  %1805 = vperm.xlu0 %5092, %v6119_v12   ;;  %5356 = verf.f32 %v1169_v8 }
 0x24c   : > { %5358 = verf.f32 %v1168_v13  ;;  %v6257_v13 = vld [vmem:[%s8190_s8] ss:$0 sm:$0xff] }
 0x24f   : > { %5082 = vset.pattern.permute.xlu1 %v8214_v33  ;;  %5093 = vset.pattern.permute.xlu0 %v8196_v43 }
 0x250   : > { %2105 = vperm.xlu1 %5082, %v6099_v0   ;;  %1997 = vperm.xlu0 %5093, %v6119_v12  }
 0x252   : > { %v5353_v42 = vpop.eup %5352 }
 0x253   : > { %v5355_v47 = vpop.eup %5354  ;;  %v1198_v50 = vadd.f32 1.0, %v5353_v42  ;;  %v6224_v42 = vadd.f32 1.0, %v6119_v12 }
 0x254   : > { %5083 = vset.pattern.permute.xlu1 %v8212_v49  ;;  %5095 = vset.pattern.permute.xlu0 %v8212_v49  ;;  %v1199_v20 = vadd.f32 1.0, %v5355_v47 }
 0x255   : > { %2217 = vperm.xlu1 %5083, %v6099_v0   ;;  %2221 = vperm.xlu0 %5095, %v6119_v12   ;;  %v1214_v55 = vmul.f32 %v1198_v50, %v1150_v41  ;;  %v5357_v22 = vpop.eup %5356  ;;  %8293 = vst [vmem:[#allocation13_spill] sm:$0xff] %v6224_v42 }
 0x256   : > { %v1215_v61 = vmul.f32 %v1199_v20, %v1151_v46  ;;  %v5359_v30 = vpop.eup %5358  ;;  %v1201_v29 = vadd.f32 1.0, %v5357_v22  ;;  %v4801_v20 = vpop.f32.mrb[36].mxu1 }
 0x257   : > { %4825 = vmatprep.mubr.msk.f32.mxu0 %vm389_vm0, %v1214_v55  ;;  %v1200_v31 = vadd.f32 1.0, %v5359_v30  ;;  %v1131_v63 = vpop.f32.mrb[37].mxu1  ;;  %v1137_v4 = vadd.f32 %v4801_v20, %v5981_v45  ;;  %v6271_v30 = vadd.f32 %v6023_v24, %v6059_v54 }
 0x258   : > { %4826 = vmatmul.mubr.msk.f32.gmra.mrb[52].mxu0 %vm389_vm0, %v1215_v61  ;;  %v1217_v35 = vmul.f32 %v1201_v29, %v1153_v28  ;;  %v1132_v6 = vadd.f32 %v5981_v45, %v1131_v63  ;;  %v1346_v45 = vadd.f32 %v6257_v13, %v6123_v14 }
 0x259   : > { %5084 = vset.pattern.permute.xlu1 %v8210_v57  ;;  %5096 = vset.pattern.permute.xlu0 %v8210_v57  ;;  %v1216_v34 = vmul.f32 %v1200_v31, %v1152_v26  ;;  %v1171_v8 = vmul.f32 0.70710677, %v1137_v4  ;;  %8294 = vst [vmem:[#allocation14_spill] sm:$0xff] %v6271_v30 }
 0x25a   : > { %2409 = vperm.xlu1 %5084, %v6099_v0   ;;  %2413 = vperm.xlu0 %5096, %v6119_v12   ;;  %v6217_v37 = vpop.f32.mrb[46].mxu0  ;;  %v1170_v1 = vmul.f32 0.70710677, %v1132_v6  ;;  %v1536_v31 = vrot.slane %v1346_v45, 1  ;;  %v1664_v14 = vrot.slane %v1346_v45, 2  ;;  %v1776_v63 = vrot.slane %v1346_v45, 4 }
 0x25b   : > { %4828 = vmatprep.mubr.msk.f32.mxu0 %vm389_vm0, %v1216_v34  ;;  %v6221_v38 = vpop.f32.mrb[47].mxu0  ;;  %5360 = verf.f32 %v1171_v8 }
 0x25c   : > { %4829 = vmatmul.mubr.msk.f32.gmra.mrb[54].mxu0 %vm389_vm0, %v1217_v35  ;;  %5362 = verf.f32 %v1170_v1  ;;  %v1154_v1 = vmul.f32 0.5, %v1132_v6 }
 0x25e   : > { %5085 = vset.pattern.permute.xlu1 %v8218_v40  ;;  %5098 = vset.pattern.permute.xlu0 %v8208_v62 }
 0x25f   : > { %2521 = vperm.xlu1 %5085, %v6099_v0   ;;  %2637 = vperm.xlu0 %5098, %v6119_v12  }
 0x263   : > { %5086 = vset.pattern.permute.xlu1 %v8208_v62  ;;  %5103 = vset.pattern.permute.xlu0 %v8204_v51 }
 0x264   : > { %2633 = vperm.xlu1 %5086, %v6099_v0   ;;  %1697 = vperm.xlu0 %5103, %v6177_v16  }
 0x265   : > { %v5361_v20 = vpop.eup %5360 }
 0x268   : > { %5087 = vset.pattern.permute.xlu1 %v8206_v21  ;;  %5106 = vset.pattern.permute.xlu0 %v8214_v33 }
 0x269   : > { %1452 = vperm.xlu1 %5087, %v6184_v23   ;;  %2113 = vperm.xlu0 %5106, %v6177_v16  }
 0x26d   : > { %5088 = vset.pattern.permute.xlu1 %v8202_v48  ;;  %5109 = vset.pattern.permute.xlu0 %v8218_v40 }
 0x26e   : > { %1897 = vperm.xlu1 %5088, %v6184_v23   ;;  %2529 = vperm.xlu0 %5109, %v6177_v16  }
 0x272   : > { %5089 = vset.pattern.permute.xlu1 %v8200_v58  ;;  %5111 = vset.pattern.permute.xlu0 %v8206_v21 }
 0x273   : > { %2313 = vperm.xlu1 %5089, %v6184_v23   ;;  %1462 = vperm.xlu0 %5111, %v6195_v18  }
 0x277   : > { %5091 = vset.pattern.permute.xlu1 %v8204_v51  ;;  %5112 = vset.pattern.permute.xlu0 %v8202_v48 }
 0x278   : > { %1693 = vperm.xlu1 %5091, %v6119_v12   ;;  %1905 = vperm.xlu0 %5112, %v6195_v18  }
 0x27c   : > { %5094 = vset.pattern.permute.xlu1 %v8214_v33  ;;  %5113 = vset.pattern.permute.xlu0 %v8200_v58 }
 0x27d   : > { %2109 = vperm.xlu1 %5094, %v6119_v12   ;;  %2321 = vperm.xlu0 %5113, %v6195_v18  }
 0x281   : > { %5097 = vset.pattern.permute.xlu1 %v8218_v40  ;;  %5114 = vset.pattern.permute.xlu0 %v8198_v52 }
 0x282   : > { %2525 = vperm.xlu1 %5097, %v6119_v12   ;;  %1579 = vperm.xlu0 %5114, %v6213_v36  }
 0x284   : > { %v1682_v39 = vpop.permute.xlu1 %1681  ;;  %v1555_v41 = vpop.permute.xlu0 %1554 }
 0x285   : > { %v1632_v54 = vmul.f32 %v1555_v41, %v1536_v31 }
 0x286   : > { %5099 = vset.pattern.permute.xlu1 %v8206_v21  ;;  %5116 = vset.pattern.permute.xlu0 %v8194_v32 }
 0x287   : > { %1457 = vperm.xlu1 %5099, %v6224_v42   ;;  %1813 = vperm.xlu0 %5116, %v6213_v36  }
 0x289   : > { %v6230_v53 = vpop.permute.xlu1 %2097  ;;  %v1794_v46 = vpop.permute.xlu0 %1793 }
 0x28a   : > { %v1856_v21 = vmul.f32 %v1794_v46, %v1776_v63  ;;  %v8297_v46 = vmov 0  }
 0x28b   : > { %5100 = vset.pattern.permute.xlu1 %v8202_v48  ;;  %5117 = vset.pattern.permute.xlu0 %v8196_v43 }
 0x28c   : > { %1901 = vperm.xlu1 %5100, %v6224_v42   ;;  %2005 = vperm.xlu0 %5117, %v6213_v36  }
 0x28e   : > { %v6236_v47 = vpop.permute.xlu1 %2513  ;;  %v6238_v50 = vpop.permute.xlu0 %1985 }
 0x290   : > { %5101 = vset.pattern.permute.xlu1 %v8200_v58  ;;  %5119 = vset.pattern.permute.xlu0 %v8212_v49  ;;  %v1744_v58 = vmul.f32 %v1682_v39, %v1664_v14 }
 0x291   : > { %2317 = vperm.xlu1 %5101, %v6224_v42   ;;  %2229 = vperm.xlu0 %5119, %v6213_v36  }
 0x293   : > { %v6244_v55 = vpop.permute.xlu0 %2209  ;;  %v6246_v61 = vpop.permute.xlu1 %1889 }
 0x295   : > { %5102 = vset.pattern.permute.xlu1 %v8198_v52  ;;  %5120 = vset.pattern.permute.xlu0 %v8210_v57  ;;  %v1203_v52 = vadd.f32 1.0, %v5361_v20 }
 0x296   : > { %1574 = vperm.xlu1 %5102, %v6177_v16   ;;  %2421 = vperm.xlu0 %5120, %v6213_v36  }
 0x298   : > { %v6259_v22 = vpop.permute.xlu0 %2401  ;;  %v6261_v26 = vpop.permute.xlu1 %2305 }
 0x29a   : > { %5104 = vset.pattern.permute.xlu1 %v8194_v32  ;;  %5122 = vset.pattern.permute.xlu0 %v8208_v62  ;;  %v5363_v32 = vpop.eup %5362 }
 0x29b   : > { %1809 = vperm.xlu1 %5104, %v6177_v16   ;;  %2645 = vperm.xlu0 %5122, %v6213_v36  }
 0x29d   : > { %v6273_v28 = vpop.permute.xlu0 %2625  ;;  %v6275_v29 = vpop.permute.xlu1 %1559 }
 0x29f   : > { %5105 = vset.pattern.permute.xlu1 %v8196_v43  ;;  %5127 = vset.pattern.permute.xlu0 %v8204_v51  ;;  %v1155_v43 = vmul.f32 0.5, %v1137_v4  ;;  %v1202_v51 = vadd.f32 1.0, %v5363_v32  ;;  %v6294_v32 = vadd.f32 1.0, %v6271_v30 }
 0x2a0   : > { %2001 = vperm.xlu1 %5105, %v6177_v16   ;;  %1705 = vperm.xlu0 %5127, %v6271_v30  }
 0x2a1   : > { %v1218_v6 = vmul.f32 %v1202_v51, %v1154_v1  ;;  %v1219_v31 = vmul.f32 %v1203_v52, %v1155_v43  ;;  %8295 = vst [vmem:[#allocation15_spill] sm:$0xff] %v6294_v32  ;;  %v8299_v1 = vmov 4  }
 0x2a2   : > { %v6281_v34 = vpop.permute.xlu1 %1797  ;;  %v1443_v35 = vpop.permute.xlu0 %1442 }
 0x2a3   : > { %v1520_v8 = vmul.f32 %v1443_v35, %v1346_v45  ;;  %4831 = vmatprep.mubr.msk.f32.mxu0 %vm389_vm0, %v1218_v6 }
 0x2a4   : > { %5107 = vset.pattern.permute.xlu1 %v8212_v49  ;;  %5130 = vset.pattern.permute.xlu0 %v8214_v33 }
 0x2a5   : > { %v1648_v48 = vadd.f32 %v1632_v54, %v1520_v8  ;;  %2225 = vperm.xlu1 %5107, %v6177_v16   ;;  %2121 = vperm.xlu0 %5130, %v6271_v30  }
 0x2a6   : > { %4832 = vmatmul.mubr.msk.f32.gmra.mrb[56].mxu0 %vm389_vm0, %v1219_v31 }
 0x2a7   : > { %v1760_v62 = vadd.f32 %v1744_v58, %v1648_v48  ;;  %v6287_v41 = vpop.permute.xlu1 %1989  ;;  %v1686_v45 = vpop.permute.xlu0 %1685 }
 0x2a9   : > { %v1872_v35 = vadd.f32 %v1856_v21, %v1760_v62  ;;  %5108 = vset.pattern.permute.xlu1 %v8210_v57  ;;  %5133 = vset.pattern.permute.xlu0 %v8218_v40  ;;  %v1351_v62 = vadd.f32 %v6121_v11, %v6257_v13  ;;  %v8296_v21 = vmov 11   ;;  %v8298_v11 = vmov 2  }
 0x2aa   : > { %2417 = vperm.xlu1 %5108, %v6177_v16   ;;  %2537 = vperm.xlu0 %5133, %v6271_v30  }
 0x2ab   : > { %v1968_v39 = vrot.slane %v1872_v35, 1  ;;  %v2080_v4 = vrot.slane %v1872_v35, 2  ;;  %v1952_v52 = vmul.f32 %v6246_v61, %v1872_v35  ;;  %v2192_v58 = vrot.slane %v1872_v35, 4 }
 0x2ac   : > { %v6297_v48 = vpop.permute.xlu1 %2213  ;;  %v6299_v51 = vpop.permute.xlu0 %2101  ;;  %v1537_v8 = vrot.slane %v1351_v62, 1  ;;  %v1665_v31 = vrot.slane %v1351_v62, 2 }
 0x2ad   : > { %v2048_v43 = vmul.f32 %v6238_v50, %v1968_v39  ;;  %v2160_v20 = vmul.f32 %v6230_v53, %v2080_v4  ;;  %v2272_v61 = vmul.f32 %v6244_v55, %v2192_v58  ;;  %v1777_v55 = vrot.slane %v1351_v62, 4 }
 0x2ae   : > { %5110 = vset.pattern.permute.xlu1 %v8296_v21  ;;  %5135 = vset.pattern.permute.xlu0 %v8297_v46  ;;  %v1633_v39 = vmul.f32 %v6275_v29, %v1537_v8 }
 0x2af   : > { %v2064_v14 = vadd.f32 %v2048_v43, %v1952_v52  ;;  %2641 = vperm.xlu1 %5110, %v6177_v16   ;;  %1472 = vperm.xlu0 %5135, %v6294_v32  }
 0x2b1   : > { %v2176_v54 = vadd.f32 %v2160_v20, %v2064_v14  ;;  %v6312_v63 = vpop.permute.xlu1 %2405  ;;  %v6314_v50 = vpop.permute.xlu0 %2517 }
 0x2b3   : > { %5115 = vset.pattern.permute.xlu1 %v8298_v11  ;;  %5136 = vset.pattern.permute.xlu0 %v8299_v1  ;;  %v2288_v6 = vadd.f32 %v2272_v61, %v2176_v54  ;;  %v1745_v54 = vmul.f32 %v1686_v45, %v1665_v31  ;;  %v8300_v61 = vmov 8  }
 0x2b4   : > { %1701 = vperm.xlu1 %5115, %v6213_v36   ;;  %1913 = vperm.xlu0 %5136, %v6294_v32  }
 0x2b5   : > { %v2384_v53 = vrot.slane %v2288_v6, 1  ;;  %v2496_v35 = vrot.slane %v2288_v6, 2  ;;  %v2368_v58 = vmul.f32 %v6261_v26, %v2288_v6  ;;  %v2608_v20 = vrot.slane %v2288_v6, 4 }
 0x2b6   : > { %v6321_v4 = vpop.permute.xlu1 %2629  ;;  %v1448_v52 = vpop.permute.xlu0 %1447 }
 0x2b7   : > { %v1521_v43 = vmul.f32 %v1448_v52, %v1351_v62  ;;  %v2464_v14 = vmul.f32 %v6259_v22, %v2384_v53  ;;  %v2576_v8 = vmul.f32 %v6236_v47, %v2496_v35  ;;  %v6332_v62 = vadd.f32 %v6023_v24, %v6084_v56 }
 0x2b8   : > { %5118 = vset.pattern.permute.xlu1 %v8214_v33  ;;  %5137 = vset.pattern.permute.xlu0 %v8300_v61  ;;  %v1857_v22 = vmul.f32 %v6281_v34, %v1777_v55  ;;  %v2688_v53 = vmul.f32 %v6273_v28, %v2608_v20  ;;  %v6351_v20 = vadd.f32 1.0, %v6213_v36 }
 0x2b9   : > { %v1649_v57 = vadd.f32 %v1633_v39, %v1521_v43  ;;  %2117 = vperm.xlu1 %5118, %v6213_v36   ;;  %2329 = vperm.xlu0 %5137, %v6294_v32   ;;  %v2480_v29 = vadd.f32 %v2464_v14, %v2368_v58  ;;  %8301 = vst [vmem:[#allocation16_spill] sm:$0xff] %v6332_v62  ;;  %v6338_v39 = vpop.f32.mrb[48].mxu0  ;;  %v8302_v43 = vmov 1  }
 0x2ba   : > { %v6342_v35 = vpop.f32.mrb[49].mxu0  ;;  %8303 = vst [vmem:[#allocation17_spill] sm:$0xff] %v6351_v20 }
 0x2bb   : > { %v1761_v26 = vadd.f32 %v1745_v54, %v1649_v57  ;;  %v6335_v45 = vpop.permute.xlu1 %1564  ;;  %v1894_v6 = vpop.permute.xlu0 %1893  ;;  %v2592_v31 = vadd.f32 %v2576_v8, %v2480_v29  ;;  %v8304_v54 = vmov 3  }
 0x2bd   : > { %v1873_v52 = vadd.f32 %v1857_v22, %v1761_v26  ;;  %5121 = vset.pattern.permute.xlu1 %v8218_v40  ;;  %5138 = vset.pattern.permute.xlu0 %v8302_v43  ;;  %v2704_v47 = vadd.f32 %v2688_v53, %v2592_v31  ;;  %v8305_v53 = vmov 5  }
 0x2be   : > { %2533 = vperm.xlu1 %5121, %v6213_v36   ;;  %1589 = vperm.xlu0 %5138, %v6332_v62  }
 0x2bf   : > { %v1969_v57 = vrot.slane %v1873_v52, 1  ;;  %v2081_v56 = vrot.slane %v1873_v52, 2  ;;  %4842 = vmatprep.mubr.msk.f32.mxu1 %vm389_vm0, %v2704_v47  ;;  %v2193_v55 = vrot.slane %v1873_v52, 4  ;;  %v1953_v58 = vmul.f32 %v1894_v6, %v1873_v52 }
 0x2c0   : > { %v6347_v34 = vpop.permute.xlu1 %1689  ;;  %v2310_v14 = vpop.permute.xlu0 %2309 }
 0x2c1   : > { %v2049_v28 = vmul.f32 %v6287_v41, %v1969_v57  ;;  %v2161_v29 = vmul.f32 %v6299_v51, %v2081_v56  ;;  %v2273_v22 = vmul.f32 %v6297_v48, %v2193_v55 }
 0x2c2   : > { %5123 = vset.pattern.permute.xlu1 %v8297_v46  ;;  %5140 = vset.pattern.permute.xlu0 %v8304_v54 }
 0x2c3   : > { %v2065_v8 = vadd.f32 %v2049_v28, %v1953_v58  ;;  %1467 = vperm.xlu1 %5123, %v6351_v20   ;;  %1821 = vperm.xlu0 %5140, %v6332_v62  }
 0x2c5   : > { %v2177_v41 = vadd.f32 %v2161_v29, %v2065_v8  ;;  %v6359_v26 = vpop.permute.xlu1 %1801  ;;  %v6361_v6 = vpop.permute.xlu0 %1569 }
 0x2c7   : > { %v2289_v31 = vadd.f32 %v2273_v22, %v2177_v41  ;;  %5124 = vset.pattern.permute.xlu1 %v8299_v1  ;;  %5141 = vset.pattern.permute.xlu0 %v8305_v53 }
 0x2c8   : > { %1909 = vperm.xlu1 %5124, %v6351_v20   ;;  %2013 = vperm.xlu0 %5141, %v6332_v62  }
 0x2c9   : > { %v2385_v51 = vrot.slane %v2289_v31, 1  ;;  %v2497_v52 = vrot.slane %v2289_v31, 2  ;;  %v2609_v56 = vrot.slane %v2289_v31, 4  ;;  %v2369_v28 = vmul.f32 %v2310_v14, %v2289_v31 }
 0x2ca   : > { %v6367_v47 = vpop.permute.xlu1 %1993  ;;  %v6369_v57 = vpop.permute.xlu0 %1805  ;;  %v8306_v14 = vmov 9  }
 0x2cb   : > { %v2465_v48 = vmul.f32 %v6312_v63, %v2385_v51  ;;  %v2577_v55 = vmul.f32 %v6314_v50, %v2497_v52  ;;  %v2689_v29 = vmul.f32 %v6321_v4, %v2609_v56  ;;  %v6397_v4 = vadd.f32 %v6023_v24, %v6093_v3 }
 0x2cc   : > { %5125 = vset.pattern.permute.xlu1 %v8300_v61  ;;  %5143 = vset.pattern.permute.xlu0 %v8212_v49  ;;  %v1356_v3 = vadd.f32 %v6257_v13, %v6135_v25 }
 0x2cd   : > { %v2481_v58 = vadd.f32 %v2465_v48, %v2369_v28  ;;  %2325 = vperm.xlu1 %5125, %v6351_v20   ;;  %2237 = vperm.xlu0 %5143, %v6332_v62   ;;  %8307 = vst [vmem:[#allocation18_spill] sm:$0xff] %v6397_v4  ;;  %v6426_v25 = vadd.f32 1.0, %v6397_v4 }
 0x2cf   : > { %v2593_v8 = vadd.f32 %v2577_v55, %v2481_v58  ;;  %v6378_v22 = vpop.permute.xlu1 %2105  ;;  %v6380_v41 = vpop.permute.xlu0 %1997  ;;  %v1538_v58 = vrot.slane %v1356_v3, 1  ;;  %8308 = vst [vmem:[#allocation19_spill] sm:$0xff] %v6426_v25 }
 0x2d1   : > { %v2705_v63 = vadd.f32 %v2689_v29, %v2593_v8  ;;  %5126 = vset.pattern.permute.xlu1 %v8302_v43  ;;  %5144 = vset.pattern.permute.xlu0 %v8306_v14  ;;  %v1666_v29 = vrot.slane %v1356_v3, 2 }
 0x2d2   : > { %1584 = vperm.xlu1 %5126, %v6271_v30   ;;  %2429 = vperm.xlu0 %5144, %v6332_v62  }
 0x2d3   : > { %4843 = vmatmul.mubr.msk.f32.vlgmr.msra.gmra.mrb[38].mxu1 %vm389_vm0, %v2705_v63 }
 0x2d4   : > { %v6387_v50 = vpop.permute.xlu1 %2217  ;;  %v6389_v31 = vpop.permute.xlu0 %2221 }
 0x2d6   : > { %5128 = vset.pattern.permute.xlu1 %v8304_v54  ;;  %5146 = vset.pattern.permute.xlu0 %v8296_v21 }
 0x2d7   : > { %1817 = vperm.xlu1 %5128, %v6271_v30   ;;  %2653 = vperm.xlu0 %5146, %v6332_v62  }
 0x2d9   : > { %v6399_v51 = vpop.permute.xlu1 %2409  ;;  %v6401_v52 = vpop.permute.xlu0 %2413 }
 0x2db   : > { %5129 = vset.pattern.permute.xlu1 %v8305_v53  ;;  %5151 = vset.pattern.permute.xlu0 %v8298_v11 }
 0x2dc   : > { %2009 = vperm.xlu1 %5129, %v6271_v30   ;;  %1713 = vperm.xlu0 %5151, %v6397_v4  }
 0x2de   : > { %v6407_v48 = vpop.permute.xlu1 %2521  ;;  %v6409_v56 = vpop.permute.xlu0 %2637 }
 0x2e0   : > { %5131 = vset.pattern.permute.xlu1 %v8212_v49  ;;  %5154 = vset.pattern.permute.xlu0 %v8214_v33  ;;  %v1634_v49 = vmul.f32 %v6335_v45, %v1538_v58  ;;  %v1778_v33 = vrot.slane %v1356_v3, 4  ;;  %v6453_v58 = vadd.f32 %v6023_v24, %v6095_v2 }
 0x2e1   : > { %2233 = vperm.xlu1 %5131, %v6271_v30   ;;  %2129 = vperm.xlu0 %5154, %v6397_v4  }
 0x2e2   : > { %v1858_v20 = vmul.f32 %v6359_v26, %v1778_v33  ;;  %v8309_v26 = vmov 6  }
 0x2e3   : > { %v6417_v28 = vpop.permute.xlu1 %2633  ;;  %v6419_v55 = vpop.permute.xlu0 %1697 }
 0x2e5   : > { %5132 = vset.pattern.permute.xlu1 %v8306_v14  ;;  %5157 = vset.pattern.permute.xlu0 %v8218_v40  ;;  %v1746_v40 = vmul.f32 %v6347_v34, %v1666_v29 }
 0x2e6   : > { %2425 = vperm.xlu1 %5132, %v6271_v30   ;;  %2545 = vperm.xlu0 %5157, %v6397_v4  }
 0x2e8   : > { %v1453_v8 = vpop.permute.xlu1 %1452  ;;  %v6428_v63 = vpop.permute.xlu0 %2113 }
 0x2e9   : > { %v1522_v0 = vmul.f32 %v1453_v8, %v1356_v3 }
 0x2ea   : > { %5134 = vset.pattern.permute.xlu1 %v8296_v21  ;;  %5158 = vset.pattern.permute.xlu0 %v8297_v46 }
 0x2eb   : > { %v1650_v16 = vadd.f32 %v1634_v49, %v1522_v0  ;;  %2649 = vperm.xlu1 %5134, %v6271_v30   ;;  %1482 = vperm.xlu0 %5158, %v6426_v25   ;;  %v8311_v30 = vmov 10  }
 0x2ed   : > { %v1762_v60 = vadd.f32 %v1746_v40, %v1650_v16  ;;  %v1898_v42 = vpop.permute.xlu1 %1897  ;;  %v6437_v23 = vpop.permute.xlu0 %2529 }
 0x2ef   : > { %v1874_v45 = vadd.f32 %v1858_v20, %v1762_v60  ;;  %5139 = vset.pattern.permute.xlu1 %v8298_v11  ;;  %5159 = vset.pattern.permute.xlu0 %v8299_v1 }
 0x2f0   : > { %1709 = vperm.xlu1 %5139, %v6332_v62   ;;  %1921 = vperm.xlu0 %5159, %v6426_v25  }
 0x2f1   : > { %v1970_v49 = vrot.slane %v1874_v45, 1  ;;  %v2082_v0 = vrot.slane %v1874_v45, 2  ;;  %v2194_v40 = vrot.slane %v1874_v45, 4  ;;  %v1954_v16 = vmul.f32 %v1898_v42, %v1874_v45  ;;  %v6458_v45 = vpop.f32.mrb[50].mxu0 }
 0x2f2   : > { %v2314_v34 = vpop.permute.xlu1 %2313  ;;  %v6443_v3 = vpop.permute.xlu0 %1462  ;;  %8310 = vst [vmem:[#allocation20_spill] sm:$0xff] %v6458_v45 }
 0x2f3   : > { %v2050_v33 = vmul.f32 %v6367_v47, %v1970_v49  ;;  %v2162_v60 = vmul.f32 %v6378_v22, %v2082_v0  ;;  %v2274_v29 = vmul.f32 %v6387_v50, %v2194_v40  ;;  %v6462_v22 = vpop.f32.mrb[51].mxu0  ;;  %v6468_v40 = vadd.f32 1.0, %v6332_v62 }
 0x2f4   : > { %5142 = vset.pattern.permute.xlu1 %v8309_v26  ;;  %5160 = vset.pattern.permute.xlu0 %v8300_v61  ;;  %8312 = vst [vmem:[#allocation21_spill] sm:$0xff] %v6462_v22 }
 0x2f5   : > { %v2066_v20 = vadd.f32 %v2050_v33, %v1954_v16  ;;  %2125 = vperm.xlu1 %5142, %v6332_v62   ;;  %2337 = vperm.xlu0 %5160, %v6426_v25   ;;  %8313 = vst [vmem:[#allocation22_spill] sm:$0xff] %v6468_v40 }
 0x2f7   : > { %v2178_v47 = vadd.f32 %v2162_v60, %v2066_v20  ;;  %v1694_v8 = vpop.permute.xlu1 %1693  ;;  %v6456_v42 = vpop.permute.xlu0 %1905  ;;  %v1361_v20 = vadd.f32 %v6133_v19, %v6257_v13 }
 0x2f9   : > { %v2290_v49 = vadd.f32 %v2274_v29, %v2178_v47  ;;  %5145 = vset.pattern.permute.xlu1 %v8311_v30  ;;  %5161 = vset.pattern.permute.xlu0 %v8302_v43  ;;  %v1539_v45 = vrot.slane %v1361_v20, 1 }
 0x2fa   : > { %2541 = vperm.xlu1 %5145, %v6332_v62   ;;  %1599 = vperm.xlu0 %5161, %v6453_v58  }
 0x2fb   : > { %v2386_v24 = vrot.slane %v2290_v49, 1  ;;  %v2498_v2 = vrot.slane %v2290_v49, 2  ;;  %v2370_v33 = vmul.f32 %v2314_v34, %v2290_v49  ;;  %v2610_v16 = vrot.slane %v2290_v49, 4 }
 0x2fc   : > { %v2110_v50 = vpop.permute.xlu1 %2109  ;;  %v6470_v60 = vpop.permute.xlu0 %2321 }
 0x2fd   : > { %v2466_v0 = vmul.f32 %v6399_v51, %v2386_v24  ;;  %v2578_v29 = vmul.f32 %v6407_v48, %v2498_v2  ;;  %v2690_v49 = vmul.f32 %v6417_v28, %v2610_v16  ;;  %v1667_v48 = vrot.slane %v1361_v20, 2 }
 0x2fe   : > { %5147 = vset.pattern.permute.xlu1 %v8297_v46  ;;  %5163 = vset.pattern.permute.xlu0 %v8304_v54  ;;  %v1635_v28 = vmul.f32 %v6361_v6, %v1539_v45  ;;  %v6506_v6 = vld [vmem:[%s8186_s4] ss:$0 sm:$0xff] }
 0x2ff   : > { %v2482_v47 = vadd.f32 %v2466_v0, %v2370_v33  ;;  %1477 = vperm.xlu1 %5147, %v6468_v40   ;;  %1829 = vperm.xlu0 %5163, %v6453_v58   ;;  %v1779_v33 = vrot.slane %v1361_v20, 4 }
 0x301   : > { %v2594_v51 = vadd.f32 %v2578_v29, %v2482_v47  ;;  %v6479_v34 = vpop.permute.xlu1 %2525  ;;  %v6482_v24 = vpop.permute.xlu0 %1579  ;;  %v8314_v29 = vmov 7   ;;  %v1747_v47 = vmul.f32 %v1694_v8, %v1667_v48 }
 0x303   : > { %5148 = vset.pattern.permute.xlu1 %v8299_v1  ;;  %5164 = vset.pattern.permute.xlu0 %v8305_v53  ;;  %v2706_v19 = vadd.f32 %v2690_v49, %v2594_v51  ;;  %v1859_v49 = vmul.f32 %v6369_v57, %v1779_v33  ;;  %v6510_v57 = vadd.f32 %v6506_v6, %v6103_v5 }
 0x304   : > { %1917 = vperm.xlu1 %5148, %v6468_v40   ;;  %2021 = vperm.xlu0 %5164, %v6453_v58  }
 0x305   : > { %4845 = vmatprep.mubr.msk.f32.mxu1 %vm389_vm0, %v2706_v19  ;;  %8315 = vst [vmem:[#allocation23_spill] sm:$0xff] %v6510_v57 }
 0x306   : > { %v1458_v2 = vpop.permute.xlu1 %1457  ;;  %v6489_v0 = vpop.permute.xlu0 %1813 }
 0x307   : > { %v1523_v16 = vmul.f32 %v1458_v2, %v1361_v20  ;;  %v1366_v20 = vadd.f32 %v6257_v13, %v6221_v38 }
 0x308   : > { %5149 = vset.pattern.permute.xlu1 %v8300_v61  ;;  %5166 = vset.pattern.permute.xlu0 %v8314_v29 }
 0x309   : > { %v1651_v51 = vadd.f32 %v1635_v28, %v1523_v16  ;;  %2333 = vperm.xlu1 %5149, %v6468_v40   ;;  %2245 = vperm.xlu0 %5166, %v6453_v58  }
 0x30b   : > { %v1763_v19 = vadd.f32 %v1747_v47, %v1651_v51  ;;  %v1902_v22 = vpop.permute.xlu1 %1901  ;;  %v6497_v44 = vpop.permute.xlu0 %2005  ;;  %v1540_v47 = vrot.slane %v1366_v20, 1 }
 0x30d   : > { %v1875_v62 = vadd.f32 %v1859_v49, %v1763_v19  ;;  %5150 = vset.pattern.permute.xlu1 %v8302_v43  ;;  %5167 = vset.pattern.permute.xlu0 %v8306_v14  ;;  %v1668_v49 = vrot.slane %v1366_v20, 2 }
 0x30e   : > { %1594 = vperm.xlu1 %5150, %v6397_v4   ;;  %2437 = vperm.xlu0 %5167, %v6453_v58  }
 0x30f   : > { %v1971_v8 = vrot.slane %v1875_v62, 1  ;;  %v2083_v45 = vrot.slane %v1875_v62, 2  ;;  %v1955_v28 = vmul.f32 %v1902_v22, %v1875_v62  ;;  %v2195_v16 = vrot.slane %v1875_v62, 4 }
 0x310   : > { %v2318_v48 = vpop.permute.xlu1 %2317  ;;  %v6514_v2 = vpop.permute.xlu0 %2229  ;;  %v1524_v62 = vmul.f32 %v6443_v3, %v1366_v20 }
 0x311   : > { %v2051_v33 = vmul.f32 %v6380_v41, %v1971_v8  ;;  %v2163_v5 = vmul.f32 %v2110_v50, %v2083_v45  ;;  %v2275_v19 = vmul.f32 %v6389_v31, %v2195_v16  ;;  %v1780_v50 = vrot.slane %v1366_v20, 4 }
 0x312   : > { %5152 = vset.pattern.permute.xlu1 %v8304_v54  ;;  %5173 = vset.pattern.permute.xlu0 %v8298_v11 }
 0x313   : > { %v2067_v51 = vadd.f32 %v2051_v33, %v1955_v28  ;;  %1825 = vperm.xlu1 %5152, %v6397_v4   ;;  %1721 = vperm.xlu0 %5173, %v6510_v57   ;;  %v1748_v28 = vmul.f32 %v6419_v55, %v1668_v49  ;;  %v6539_v55 = vadd.f32 1.0, %v6510_v57 }
 0x315   : > { %v2179_v38 = vadd.f32 %v2163_v5, %v2067_v51  ;;  %v1575_v40 = vpop.permute.xlu1 %1574  ;;  %v6522_v22 = vpop.permute.xlu0 %2421  ;;  %8316 = vst [vmem:[#allocation24_spill] sm:$0xff] %v6539_v55 }
 0x316   : > { %v1636_v41 = vmul.f32 %v1575_v40, %v1540_v47 }
 0x317   : > { %v2291_v8 = vadd.f32 %v2275_v19, %v2179_v38  ;;  %5153 = vset.pattern.permute.xlu1 %v8305_v53  ;;  %5176 = vset.pattern.permute.xlu0 %v8309_v26 }
 0x318   : > { %v1652_v45 = vadd.f32 %v1636_v41, %v1524_v62  ;;  %2017 = vperm.xlu1 %5153, %v6397_v4   ;;  %2137 = vperm.xlu0 %5176, %v6510_v57  }
 0x319   : > { %v2387_v31 = vrot.slane %v2291_v8, 1  ;;  %v2499_v33 = vrot.slane %v2291_v8, 2  ;;  %v2371_v5 = vmul.f32 %v2318_v48, %v2291_v8  ;;  %v2611_v47 = vrot.slane %v2291_v8, 4 }
 0x31a   : > { %v1810_v16 = vpop.permute.xlu1 %1809  ;;  %v1764_v51 = vadd.f32 %v1748_v28, %v1652_v45  ;;  %v6531_v38 = vpop.permute.xlu0 %2645 }
 0x31b   : > { %v2467_v3 = vmul.f32 %v6401_v52, %v2387_v31  ;;  %v1860_v40 = vmul.f32 %v1810_v16, %v1780_v50  ;;  %v2579_v19 = vmul.f32 %v6479_v34, %v2499_v33  ;;  %v2691_v41 = vmul.f32 %v6409_v56, %v2611_v47 }
 0x31c   : > { %5155 = vset.pattern.permute.xlu1 %v8314_v29  ;;  %5179 = vset.pattern.permute.xlu0 %v8311_v30 }
 0x31d   : > { %v2483_v20 = vadd.f32 %v2467_v3, %v2371_v5  ;;  %v1876_v62 = vadd.f32 %v1860_v40, %v1764_v51  ;;  %2241 = vperm.xlu1 %5155, %v6397_v4   ;;  %2553 = vperm.xlu0 %5179, %v6510_v57  }
 0x31f   : > { %v2595_v52 = vadd.f32 %v2579_v19, %v2483_v20  ;;  %v2002_v48 = vpop.permute.xlu1 %2001  ;;  %v1972_v49 = vrot.slane %v1876_v62, 1  ;;  %v2084_v8 = vrot.slane %v1876_v62, 2  ;;  %v6542_v50 = vpop.permute.xlu0 %1705  ;;  %v1956_v45 = vmul.f32 %v6456_v42, %v1876_v62 }
 0x320   : > { %v2196_v33 = vrot.slane %v1876_v62, 4 }
 0x321   : > { %v2052_v28 = vmul.f32 %v2002_v48, %v1972_v49  ;;  %5156 = vset.pattern.permute.xlu1 %v8306_v14  ;;  %5180 = vset.pattern.permute.xlu0 %v8297_v46  ;;  %v2707_v34 = vadd.f32 %v2691_v41, %v2595_v52  ;;  %v2164_v56 = vmul.f32 %v6428_v63, %v2084_v8 }
 0x322   : > { %2433 = vperm.xlu1 %5156, %v6397_v4   ;;  %1492 = vperm.xlu0 %5180, %v6539_v55   ;;  %v6566_v52 = vadd.f32 %v6506_v6, %v6107_v7 }
 0x323   : > { %v2068_v31 = vadd.f32 %v2052_v28, %v1956_v45  ;;  %4846 = vmatmul.mubr.msk.f32.gmra.mrb[40].mxu1 %vm389_vm0, %v2707_v34 }
 0x324   : > { %v2226_v16 = vpop.permute.xlu1 %2225  ;;  %v6551_v51 = vpop.permute.xlu0 %2121 }
 0x325   : > { %v2180_v42 = vadd.f32 %v2164_v56, %v2068_v31  ;;  %v2276_v5 = vmul.f32 %v2226_v16, %v2196_v33  ;;  %v4662_v56 = vld [vmem:[%s8189_s7 + $0x28] sm:$0xff] }
 0x326   : > { %5162 = vset.pattern.permute.xlu1 %v8298_v11  ;;  %5181 = vset.pattern.permute.xlu0 %v8299_v1 }
 0x327   : > { %v2292_v3 = vadd.f32 %v2276_v5, %v2180_v42  ;;  %1717 = vperm.xlu1 %5162, %v6453_v58   ;;  %1929 = vperm.xlu0 %5181, %v6539_v55   ;;  %v6589_v5 = vadd.f32 1.0, %v6453_v58 }
 0x329   : > { %v2418_v40 = vpop.permute.xlu1 %2417  ;;  %v2388_v47 = vrot.slane %v2292_v3, 1  ;;  %v2500_v20 = vrot.slane %v2292_v3, 2  ;;  %v6557_v19 = vpop.permute.xlu0 %2537  ;;  %v2372_v63 = vmul.f32 %v6470_v60, %v2292_v3  ;;  %v2612_v41 = vrot.slane %v2292_v3, 4  ;;  %8319 = vst [vmem:[#allocation27_spill] sm:$0xff] %v6589_v5  ;;  %v4663_v3 = vld [vmem:[%s8189_s7 + $0x30] sm:$0xff] }
 0x32b   : > { %v2468_v62 = vmul.f32 %v2418_v40, %v2388_v47  ;;  %5165 = vset.pattern.permute.xlu1 %v8309_v26  ;;  %5182 = vset.pattern.permute.xlu0 %v8300_v61  ;;  %v2580_v49 = vmul.f32 %v6437_v23, %v2500_v20  ;;  %v6575_v7 = vpop.f32.mrb[52].mxu0  ;;  %v4661_v23 = vld [vmem:[%s8189_s7 + $0x20] sm:$0xff]  ;;  %v4664_v40 = vld [vmem:[%s8189_s7 + $0x38] sm:$0xff] }
 0x32c   : > { %2133 = vperm.xlu1 %5165, %v6453_v58   ;;  %2345 = vperm.xlu0 %5182, %v6539_v55   ;;  %8317 = vst [vmem:[#allocation25_spill] sm:$0xff] %v6575_v7  ;;  %v6577_v31 = vpop.f32.mrb[53].mxu0  ;;  %v4966_v42 = vpack.c.bf16 %v4662_v56, %v4661_v23  ;;  %v4970_v47 = vpack.c.bf16 %v4664_v40, %v4663_v3 }
 0x32d   : > { %v2484_v48 = vadd.f32 %v2468_v62, %v2372_v63  ;;  %8318 = vst [vmem:[#allocation26_spill] sm:$0xff] %v6577_v31  ;;  %v1371_v62 = vadd.f32 %v6217_v37, %v6257_v13  ;;  %v6626_v3 = vadd.f32 %v6506_v6, %v6109_v9 }
 0x32e   : > { %v2642_v8 = vpop.permute.xlu1 %2641  ;;  %v6569_v45 = vpop.permute.xlu0 %1472  ;;  %4967 = vmatprep.subr.bf16.mxu0 %v4966_v42 }
 0x32f   : > { %v2596_v60 = vadd.f32 %v2580_v49, %v2484_v48  ;;  %v2692_v28 = vmul.f32 %v2642_v8, %v2612_v41  ;;  %4969 = vmatpush3.bf16.msra.mxu0 %v4966_v42  ;;  %v1541_v41 = vrot.slane %v1371_v62, 1  ;;  %v1669_v8 = vrot.slane %v1371_v62, 2  ;;  %8320 = vst [vmem:[#allocation28_spill] sm:$0xff] %v6626_v3 }
 0x330   : > { %5168 = vset.pattern.permute.xlu1 %v8311_v30  ;;  %5183 = vset.pattern.permute.xlu0 %v8302_v43 }
 0x331   : > { %v2708_v34 = vadd.f32 %v2692_v28, %v2596_v60  ;;  %2549 = vperm.xlu1 %5168, %v6453_v58   ;;  %1609 = vperm.xlu0 %5183, %v6566_v52   ;;  %v1637_v28 = vmul.f32 %v6482_v24, %v1541_v41 }
 0x332   : > { %4971 = vmatprep.subr.bf16.mxu0 %v4970_v47 }
 0x333   : > { %v1702_v33 = vpop.permute.xlu1 %1701  ;;  %4848 = vmatprep.mubr.msk.f32.mxu1 %vm389_vm0, %v2708_v34  ;;  %v6586_v16 = vpop.permute.xlu0 %1913  ;;  %4973 = vmatpush3.bf16.msra.mxu0 %v4970_v47  ;;  %v1781_v34 = vrot.slane %v1371_v62, 4 }
 0x334   : > { %v1749_v56 = vmul.f32 %v1702_v33, %v1669_v8 }
 0x335   : > { %5169 = vset.pattern.permute.xlu1 %v8297_v46  ;;  %5185 = vset.pattern.permute.xlu0 %v8304_v54  ;;  %v1861_v40 = vmul.f32 %v6489_v0, %v1781_v34  ;;  %v1376_v0 = vadd.f32 %v6257_v13, %v6342_v35 }
 0x336   : > { %1487 = vperm.xlu1 %5169, %v6589_v5   ;;  %1837 = vperm.xlu0 %5185, %v6566_v52  }
 0x337   : > { %v1670_v7 = vrot.slane %v1376_v0, 2 }
 0x338   : > { %v2118_v20 = vpop.permute.xlu1 %2117  ;;  %v6601_v63 = vpop.permute.xlu0 %2329 }
 0x33a   : > { %5170 = vset.pattern.permute.xlu1 %v8299_v1  ;;  %5186 = vset.pattern.permute.xlu0 %v8305_v53 }
 0x33b   : > { %1925 = vperm.xlu1 %5170, %v6589_v5   ;;  %2029 = vperm.xlu0 %5186, %v6566_v52  }
 0x33d   : > { %v6609_v48 = vpop.permute.xlu1 %2533  ;;  %v6611_v49 = vpop.permute.xlu0 %1589 }
 0x33f   : > { %5171 = vset.pattern.permute.xlu1 %v8300_v61  ;;  %5188 = vset.pattern.permute.xlu0 %v8314_v29 }
 0x340   : > { %2341 = vperm.xlu1 %5171, %v6589_v5   ;;  %2253 = vperm.xlu0 %5188, %v6566_v52  }
 0x342   : > { %v1468_v37 = vpop.permute.xlu1 %1467  ;;  %v6617_v60 = vpop.permute.xlu0 %1821 }
 0x343   : > { %v1525_v23 = vmul.f32 %v1468_v37, %v1371_v62  ;;  %v6631_v62 = vpop.f32.mrb[54].mxu0 }
 0x344   : > { %5172 = vset.pattern.permute.xlu1 %v8302_v43  ;;  %5189 = vset.pattern.permute.xlu0 %v8306_v14  ;;  %8321 = vst [vmem:[#allocation29_spill] sm:$0xff] %v6631_v62  ;;  %v6635_v33 = vpop.f32.mrb[55].mxu0 }
 0x345   : > { %v1653_v42 = vadd.f32 %v1637_v28, %v1525_v23  ;;  %1604 = vperm.xlu1 %5172, %v6510_v57   ;;  %2445 = vperm.xlu0 %5189, %v6566_v52  }
 0x347   : > { %v1765_v47 = vadd.f32 %v1749_v56, %v1653_v42  ;;  %v1910_v24 = vpop.permute.xlu1 %1909  ;;  %v6629_v41 = vpop.permute.xlu0 %2013 }
 0x349   : > { %v1877_v37 = vadd.f32 %v1861_v40, %v1765_v47  ;;  %5174 = vset.pattern.permute.xlu1 %v8304_v54  ;;  %5195 = vset.pattern.permute.xlu0 %v8298_v11  ;;  %v1542_v40 = vrot.slane %v1376_v0, 1 }
 0x34a   : > { %1833 = vperm.xlu1 %5174, %v6510_v57   ;;  %1729 = vperm.xlu0 %5195, %v6626_v3  }
 0x34b   : > { %v1973_v9 = vrot.slane %v1877_v37, 1  ;;  %v2085_v8 = vrot.slane %v1877_v37, 2  ;;  %v1957_v23 = vmul.f32 %v1910_v24, %v1877_v37  ;;  %v2197_v42 = vrot.slane %v1877_v37, 4 }
 0x34c   : > { %v2326_v28 = vpop.permute.xlu1 %2325  ;;  %v6641_v34 = vpop.permute.xlu0 %2237 }
 0x34d   : > { %v2053_v56 = vmul.f32 %v6497_v44, %v1973_v9  ;;  %v2165_v62 = vmul.f32 %v2118_v20, %v2085_v8  ;;  %v2277_v35 = vmul.f32 %v6514_v2, %v2197_v42  ;;  %v1526_v44 = vmul.f32 %v6569_v45, %v1376_v0 }
 0x34e   : > { %5175 = vset.pattern.permute.xlu1 %v8305_v53  ;;  %5198 = vset.pattern.permute.xlu0 %v8309_v26  ;;  %v1782_v20 = vrot.slane %v1376_v0, 4  ;;  %v6658_v45 = vadd.f32 1.0, %v6626_v3 }
 0x34f   : > { %v2069_v47 = vadd.f32 %v2053_v56, %v1957_v23  ;;  %2025 = vperm.xlu1 %5175, %v6510_v57   ;;  %2145 = vperm.xlu0 %5198, %v6626_v3  }
 0x350   : > { %8322 = vst [vmem:[#allocation30_spill] sm:$0xff] %v6658_v45 }
 0x351   : > { %v2181_v13 = vadd.f32 %v2165_v62, %v2069_v47  ;;  %v1585_v31 = vpop.permute.xlu1 %1584  ;;  %v6649_v24 = vpop.permute.xlu0 %2429  ;;  %v1750_v62 = vmul.f32 %v6542_v50, %v1670_v7 }
 0x352   : > { %v1638_v37 = vmul.f32 %v1585_v31, %v1542_v40 }
 0x353   : > { %v2293_v9 = vadd.f32 %v2277_v35, %v2181_v13  ;;  %5177 = vset.pattern.permute.xlu1 %v8314_v29  ;;  %5201 = vset.pattern.permute.xlu0 %v8311_v30 }
 0x354   : > { %v1654_v8 = vadd.f32 %v1638_v37, %v1526_v44  ;;  %2249 = vperm.xlu1 %5177, %v6510_v57   ;;  %2561 = vperm.xlu0 %5201, %v6626_v3  }
 0x355   : > { %v2389_v2 = vrot.slane %v2293_v9, 1  ;;  %v2501_v23 = vrot.slane %v2293_v9, 2  ;;  %v2373_v31 = vmul.f32 %v2326_v28, %v2293_v9  ;;  %v2613_v13 = vrot.slane %v2293_v9, 4 }
 0x356   : > { %v1818_v56 = vpop.permute.xlu1 %1817  ;;  %v1766_v42 = vadd.f32 %v1750_v62, %v1654_v8  ;;  %v6661_v0 = vpop.permute.xlu0 %2653 }
 0x357   : > { %v2469_v40 = vmul.f32 %v6522_v22, %v2389_v2  ;;  %v1862_v47 = vmul.f32 %v1818_v56, %v1782_v20  ;;  %v2581_v50 = vmul.f32 %v6609_v48, %v2501_v23  ;;  %v2693_v22 = vmul.f32 %v6531_v38, %v2613_v13 }
 0x358   : > { %5178 = vset.pattern.permute.xlu1 %v8306_v14  ;;  %5202 = vset.pattern.permute.xlu0 %v8297_v46 }
 0x359   : > { %v2485_v35 = vadd.f32 %v2469_v40, %v2373_v31  ;;  %v1878_v7 = vadd.f32 %v1862_v47, %v1766_v42  ;;  %2441 = vperm.xlu1 %5178, %v6510_v57   ;;  %1502 = vperm.xlu0 %5202, %v6658_v45  }
 0x35b   : > { %v2597_v44 = vadd.f32 %v2581_v50, %v2485_v35  ;;  %v2010_v28 = vpop.permute.xlu1 %2009  ;;  %v1974_v37 = vrot.slane %v1878_v7, 1  ;;  %v2086_v9 = vrot.slane %v1878_v7, 2  ;;  %v6669_v20 = vpop.permute.xlu0 %1713  ;;  %v1958_v8 = vmul.f32 %v6586_v16, %v1878_v7 }
 0x35c   : > { %v2198_v23 = vrot.slane %v1878_v7, 4 }
 0x35d   : > { %v2054_v62 = vmul.f32 %v2010_v28, %v1974_v37  ;;  %5184 = vset.pattern.permute.xlu1 %v8298_v11  ;;  %5203 = vset.pattern.permute.xlu0 %v8299_v1  ;;  %v2709_v48 = vadd.f32 %v2693_v22, %v2597_v44  ;;  %v2166_v38 = vmul.f32 %v6551_v51, %v2086_v9 }
 0x35e   : > { %1725 = vperm.xlu1 %5184, %v6566_v52   ;;  %1937 = vperm.xlu0 %5203, %v6658_v45   ;;  %v6688_v51 = vadd.f32 %v6506_v6, %v6115_v10 }
 0x35f   : > { %v2070_v2 = vadd.f32 %v2054_v62, %v1958_v8  ;;  %4849 = vmatmul.mubr.msk.f32.gmra.mrb[42].mxu1 %vm389_vm0, %v2709_v48 }
 0x360   : > { %v2234_v56 = vpop.permute.xlu1 %2233  ;;  %v6678_v42 = vpop.permute.xlu0 %2129 }
 0x361   : > { %v2182_v16 = vadd.f32 %v2166_v38, %v2070_v2  ;;  %v2278_v31 = vmul.f32 %v2234_v56, %v2198_v23  ;;  %v6719_v56 = vld [vmem:[%s8190_s8] ss:$0 sm:$0xff] }
 0x362   : > { %5187 = vset.pattern.permute.xlu1 %v8309_v26  ;;  %5204 = vset.pattern.permute.xlu0 %v8300_v61 }
 0x363   : > { %v2294_v40 = vadd.f32 %v2278_v31, %v2182_v16  ;;  %2141 = vperm.xlu1 %5187, %v6566_v52   ;;  %2353 = vperm.xlu0 %5204, %v6658_v45   ;;  %v1381_v16 = vadd.f32 %v6719_v56, %v6338_v39 }
 0x365   : > { %v2426_v47 = vpop.permute.xlu1 %2425  ;;  %v2390_v13 = vrot.slane %v2294_v40, 1  ;;  %v2502_v35 = vrot.slane %v2294_v40, 2  ;;  %v6684_v50 = vpop.permute.xlu0 %2545  ;;  %v2374_v7 = vmul.f32 %v6601_v63, %v2294_v40  ;;  %v2614_v22 = vrot.slane %v2294_v40, 4 }
 0x366   : > { %8323 = vst [vmem:[#allocation31_spill] sm:$0xff] %v6684_v50  ;;  %v6699_v63 = vadd.f32 1.0, %v6566_v52 }
 0x367   : > { %v2470_v44 = vmul.f32 %v2426_v47, %v2390_v13  ;;  %5190 = vset.pattern.permute.xlu1 %v8311_v30  ;;  %5205 = vset.pattern.permute.xlu0 %v8302_v43  ;;  %v2582_v37 = vmul.f32 %v6557_v19, %v2502_v35  ;;  %v1543_v47 = vrot.slane %v1381_v16, 1  ;;  %v1671_v13 = vrot.slane %v1381_v16, 2 }
 0x368   : > { %2557 = vperm.xlu1 %5190, %v6566_v52   ;;  %1619 = vperm.xlu0 %5205, %v6688_v51   ;;  %8324 = vst [vmem:[#allocation32_spill] sm:$0xff] %v6699_v63 }
 0x369   : > { %v2486_v28 = vadd.f32 %v2470_v44, %v2374_v7  ;;  %v6737_v7 = vadd.f32 %v6506_v6, %v6125_v15  ;;  %v1639_v44 = vmul.f32 %v6611_v49, %v1543_v47 }
 0x36a   : > { %v2650_v9 = vpop.permute.xlu1 %2649  ;;  %v6696_v8 = vpop.permute.xlu0 %1482 }
 0x36b   : > { %v2598_v10 = vadd.f32 %v2582_v37, %v2486_v28  ;;  %v2694_v62 = vmul.f32 %v2650_v9, %v2614_v22  ;;  %8326 = vst [vmem:[#allocation34_spill] sm:$0xff] %v6737_v7  ;;  %v1783_v28 = vrot.slane %v1381_v16, 4 }
 0x36c   : > { %5191 = vset.pattern.permute.xlu1 %v8297_v46  ;;  %5207 = vset.pattern.permute.xlu0 %v8304_v54 }
 0x36d   : > { %v2710_v48 = vadd.f32 %v2694_v62, %v2598_v10  ;;  %1497 = vperm.xlu1 %5191, %v6699_v63   ;;  %1845 = vperm.xlu0 %5207, %v6688_v51   ;;  %v1863_v15 = vmul.f32 %v6617_v60, %v1783_v28 }
 0x36f   : > { %v1710_v2 = vpop.permute.xlu1 %1709  ;;  %4851 = vmatprep.mubr.msk.f32.mxu1 %vm389_vm0, %v2710_v48  ;;  %v6706_v19 = vpop.permute.xlu0 %1921 }
 0x370   : > { %v1751_v10 = vmul.f32 %v1710_v2, %v1671_v13 }
 0x371   : > { %5192 = vset.pattern.permute.xlu1 %v8299_v1  ;;  %5208 = vset.pattern.permute.xlu0 %v8305_v53 }
 0x372   : > { %1933 = vperm.xlu1 %5192, %v6699_v63   ;;  %2037 = vperm.xlu0 %5208, %v6688_v51  }
 0x374   : > { %v2126_v38 = vpop.permute.xlu1 %2125  ;;  %v6712_v23 = vpop.permute.xlu0 %2337 }
 0x375   : > { %8325 = vst [vmem:[#allocation33_spill] sm:$0xff] %v6712_v23 }
 0x376   : > { %5193 = vset.pattern.permute.xlu1 %v8300_v61  ;;  %5210 = vset.pattern.permute.xlu0 %v8314_v29 }
 0x377   : > { %2349 = vperm.xlu1 %5193, %v6699_v63   ;;  %2261 = vperm.xlu0 %5210, %v6688_v51  }
 0x379   : > { %v6725_v31 = vpop.permute.xlu1 %2541  ;;  %v6727_v40 = vpop.permute.xlu0 %1599 }
 0x37a   : > { %v6740_v22 = vpop.f32.mrb[56].mxu0 }
 0x37b   : > { %5194 = vset.pattern.permute.xlu1 %v8302_v43  ;;  %5211 = vset.pattern.permute.xlu0 %v8306_v14  ;;  %8327 = vst [vmem:[#allocation35_spill] sm:$0xff] %v6740_v22  ;;  %v6744_v9 = vpop.f32.mrb[57].mxu0 }
 0x37c   : > { %1614 = vperm.xlu1 %5194, %v6626_v3   ;;  %2453 = vperm.xlu0 %5211, %v6688_v51  }
 0x37e   : > { %v1478_v35 = vpop.permute.xlu1 %1477  ;;  %v6733_v39 = vpop.permute.xlu0 %1829 }
 0x37f   : > { %v1527_v37 = vmul.f32 %v1478_v35, %v1381_v16 }
 0x380   : > { %5196 = vset.pattern.permute.xlu1 %v8304_v54  ;;  %5217 = vset.pattern.permute.xlu0 %v8298_v11 }
 0x381   : > { %v1655_v62 = vadd.f32 %v1639_v44, %v1527_v37  ;;  %1841 = vperm.xlu1 %5196, %v6626_v3   ;;  %1737 = vperm.xlu0 %5217, %v6737_v7  }
 0x383   : > { %v1767_v48 = vadd.f32 %v1751_v10, %v1655_v62  ;;  %v1918_v49 = vpop.permute.xlu1 %1917  ;;  %v6749_v47 = vpop.permute.xlu0 %2021 }
 0x385   : > { %v1879_v16 = vadd.f32 %v1863_v15, %v1767_v48  ;;  %5197 = vset.pattern.permute.xlu1 %v8305_v53  ;;  %5220 = vset.pattern.permute.xlu0 %v8309_v26 }
 0x386   : > { %2033 = vperm.xlu1 %5197, %v6626_v3   ;;  %2153 = vperm.xlu0 %5220, %v6737_v7  }
 0x387   : > { %v1975_v2 = vrot.slane %v1879_v16, 1  ;;  %v2087_v13 = vrot.slane %v1879_v16, 2  ;;  %v1959_v37 = vmul.f32 %v1918_v49, %v1879_v16  ;;  %v2199_v28 = vrot.slane %v1879_v16, 4 }
 0x388   : > { %v2334_v35 = vpop.permute.xlu1 %2333  ;;  %v6755_v44 = vpop.permute.xlu0 %2245  ;;  %v6766_v49 = vadd.f32 1.0, %v6737_v7 }
 0x389   : > { %8328 = vst [vmem:[#allocation36_spill] sm:$0xff] %v6755_v44  ;;  %v2055_v60 = vmul.f32 %v6629_v41, %v1975_v2  ;;  %v2167_v62 = vmul.f32 %v2126_v38, %v2087_v13  ;;  %v2279_v48 = vmul.f32 %v6641_v34, %v2199_v28 }
 0x38a   : > { %5199 = vset.pattern.permute.xlu1 %v8314_v29  ;;  %5223 = vset.pattern.permute.xlu0 %v8311_v30  ;;  %8329 = vst [vmem:[#allocation37_spill] sm:$0xff] %v6766_v49 }
 0x38b   : > { %v2071_v10 = vadd.f32 %v2055_v60, %v1959_v37  ;;  %2257 = vperm.xlu1 %5199, %v6626_v3   ;;  %2569 = vperm.xlu0 %5223, %v6737_v7  }
 0x38d   : > { %v2183_v15 = vadd.f32 %v2167_v62, %v2071_v10  ;;  %v6763_v50 = vpop.permute.xlu1 %1594  ;;  %v6768_v41 = vpop.permute.xlu0 %2437 }
 0x38e   : > { %8330 = vst [vmem:[#allocation38_spill] sm:$0xff] %v6768_v41 }
 0x38f   : > { %v2295_v16 = vadd.f32 %v2279_v48, %v2183_v15  ;;  %5200 = vset.pattern.permute.xlu1 %v8306_v14  ;;  %5224 = vset.pattern.permute.xlu0 %v8297_v46 }
 0x390   : > { %2449 = vperm.xlu1 %5200, %v6626_v3   ;;  %1512 = vperm.xlu0 %5224, %v6766_v49  }
 0x391   : > { %v2391_v38 = vrot.slane %v2295_v16, 1  ;;  %v2503_v2 = vrot.slane %v2295_v16, 2  ;;  %v2375_v37 = vmul.f32 %v2334_v35, %v2295_v16  ;;  %v2615_v28 = vrot.slane %v2295_v16, 4 }
 0x392   : > { %v6774_v13 = vpop.permute.xlu1 %1825  ;;  %v6776_v34 = vpop.permute.xlu0 %1721 }
 0x393   : > { %v2471_v60 = vmul.f32 %v6649_v24, %v2391_v38  ;;  %v2583_v62 = vmul.f32 %v6725_v31, %v2503_v2  ;;  %v2695_v41 = vmul.f32 %v6661_v0, %v2615_v28  ;;  %v6800_v0 = vadd.f32 %v6506_v6, %v6129_v17  ;;  %v6820_v17 = vld [vmem:[%s8188_s6 + $0x1] ss:$0 sm:$0xff] }
 0x394   : > { %5206 = vset.pattern.permute.xlu1 %v8298_v11  ;;  %5225 = vset.pattern.permute.xlu0 %v8299_v1  ;;  %v6811_v2 = vadd.f32 1.0, %v6688_v51  ;;  %8336 = vst [vmem:[#allocation44_spill] sm:$0xff] %v6820_v17 }
 0x395   : > { %v2487_v10 = vadd.f32 %v2471_v60, %v2375_v37  ;;  %1733 = vperm.xlu1 %5206, %v6688_v51   ;;  %1945 = vperm.xlu0 %5225, %v6766_v49  }
 0x396   : > { %8335 = vst [vmem:[#allocation43_spill] sm:$0xff] %v6811_v2 }
 0x397   : > { %v2599_v15 = vadd.f32 %v2583_v62, %v2487_v10  ;;  %v6784_v48 = vpop.permute.xlu1 %2017  ;;  %v6787_v35 = vpop.permute.xlu0 %2137 }
 0x398   : > { %8331 = vst [vmem:[#allocation39_spill] sm:$0xff] %v6787_v35 }
 0x399   : > { %5209 = vset.pattern.permute.xlu1 %v8309_v26  ;;  %5226 = vset.pattern.permute.xlu0 %v8300_v61  ;;  %v2711_v24 = vadd.f32 %v2695_v41, %v2599_v15 }
 0x39a   : > { %2149 = vperm.xlu1 %5209, %v6688_v51   ;;  %2361 = vperm.xlu0 %5226, %v6766_v49  }
 0x39b   : > { %4852 = vmatmul.mubr.msk.f32.gmra.mrb[44].mxu1 %vm389_vm0, %v2711_v24 }
 0x39c   : > { %v6794_v31 = vpop.permute.xlu1 %2241  ;;  %v6796_v16 = vpop.permute.xlu0 %2553 }
 0x39d   : > { %8332 = vst [vmem:[#allocation40_spill] sm:$0xff] %v6794_v31  ;;  %8333 = vst [vmem:[#allocation41_spill] sm:$0xff] %v6796_v16 }
 0x39e   : > { %5212 = vset.pattern.permute.xlu1 %v8311_v30  ;;  %5227 = vset.pattern.permute.xlu0 %v8302_v43 }
 0x39f   : > { %2565 = vperm.xlu1 %5212, %v6688_v51   ;;  %1629 = vperm.xlu0 %5227, %v6800_v0  }
 0x3a1   : > { %v6806_v41 = vpop.permute.xlu1 %2433  ;;  %v6808_v38 = vpop.permute.xlu0 %1492 }
 0x3a2   : > { %8334 = vst [vmem:[#allocation42_spill] sm:$0xff] %v6806_v41 }
 0x3a3   : > { %5213 = vset.pattern.permute.xlu1 %v8297_v46  ;;  %5229 = vset.pattern.permute.xlu0 %v8304_v54 }
 0x3a4   : > { %1507 = vperm.xlu1 %5213, %v6811_v2   ;;  %1853 = vperm.xlu0 %5229, %v6800_v0  }
 0x3a6   : > { %v6822_v6 = vpop.permute.xlu1 %1717  ;;  %v4844_v37 = vpop.f32.mrb[38].mxu1 }
 0x3a7   : > { %v2853_v60 = vadd.f32 %v4844_v37, %v6820_v17  ;;  %v2847_v28 = vpop.f32.mrb[39].mxu1  ;;  %v6825_v10 = vpop.permute.xlu0 %1929 }
 0x3a8   : > { %8337 = vst [vmem:[#allocation45_spill] sm:$0xff] %v6825_v10  ;;  %v2848_v62 = vadd.f32 %v6820_v17, %v2847_v28  ;;  %5214 = vset.pattern.permute.xlu1 %v8299_v1  ;;  %5230 = vset.pattern.permute.xlu0 %v8305_v53 }
 0x3a9   : > { %v2943_v15 = vmul.f32 0.70710677, %v2853_v60  ;;  %1941 = vperm.xlu1 %5214, %v6811_v2   ;;  %2045 = vperm.xlu0 %5230, %v6800_v0  }
 0x3aa   : > { %v2942_v24 = vmul.f32 0.70710677, %v2848_v62  ;;  %v2926_v10 = vmul.f32 0.5, %v2848_v62 }
 0x3ab   : > { %5364 = verf.f32 %v2943_v15  ;;  %v6832_v16 = vpop.permute.xlu1 %2133  ;;  %v6834_v41 = vpop.permute.xlu0 %2345 }
 0x3ac   : > { %8338 = vst [vmem:[#allocation46_spill] sm:$0xff] %v6832_v16  ;;  %8339 = vst [vmem:[#allocation47_spill] sm:$0xff] %v6834_v41  ;;  %5366 = verf.f32 %v2942_v24 }
 0x3ad   : > { %5215 = vset.pattern.permute.xlu1 %v8300_v61  ;;  %5232 = vset.pattern.permute.xlu0 %v8314_v29 }
 0x3ae   : > { %2357 = vperm.xlu1 %5215, %v6811_v2   ;;  %2269 = vperm.xlu0 %5232, %v6800_v0  }
 0x3b0   : > { %v6840_v37 = vpop.permute.xlu1 %2549  ;;  %v6842_v28 = vpop.permute.xlu0 %1609 }
 0x3b1   : > { %8340 = vst [vmem:[#allocation48_spill] sm:$0xff] %v6840_v37 }
 0x3b2   : > { %5216 = vset.pattern.permute.xlu1 %v8302_v43  ;;  %5233 = vset.pattern.permute.xlu0 %v8306_v14  ;;  %v2927_v43 = vmul.f32 0.5, %v2853_v60 }
 0x3b3   : > { %1624 = vperm.xlu1 %5216, %v6737_v7   ;;  %2461 = vperm.xlu0 %5233, %v6800_v0  }
 0x3b5   : > { %v5365_v15 = vpop.eup %5364  ;;  %v6848_v24 = vpop.permute.xlu1 %1487 }
 0x3b6   : > { %v6850_v41 = vpop.permute.xlu0 %1837  ;;  %v5367_v35 = vpop.eup %5366  ;;  %v2975_v23 = vadd.f32 1.0, %v5365_v15 }
 0x3b7   : > { %v2974_v22 = vadd.f32 1.0, %v5367_v35  ;;  %5218 = vset.pattern.permute.xlu1 %v8304_v54  ;;  %5237 = vset.pattern.permute.xlu0 %v8296_v21 }
 0x3b8   : > { %1849 = vperm.xlu1 %5218, %v6737_v7   ;;  %2661 = vperm.xlu0 %5237, %v6453_v58   ;;  %v2991_v44 = vmul.f32 %v2975_v23, %v2927_v43  ;;  %v6910_v43 = vadd.f32 1.0, %v6800_v0 }
 0x3b9   : > { %v2990_v37 = vmul.f32 %v2974_v22, %v2926_v10 }
 0x3ba   : > { %v6856_v31 = vpop.permute.xlu1 %1925  ;;  %v6858_v16 = vpop.permute.xlu0 %2029  ;;  %8350 = vst [vmem:[#allocation58_spill] sm:$0xff] %v6910_v43 }
 0x3bb   : > { %8341 = vst [vmem:[#allocation49_spill] sm:$0xff] %v6858_v16  ;;  %4874 = vmatprep.mubr.msk.f32.mxu0 %vm389_vm0, %v2990_v37 }
 0x3bc   : > { %5219 = vset.pattern.permute.xlu1 %v8305_v53  ;;  %4875 = vmatmul.mubr.msk.f32.vlgmr.msra.gmra.mrb[58].mxu0 %vm389_vm0, %v2991_v44  ;;  %v8238_v53 = vmov 12  }
 0x3bd   : > { %2669 = vperm.xlu0 %5237, %v6566_v52   ;;  %2041 = vperm.xlu1 %5219, %v6737_v7  }
 0x3bf   : > { %v6865_v54 = vpop.permute.xlu1 %2341  ;;  %v6867_v35 = vpop.permute.xlu0 %2253 }
 0x3c0   : > { %8342 = vst [vmem:[#allocation50_spill] sm:$0xff] %v6865_v54  ;;  %8343 = vst [vmem:[#allocation51_spill] sm:$0xff] %v6867_v35 }
 0x3c1   : > { %2677 = vperm.xlu0 %5237, %v6688_v51   ;;  %5221 = vset.pattern.permute.xlu1 %v8314_v29 }
 0x3c2   : > { %2265 = vperm.xlu1 %5221, %v6737_v7  }
 0x3c4   : > { %v6872_v23 = vpop.permute.xlu1 %1604  ;;  %v6874_v22 = vpop.permute.xlu0 %2445 }
 0x3c5   : > { %8344 = vst [vmem:[#allocation52_spill] sm:$0xff] %v6874_v22  ;;  %2685 = vperm.xlu0 %5237, %v6800_v0  }
 0x3c6   : > { %5222 = vset.pattern.permute.xlu1 %v8306_v14 }
 0x3c7   : > { %2457 = vperm.xlu1 %5222, %v6737_v7  }
 0x3c9   : > { %5243 = vset.pattern.permute.xlu0 %v8238_v53  ;;  %v6880_v44 = vpop.permute.xlu1 %1833  ;;  %v6882_v60 = vpop.permute.xlu0 %1729 }
 0x3ca   : > { %3217 = vperm.xlu0 %5243, %v6087_v59  }
 0x3cb   : > { %5228 = vset.pattern.permute.xlu1 %v8298_v11  ;;  %v6904_v11 = vadd.f32 %v6719_v56, %v6635_v33 }
 0x3cc   : > { %1741 = vperm.xlu1 %5228, %v6800_v0  }
 0x3ce   : > { %3229 = vperm.xlu0 %5243, %v6195_v18   ;;  %v6888_v29 = vpop.permute.xlu1 %2025  ;;  %v6890_v14 = vpop.permute.xlu0 %2145 }
 0x3cf   : > { %8345 = vst [vmem:[#allocation53_spill] sm:$0xff] %v6888_v29  ;;  %8346 = vst [vmem:[#allocation54_spill] sm:$0xff] %v6890_v14  ;;  %v8363_v29 = vld [vmem:[#allocation12_spill] sm:$0xff] }
 0x3d0   : > { %5231 = vset.pattern.permute.xlu1 %v8309_v26 }
 0x3d1   : > { %2157 = vperm.xlu1 %5231, %v6800_v0  }
 0x3d2   : > { %3237 = vperm.xlu0 %5243, %v6294_v32  }
 0x3d3   : > { %v6895_v10 = vpop.permute.xlu1 %2249  ;;  %v6897_v62 = vpop.permute.xlu0 %2561 }
 0x3d4   : > { %8347 = vst [vmem:[#allocation55_spill] sm:$0xff] %v6895_v10  ;;  %8348 = vst [vmem:[#allocation56_spill] sm:$0xff] %v6897_v62 }
 0x3d5   : > { %5234 = vset.pattern.permute.xlu1 %v8311_v30 }
 0x3d6   : > { %3245 = vperm.xlu0 %5243, %v6426_v25   ;;  %2573 = vperm.xlu1 %5234, %v6800_v0   ;;  %v8362_v25 = vld [vmem:[#allocation8_spill] sm:$0xff] }
 0x3d8   : > { %v6906_v37 = vpop.permute.xlu1 %2441  ;;  %v1503_v26 = vpop.permute.xlu0 %1502 }
 0x3d9   : > { %8349 = vst [vmem:[#allocation57_spill] sm:$0xff] %v6906_v37  ;;  %v1532_v15 = vmul.f32 %v1503_v26, %v6904_v11 }
 0x3da   : > { %3253 = vperm.xlu0 %5243, %v6539_v55   ;;  %5235 = vset.pattern.permute.xlu1 %v8297_v46  ;;  %v8240_v46 = vmov 13  }
 0x3db   : > { %1517 = vperm.xlu1 %5235, %v6910_v43  }
 0x3dd   : > { %v6915_v30 = vpop.permute.xlu1 %1725  ;;  %v6917_v53 = vpop.permute.xlu0 %1937 }
 0x3de   : > { %8351 = vst [vmem:[#allocation59_spill] sm:$0xff] %v6917_v53  ;;  %3261 = vperm.xlu0 %5243, %v6658_v45  }
 0x3df   : > { %5236 = vset.pattern.permute.xlu1 %v8296_v21 }
 0x3e0   : > { %2657 = vperm.xlu1 %5236, %v6397_v4  }
 0x3e2   : > { %3269 = vperm.xlu0 %5243, %v6766_v49   ;;  %v6923_v33 = vpop.permute.xlu1 %2141  ;;  %v6925_v26 = vpop.permute.xlu0 %2353 }
 0x3e3   : > { %8352 = vst [vmem:[#allocation60_spill] sm:$0xff] %v6923_v33  ;;  %8353 = vst [vmem:[#allocation61_spill] sm:$0xff] %v6925_v26 }
 0x3e4   : > { %5238 = vset.pattern.permute.xlu1 %v8299_v1 }
 0x3e5   : > { %1949 = vperm.xlu1 %5238, %v6910_v43  }
 0x3e6   : > { %5244 = vset.pattern.permute.xlu0 %v8240_v46 }
 0x3e7   : > { %3309 = vperm.xlu0 %5244, %v6026_v27   ;;  %v6931_v62 = vpop.permute.xlu1 %2557  ;;  %v6933_v22 = vpop.permute.xlu0 %1619 }
 0x3e8   : > { %8354 = vst [vmem:[#allocation62_spill] sm:$0xff] %v6931_v62  ;;  %v8357_v62 = vld [vmem:[#allocation16_spill] sm:$0xff] }
 0x3e9   : > { %5239 = vset.pattern.permute.xlu1 %v8296_v21 }
 0x3ea   : > { %2665 = vperm.xlu1 %5239, %v6510_v57  }
 0x3eb   : > { %3321 = vperm.xlu0 %5244, %v6119_v12  }
 0x3ec   : > { %v6938_v26 = vpop.permute.xlu1 %1497  ;;  %v6940_v1 = vpop.permute.xlu0 %1845 }
 0x3ee   : > { %2673 = vperm.xlu1 %5239, %v6626_v3  }
 0x3ef   : > { %3329 = vperm.xlu0 %5244, %v6213_v36  }
 0x3f1   : > { %v6944_v46 = vpop.permute.xlu1 %1933  ;;  %v6946_v37 = vpop.permute.xlu0 %2037 }
 0x3f2   : > { %8355 = vst [vmem:[#allocation63_spill] sm:$0xff] %v6944_v46  ;;  %8356 = vst [vmem:[#allocation64_spill] sm:$0xff] %v6946_v37  ;;  %5240 = vset.pattern.permute.xlu1 %v8300_v61  ;;  %v1548_v61 = vrot.slane %v6904_v11, 1  ;;  %v8361_v37 = vmov 12  }
 0x3f3   : > { %3337 = vperm.xlu0 %5244, %v8357_v62   ;;  %2365 = vperm.xlu1 %5240, %v6910_v43   ;;  %v1676_v43 = vrot.slane %v6904_v11, 2 }
 0x3f6   : > { %v6951_v49 = vpop.permute.xlu1 %2349  ;;  %v4847_v45 = vpop.f32.mrb[40].mxu1 }
 0x3f7   : > { %8358 = vst [vmem:[#allocation16_spill] sm:$0xff] %v6951_v49  ;;  %v2863_v14 = vadd.f32 %v4847_v45, %v6820_v17  ;;  %3345 = vperm.xlu0 %5244, %v6453_v58   ;;  %v6955_v35 = vpop.permute.xlu0 %2261  ;;  %v2857_v55 = vpop.f32.mrb[41].mxu1  ;;  %5241 = vset.pattern.permute.xlu1 %v8296_v21  ;;  %v1788_v21 = vrot.slane %v6904_v11, 4 }
 0x3f8   : > { %8359 = vst [vmem:[#allocation65_spill] sm:$0xff] %v6955_v35  ;;  %v2858_v54 = vadd.f32 %v6820_v17, %v2857_v55  ;;  %2681 = vperm.xlu1 %5241, %v6737_v7   ;;  %v1756_v55 = vmul.f32 %v6882_v60, %v1676_v43  ;;  %v8365_v43 = vld [vmem:[#allocation13_spill] sm:$0xff] }
 0x3f9   : > { %v2945_v53 = vmul.f32 0.70710677, %v2863_v14 }
 0x3fa   : > { %v2944_v49 = vmul.f32 0.70710677, %v2858_v54 }
 0x3fb   : > { %5368 = verf.f32 %v2945_v53  ;;  %3353 = vperm.xlu0 %5244, %v6566_v52   ;;  %v1615_v45 = vpop.permute.xlu1 %1614  ;;  %v6963_v33 = vpop.permute.xlu0 %2453 }
 0x3fc   : > { %8360 = vst [vmem:[#allocation66_spill] sm:$0xff] %v6963_v33  ;;  %5370 = verf.f32 %v2944_v49  ;;  %v1644_v35 = vmul.f32 %v1615_v45, %v1548_v61  ;;  %5242 = vset.pattern.permute.xlu1 %v8361_v37  ;;  %v2928_v45 = vmul.f32 0.5, %v2858_v54  ;;  %v8371_v54 = vld [vmem:[#allocation22_spill] sm:$0xff] }
 0x3fd   : > { %3213 = vperm.xlu1 %5242, %v8362_v25  }
 0x3fe   : > { %v1660_v10 = vadd.f32 %v1644_v35, %v1532_v15 }
 0x3ff   : > { %3361 = vperm.xlu0 %5244, %v6688_v51  }
 0x400   : > { %v1842_v46 = vpop.permute.xlu1 %1841  ;;  %v1772_v53 = vadd.f32 %v1756_v55, %v1660_v10  ;;  %v6970_v32 = vpop.permute.xlu0 %1737  ;;  %v8253_v55 = vmov 14  }
 0x401   : > { %v1868_v16 = vmul.f32 %v1842_v46, %v1788_v21  ;;  %3221 = vperm.xlu1 %5242, %v8363_v29   ;;  %v2929_v46 = vmul.f32 0.5, %v2863_v14  ;;  %v8366_v21 = vld [vmem:[#allocation9_spill] sm:$0xff] }
 0x402   : > { %v8367_v29 = vld [vmem:[#allocation17_spill] sm:$0xff] }
 0x403   : > { %v6973_v49 = vadd.f32 %v1868_v16, %v1772_v53  ;;  %3369 = vperm.xlu0 %5244, %v6800_v0  }
 0x405   : > { %v5369_v61 = vpop.eup %5368  ;;  %v6976_v11 = vpop.permute.xlu1 %2033  ;;  %3225 = vperm.xlu1 %5242, %v8365_v43  }
 0x406   : > { %v6978_v60 = vpop.permute.xlu0 %2153  ;;  %v5371_v35 = vpop.eup %5370  ;;  %v2977_v15 = vadd.f32 1.0, %v5369_v61  ;;  %v8370_v61 = vld [vmem:[#allocation11_spill] sm:$0xff] }
 0x407   : > { %8364 = vst [vmem:[#allocation67_spill] sm:$0xff] %v6978_v60  ;;  %v2976_v10 = vadd.f32 1.0, %v5371_v35  ;;  %5247 = vset.pattern.permute.xlu0 %v8253_v55 }
 0x408   : > { %3425 = vperm.xlu0 %5247, %v8366_v21   ;;  %v2993_v53 = vmul.f32 %v2977_v15, %v2929_v46 }
 0x409   : > { %v2992_v16 = vmul.f32 %v2976_v10, %v2928_v45  ;;  %3233 = vperm.xlu1 %5242, %v8367_v29   ;;  %v8373_v45 = vld [vmem:[#allocation14_spill] sm:$0xff] }
 0x40a   : > { %v6984_v25 = vpop.permute.xlu1 %2257  ;;  %v6986_v37 = vpop.permute.xlu0 %2569  ;;  %v8380_v29 = vld [vmem:[#allocation10_spill] sm:$0xff] }
 0x40b   : > { %8368 = vst [vmem:[#allocation68_spill] sm:$0xff] %v6984_v25  ;;  %8369 = vst [vmem:[#allocation69_spill] sm:$0xff] %v6986_v37  ;;  %4877 = vmatprep.mubr.msk.f32.mxu0 %vm389_vm0, %v2992_v16  ;;  %v8382_v37 = vld [vmem:[#allocation20_spill] sm:$0xff] }
 0x40c   : > { %3437 = vperm.xlu0 %5247, %v8370_v61   ;;  %4878 = vmatmul.mubr.msk.f32.gmra.mrb[60].mxu0 %vm389_vm0, %v2993_v53  ;;  %v8376_v53 = vmov 13  }
 0x40d   : > { %3241 = vperm.xlu1 %5242, %v8371_v54  }
 0x40f   : > { %v6992_v35 = vpop.permute.xlu1 %2449  ;;  %v6994_v14 = vpop.permute.xlu0 %1512 }
 0x410   : > { %8372 = vst [vmem:[#allocation70_spill] sm:$0xff] %v6992_v35  ;;  %3445 = vperm.xlu0 %5247, %v8373_v45  }
 0x411   : > { %3249 = vperm.xlu1 %5242, %v6589_v5  }
 0x414   : > { %3453 = vperm.xlu0 %5247, %v6397_v4   ;;  %v6999_v15 = vpop.permute.xlu1 %1733  ;;  %v7001_v10 = vpop.permute.xlu0 %1945 }
 0x415   : > { %8374 = vst [vmem:[#allocation71_spill] sm:$0xff] %v7001_v10  ;;  %3257 = vperm.xlu1 %5242, %v6699_v63   ;;  %v8379_v63 = vld [vmem:[#allocation21_spill] sm:$0xff] }
 0x416   : > { %v1386_v54 = vadd.f32 %v6719_v56, %v8379_v63 }
 0x418   : > { %3461 = vperm.xlu0 %5247, %v6510_v57  }
 0x419   : > { %v7005_v46 = vpop.permute.xlu1 %2149  ;;  %v7007_v16 = vpop.permute.xlu0 %2361  ;;  %3265 = vperm.xlu1 %5242, %v6811_v2  }
 0x41a   : > { %8375 = vst [vmem:[#allocation72_spill] sm:$0xff] %v7007_v16  ;;  %v8261_v16 = vmov 15  }
 0x41c   : > { %3469 = vperm.xlu0 %5247, %v6626_v3  }
 0x41d   : > { %5245 = vset.pattern.permute.xlu1 %v8376_v53  ;;  %v1391_v53 = vadd.f32 %v6719_v56, %v8382_v37  ;;  %v1672_v37 = vrot.slane %v1386_v54, 2 }
 0x41e   : > { %v7012_v55 = vpop.permute.xlu1 %2565  ;;  %v7014_v5 = vpop.permute.xlu0 %1629  ;;  %3313 = vperm.xlu1 %5245, %v8366_v21  }
 0x41f   : > { %8377 = vst [vmem:[#allocation73_spill] sm:$0xff] %v7012_v55  ;;  %8378 = vst [vmem:[#allocation74_spill] sm:$0xff] %v7014_v5  ;;  %v1544_v55 = vrot.slane %v1386_v54, 1  ;;  %v1545_v33 = vrot.slane %v1391_v53, 1  ;;  %v1529_v60 = vmul.f32 %v6848_v24, %v1391_v53  ;;  %v1673_v10 = vrot.slane %v1391_v53, 2 }
 0x420   : > { %3477 = vperm.xlu0 %5247, %v6737_v7   ;;  %v1784_v5 = vrot.slane %v1386_v54, 4  ;;  %v1785_v24 = vrot.slane %v1391_v53, 4 }
 0x421   : > { %v1640_v21 = vmul.f32 %v6763_v50, %v1544_v55  ;;  %v1752_v55 = vmul.f32 %v6669_v20, %v1672_v37 }
 0x422   : > { %3317 = vperm.xlu1 %5245, %v8380_v29  }
 0x423   : > { %v7021_v43 = vpop.permute.xlu1 %1507  ;;  %v7023_v2 = vpop.permute.xlu0 %1853 }
 0x424   : > { %8381 = vst [vmem:[#allocation21_spill] sm:$0xff] %v7023_v2  ;;  %5248 = vset.pattern.permute.xlu0 %v8261_v16  ;;  %v1528_v2 = vmul.f32 %v6696_v8, %v1386_v54  ;;  %v1641_v16 = vmul.f32 %v6727_v40, %v1545_v33  ;;  %v1753_v8 = vmul.f32 %v6822_v6, %v1673_v10  ;;  %v8385_v33 = vld [vmem:[#allocation26_spill] sm:$0xff] }
 0x425   : > { %3533 = vperm.xlu0 %5248, %v6026_v27   ;;  %v1864_v40 = vmul.f32 %v6774_v13, %v1784_v5  ;;  %v1865_v5 = vmul.f32 %v6733_v39, %v1785_v24  ;;  %v8387_v13 = vld [vmem:[#allocation25_spill] sm:$0xff] }
 0x426   : > { %3325 = vperm.xlu1 %5245, %v8370_v61   ;;  %v1656_v61 = vadd.f32 %v1640_v21, %v1528_v2  ;;  %v1657_v50 = vadd.f32 %v1641_v16, %v1529_v60  ;;  %v1396_v2 = vadd.f32 %v6719_v56, %v8385_v33 }
 0x428   : > { %v7030_v35 = vpop.permute.xlu1 %1941  ;;  %v7032_v63 = vpop.permute.xlu0 %2045  ;;  %v1769_v21 = vadd.f32 %v1753_v8, %v1657_v50  ;;  %v1546_v60 = vrot.slane %v1396_v2, 1 }
 0x429   : > { %8383 = vst [vmem:[#allocation10_spill] sm:$0xff] %v7032_v63  ;;  %3545 = vperm.xlu0 %5248, %v6119_v12  }
 0x42a   : > { %3333 = vperm.xlu1 %5245, %v8373_v45   ;;  %v1768_v45 = vadd.f32 %v1752_v55, %v1656_v61  ;;  %v7063_v61 = vadd.f32 %v6719_v56, %v8387_v13  ;;  %v7070_v50 = vadd.f32 %v1865_v5, %v1769_v21  ;;  %v1642_v55 = vmul.f32 %v6872_v23, %v1546_v60 }
 0x42b   : > { %v1674_v21 = vrot.slane %v1396_v2, 2  ;;  %v1786_v13 = vrot.slane %v1396_v2, 4 }
 0x42c   : > { %v7066_v53 = vadd.f32 %v1864_v40, %v1768_v45  ;;  %v1547_v8 = vrot.slane %v7063_v61, 1  ;;  %v8388_v45 = vld [vmem:[#allocation29_spill] sm:$0xff]  ;;  %v1977_v23 = vrot.slane %v7070_v50, 1  ;;  %v1531_v60 = vmul.f32 %v6938_v26, %v7063_v61 }
 0x42d   : > { %3553 = vperm.xlu0 %5248, %v6213_v36   ;;  %v7041_v25 = vpop.permute.xlu1 %2357  ;;  %v7043_v63 = vpop.permute.xlu0 %2269  ;;  %v7081_v40 = vadd.f32 %v6719_v56, %v8388_v45  ;;  %v1675_v45 = vrot.slane %v7063_v61, 2 }
 0x42e   : > { %8384 = vst [vmem:[#allocation20_spill] sm:$0xff] %v7043_v63  ;;  %3341 = vperm.xlu1 %5245, %v6397_v4   ;;  %v1976_v33 = vrot.slane %v7066_v53, 1  ;;  %v2088_v26 = vrot.slane %v7066_v53, 2 }
 0x430   : > { %v2056_v4 = vmul.f32 %v6784_v48, %v1976_v33  ;;  %v1960_v48 = vmul.f32 %v6706_v19, %v7066_v53 }
 0x431   : > { %3561 = vperm.xlu0 %5248, %v8357_v62  }
 0x432   : > { %v7052_v54 = vpop.permute.xlu1 %1624  ;;  %v4850_v63 = vpop.f32.mrb[42].mxu1  ;;  %3349 = vperm.xlu1 %5245, %v6510_v57  }
 0x433   : > { %v7056_v20 = vadd.f32 %v4850_v63, %v6820_v17  ;;  %v7058_v16 = vpop.permute.xlu0 %2461  ;;  %v2867_v6 = vpop.f32.mrb[43].mxu1 }
 0x434   : > { %8386 = vst [vmem:[#allocation26_spill] sm:$0xff] %v7058_v16  ;;  %v2868_v10 = vadd.f32 %v6820_v17, %v2867_v6  ;;  %v1530_v6 = vmul.f32 %v6808_v38, %v1396_v2  ;;  %v1754_v2 = vmul.f32 %v6776_v34, %v1674_v21  ;;  %v1533_v34 = vmul.f32 %v7021_v43, %v7081_v40 }
 0x435   : > { %v2947_v37 = vmul.f32 0.70710677, %v7056_v20  ;;  %3569 = vperm.xlu0 %5248, %v6453_v58   ;;  %v8389_v21 = vmov 14  }
 0x436   : > { %v2946_v63 = vmul.f32 0.70710677, %v2868_v10  ;;  %3357 = vperm.xlu1 %5245, %v6626_v3   ;;  %v1658_v5 = vadd.f32 %v1642_v55, %v1530_v6  ;;  %v1549_v3 = vrot.slane %v7081_v40, 1  ;;  %v1789_v55 = vrot.slane %v7081_v40, 4 }
 0x437   : > { %5372 = verf.f32 %v2947_v37  ;;  %v7074_v39 = vpop.permute.xlu1 %1849  ;;  %v7076_v24 = vpop.permute.xlu0 %2661  ;;  %v1643_v37 = vmul.f32 %v6842_v28, %v1547_v8  ;;  %v2057_v28 = vmul.f32 %v6749_v47, %v1977_v23  ;;  %v1677_v6 = vrot.slane %v7081_v40, 2 }
 0x438   : > { %5374 = verf.f32 %v2946_v63  ;;  %v1787_v63 = vrot.slane %v7063_v61, 4  ;;  %v7106_v61 = vadd.f32 %v6719_v56, %v6744_v9  ;;  %v1770_v33 = vadd.f32 %v1754_v2, %v1658_v5 }
 0x439   : > { %3577 = vperm.xlu0 %5248, %v6566_v52   ;;  %v1659_v8 = vadd.f32 %v1643_v37, %v1531_v60  ;;  %v2200_v47 = vrot.slane %v7066_v53, 4  ;;  %v1961_v23 = vmul.f32 %v6856_v31, %v7070_v50  ;;  %v2089_v9 = vrot.slane %v7070_v50, 2 }
 0x43a   : > { %3365 = vperm.xlu1 %5245, %v6737_v7   ;;  %v1866_v7 = vmul.f32 %v6880_v44, %v1786_v13  ;;  %v1755_v60 = vmul.f32 %v6915_v30, %v1675_v45  ;;  %v2072_v44 = vadd.f32 %v2056_v4, %v1960_v48  ;;  %v2168_v13 = vmul.f32 %v6678_v42, %v2088_v26  ;;  %v8390_v4 = vld [vmem:[#allocation46_spill] sm:$0xff] }
 0x43b   : > { %v1645_v43 = vmul.f32 %v6933_v22, %v1549_v3  ;;  %v1550_v40 = vrot.slane %v7106_v61, 1  ;;  %v2073_v37 = vadd.f32 %v2057_v28, %v1961_v23  ;;  %v2930_v16 = vmul.f32 0.5, %v2868_v10 }
 0x43c   : > { %v7094_v38 = vpop.permute.xlu0 %2669  ;;  %v7096_v57 = vpop.permute.xlu1 %2041  ;;  %v1771_v2 = vadd.f32 %v1755_v60, %v1659_v8  ;;  %v7129_v45 = vadd.f32 %v1866_v7, %v1770_v33  ;;  %v2169_v48 = vmul.f32 %v8390_v4, %v2089_v9  ;;  %v2201_v42 = vrot.slane %v7070_v50, 4  ;;  %v8391_v8 = vld [vmem:[#allocation40_spill] sm:$0xff] }
 0x43d   : > { %3585 = vperm.xlu0 %5248, %v6688_v51   ;;  %v1867_v3 = vmul.f32 %v6850_v41, %v1787_v63  ;;  %v2931_v22 = vmul.f32 0.5, %v7056_v20  ;;  %v2184_v28 = vadd.f32 %v2168_v13, %v2072_v44  ;;  %v2280_v23 = vmul.f32 %v8391_v8, %v2200_v47  ;;  %v8392_v47 = vld [vmem:[#allocation36_spill] sm:$0xff] }
 0x43e   : > { %5246 = vset.pattern.permute.xlu1 %v8389_v21  ;;  %v1661_v21 = vadd.f32 %v1645_v43, %v1533_v34  ;;  %v1757_v7 = vmul.f32 %v6999_v15, %v1677_v6  ;;  %v8275_v10 = vmov 16   ;;  %v2185_v34 = vadd.f32 %v2169_v48, %v2073_v37 }
 0x43f   : > { %3421 = vperm.xlu1 %5246, %v6026_v27   ;;  %v7141_v9 = vadd.f32 %v1867_v3, %v1771_v2  ;;  %v1978_v20 = vrot.slane %v7129_v45, 1  ;;  %v2281_v60 = vmul.f32 %v8392_v47, %v2201_v42  ;;  %v7152_v15 = vadd.f32 %v2280_v23, %v2184_v28  ;;  %v8397_v3 = vld [vmem:[#allocation49_spill] sm:$0xff] }
 0x440   : > { %v7121_v19 = vpop.permute.xlu0 %2677  ;;  %v1773_v63 = vadd.f32 %v1757_v7, %v1661_v21  ;;  %v1678_v13 = vrot.slane %v7106_v61, 2  ;;  %v1534_v43 = vmul.f32 %v6994_v14, %v7106_v61  ;;  %v8395_v14 = vld [vmem:[#allocation45_spill] sm:$0xff]  ;;  %v2090_v48 = vrot.slane %v7129_v45, 2 }
 0x441   : > { %v5373_v5 = vpop.eup %5372  ;;  %3593 = vperm.xlu0 %5248, %v6800_v0   ;;  %v7127_v53 = vpop.permute.xlu1 %2265  ;;  %v1979_v44 = vrot.slane %v7141_v9, 1  ;;  %v2392_v21 = vrot.slane %v7152_v15, 1  ;;  %v1962_v4 = vmul.f32 %v8395_v14, %v7129_v45  ;;  %v1980_v8 = vrot.slane %v6973_v49, 1 }
 0x442   : > { %v5375_v31 = vpop.eup %5374  ;;  %v2979_v30 = vadd.f32 1.0, %v5373_v5  ;;  %v7157_v5 = vadd.f32 %v2281_v60, %v2185_v34  ;;  %v1758_v28 = vmul.f32 %v6970_v32, %v1678_v13  ;;  %v8399_v34 = vld [vmem:[#allocation63_spill] sm:$0xff]  ;;  %v8400_v60 = vld [vmem:[#allocation33_spill] sm:$0xff]  ;;  %v2202_v13 = vrot.slane %v7129_v45, 4 }
 0x443   : > { %v2978_v17 = vadd.f32 1.0, %v5375_v31  ;;  %3429 = vperm.xlu1 %5246, %v8380_v29   ;;  %v8394_v31 = vld [vmem:[#allocation35_spill] sm:$0xff] }
 0x444   : > { %v7136_v26 = vpop.permute.xlu0 %2685  ;;  %v2995_v50 = vmul.f32 %v2979_v30, %v2931_v22  ;;  %v7167_v37 = vadd.f32 %v6719_v56, %v8394_v31  ;;  %v1790_v30 = vrot.slane %v7106_v61, 4  ;;  %v2393_v56 = vrot.slane %v7157_v5, 1  ;;  %v8398_v61 = vld [vmem:[#allocation15_spill] sm:$0xff] }
 0x445   : > { %v2994_v33 = vmul.f32 %v2978_v17, %v2930_v16  ;;  %5253 = vset.pattern.permute.xlu0 %v8275_v10  ;;  %v1646_v17 = vmul.f32 %v7052_v54, %v1550_v40  ;;  %v1869_v16 = vmul.f32 %v6940_v1, %v1789_v55  ;;  %v8393_v54 = vld [vmem:[#allocation53_spill] sm:$0xff]  ;;  %v2059_v22 = vmul.f32 %v8397_v3, %v1979_v44 }
 0x446   : > { %3633 = vperm.xlu0 %5253, %v6087_v59   ;;  %v7144_v41 = vpop.permute.xlu1 %2457  ;;  %v2058_v40 = vmul.f32 %v8393_v54, %v1978_v20  ;;  %v1551_v7 = vrot.slane %v7167_v37, 1  ;;  %v2091_v20 = vrot.slane %v7141_v9, 2  ;;  %v1870_v47 = vmul.f32 %v7074_v39, %v1790_v30 }
 0x447   : > { %4880 = vmatprep.mubr.msk.f32.mxu0 %vm389_vm0, %v2994_v33  ;;  %3433 = vperm.xlu1 %5246, %v6119_v12   ;;  %v7169_v1 = vadd.f32 %v1869_v16, %v1773_v63  ;;  %v1662_v2 = vadd.f32 %v1646_v17, %v1534_v43  ;;  %v2376_v17 = vmul.f32 %v8400_v60, %v7152_v15  ;;  %v8401_v16 = vld [vmem:[#allocation39_spill] sm:$0xff]  ;;  %v2504_v54 = vrot.slane %v7152_v15, 2  ;;  %v8407_v60 = vld [vmem:[#allocation64_spill] sm:$0xff] }
 0x448   : > { %4881 = vmatmul.mubr.msk.f32.gmra.mrb[62].mxu0 %vm389_vm0, %v2995_v50  ;;  %v2074_v23 = vadd.f32 %v2058_v40, %v1962_v4  ;;  %v1963_v50 = vmul.f32 %v8399_v34, %v7141_v9  ;;  %v2170_v44 = vmul.f32 %v8401_v16, %v2090_v48  ;;  %v8403_v40 = vld [vmem:[#allocation42_spill] sm:$0xff]  ;;  %v2060_v30 = vmul.f32 %v6976_v11, %v1980_v8  ;;  %v8405_v4 = vld [vmem:[#allocation19_spill] sm:$0xff]  ;;  %v8408_v16 = vld [vmem:[#allocation60_spill] sm:$0xff] }
 0x449   : > { %v7155_v6 = vpop.permute.xlu0 %3217  ;;  %v1981_v33 = vrot.slane %v7169_v1, 1  ;;  %v1774_v63 = vadd.f32 %v1758_v28, %v1662_v2  ;;  %v2472_v31 = vmul.f32 %v8403_v40, %v2392_v21  ;;  %v8404_v2 = vld [vmem:[#allocation38_spill] sm:$0xff]  ;;  %v8406_v28 = vld [vmem:[#allocation55_spill] sm:$0xff]  ;;  %v2203_v48 = vrot.slane %v7141_v9, 4 }
 0x44a   : > { %3645 = vperm.xlu0 %5253, %v6195_v18   ;;  %v2473_v14 = vmul.f32 %v8404_v2, %v2393_v56  ;;  %v2075_v39 = vadd.f32 %v2059_v22, %v1963_v50  ;;  %v2186_v3 = vadd.f32 %v2170_v44, %v2074_v23  ;;  %v2282_v34 = vmul.f32 %v8406_v28, %v2202_v13  ;;  %v8410_v11 = vld [vmem:[#allocation50_spill] sm:$0xff]  ;;  %v8412_v13 = vld [vmem:[#allocation24_spill] sm:$0xff]  ;;  %v8413_v28 = vld [vmem:[#allocation51_spill] sm:$0xff] }
 0x44b   : > { %v7171_v55 = vpop.permute.xlu1 %1741  ;;  %3441 = vperm.xlu1 %5246, %v6213_v36   ;;  %v2061_v45 = vmul.f32 %v8407_v60, %v1981_v33  ;;  %v2171_v10 = vmul.f32 %v8408_v16, %v2091_v20  ;;  %v2092_v21 = vrot.slane %v6973_v49, 2  ;;  %v7213_v56 = vadd.f32 %v1870_v47, %v1774_v63  ;;  %v8414_v16 = vld [vmem:[#allocation54_spill] sm:$0xff] }
 0x44c   : > { %v2377_v22 = vmul.f32 %v8410_v11, %v7157_v5  ;;  %v1965_v8 = vmul.f32 %v7030_v35, %v7169_v1  ;;  %v2093_v9 = vrot.slane %v7169_v1, 2  ;;  %v2616_v50 = vrot.slane %v7152_v15, 4 }
 0x44d   : > { %v7179_v42 = vpop.permute.xlu0 %3229  ;;  %v2187_v20 = vadd.f32 %v2171_v10, %v2075_v39  ;;  %v1791_v63 = vrot.slane %v7167_v37, 4  ;;  %v2505_v47 = vrot.slane %v7157_v5, 2  ;;  %v7229_v2 = vadd.f32 %v2282_v34, %v2186_v3  ;;  %v8417_v34 = vld [vmem:[#allocation68_spill] sm:$0xff] }
 0x44e   : > { %8396 = vst [vmem:[#allocation25_spill] sm:$0xff] %v7179_v42  ;;  %3653 = vperm.xlu0 %5253, %v8398_v61   ;;  %v2489_v40 = vadd.f32 %v2473_v14, %v2377_v22  ;;  %v2077_v35 = vadd.f32 %v2061_v45, %v1965_v8  ;;  %v2283_v60 = vmul.f32 %v8413_v28, %v2203_v48  ;;  %v1982_v10 = vrot.slane %v7213_v56, 1  ;;  %v8416_v14 = vld [vmem:[#allocation31_spill] sm:$0xff]  ;;  %v8420_v8 = vld [vmem:[#allocation74_spill] sm:$0xff] }
 0x44f   : > { %3449 = vperm.xlu1 %5246, %v8357_v62   ;;  %v2172_v11 = vmul.f32 %v8414_v16, %v2092_v21  ;;  %v2173_v15 = vmul.f32 %v7005_v46, %v2093_v9  ;;  %v2584_v39 = vmul.f32 %v8416_v14, %v2504_v54  ;;  %v8419_v21 = vld [vmem:[#allocation30_spill] sm:$0xff]  ;;  %v1647_v46 = vmul.f32 %v8420_v8, %v1551_v7  ;;  %v8426_v14 = vld [vmem:[#allocation47_spill] sm:$0xff] }
 0x450   : > { %v7193_v32 = vpop.permute.xlu1 %2157  ;;  %v2394_v16 = vrot.slane %v7229_v2, 1  ;;  %v2617_v54 = vrot.slane %v7157_v5, 4  ;;  %v2506_v7 = vrot.slane %v7229_v2, 2 }
 0x451   : > { %v7199_v43 = vpop.permute.xlu0 %3237  ;;  %v2189_v9 = vadd.f32 %v2173_v15, %v2077_v35  ;;  %v8424_v35 = vld [vmem:[#allocation37_spill] sm:$0xff] }
 0x452   : > { %8402 = vst [vmem:[#allocation29_spill] sm:$0xff] %v7199_v43  ;;  %3661 = vperm.xlu0 %5253, %v8405_v4   ;;  %v8409_v43 = vld [vmem:[#allocation59_spill] sm:$0xff] }
 0x453   : > { %v1964_v42 = vmul.f32 %v8409_v43, %v6973_v49  ;;  %3457 = vperm.xlu1 %5246, %v6453_v58   ;;  %v2488_v43 = vadd.f32 %v2472_v31, %v2376_v17  ;;  %v1679_v17 = vrot.slane %v7167_v37, 2 }
 0x455   : > { %v7221_v23 = vpop.permute.xlu0 %3245  ;;  %v7223_v33 = vpop.permute.xlu1 %2573  ;;  %v2076_v44 = vadd.f32 %v2060_v30, %v1964_v42  ;;  %v2205_v42 = vrot.slane %v7169_v1, 4  ;;  %v7242_v30 = vadd.f32 %v2283_v60, %v2187_v20  ;;  %v2600_v28 = vadd.f32 %v2584_v39, %v2488_v43 }
 0x456   : > { %8411 = vst [vmem:[#allocation46_spill] sm:$0xff] %v7221_v23  ;;  %3669 = vperm.xlu0 %5253, %v8412_v13   ;;  %v2204_v23 = vrot.slane %v6973_v49, 4  ;;  %v8418_v49 = vld [vmem:[#allocation48_spill] sm:$0xff]  ;;  %v2062_v20 = vmul.f32 %v7096_v57, %v1982_v10  ;;  %v2094_v57 = vrot.slane %v7213_v56, 2  ;;  %v8425_v10 = vld [vmem:[#allocation21_spill] sm:$0xff]  ;;  %v2378_v39 = vmul.f32 %v8426_v14, %v7229_v2  ;;  %v8435_v14 = vld [vmem:[#allocation10_spill] sm:$0xff] }
 0x457   : > { %3465 = vperm.xlu1 %5246, %v6566_v52   ;;  %v2188_v3 = vadd.f32 %v2172_v11, %v2076_v44  ;;  %v2585_v45 = vmul.f32 %v8418_v49, %v2505_v47  ;;  %v1759_v47 = vmul.f32 %v7171_v55, %v1679_v17  ;;  %v1871_v15 = vmul.f32 %v8425_v10, %v1791_v63  ;;  %v8427_v49 = vld [vmem:[#allocation57_spill] sm:$0xff] }
 0x458   : > { %v2284_v48 = vmul.f32 %v8417_v34, %v2204_v23  ;;  %v8421_v23 = vld [vmem:[#allocation65_spill] sm:$0xff]  ;;  %v2697_v34 = vmul.f32 %v7076_v24, %v2617_v54  ;;  %v8277_v54 = vmov 17  }
 0x459   : > { %v7239_v31 = vpop.permute.xlu0 %3253  ;;  %v2285_v44 = vmul.f32 %v8421_v23, %v2205_v42  ;;  %v8429_v63 = vld [vmem:[#allocation41_spill] sm:$0xff] }
 0x45a   : > { %8415 = vst [vmem:[#allocation40_spill] sm:$0xff] %v7239_v31  ;;  %3677 = vperm.xlu0 %5253, %v8419_v21   ;;  %v1518_v22 = vpop.permute.xlu1 %1517  ;;  %v2601_v31 = vadd.f32 %v2585_v45, %v2489_v40  ;;  %v7259_v43 = vadd.f32 %v2284_v48, %v2188_v3  ;;  %v8423_v40 = vld [vmem:[#allocation71_spill] sm:$0xff]  ;;  %v2474_v45 = vmul.f32 %v8427_v49, %v2394_v16  ;;  %v2206_v16 = vrot.slane %v7213_v56, 4 }
 0x45b   : > { %v1535_v1 = vmul.f32 %v1518_v22, %v7167_v37  ;;  %3473 = vperm.xlu1 %5246, %v6688_v51   ;;  %v2395_v37 = vrot.slane %v7242_v30, 1  ;;  %v1966_v5 = vmul.f32 %v8423_v40, %v7213_v56  ;;  %v7266_v42 = vadd.f32 %v2285_v44, %v2189_v9 }
 0x45c   : > { %v2507_v22 = vrot.slane %v7242_v30, 2  ;;  %v2586_v9 = vmul.f32 %v8429_v63, %v2506_v7  ;;  %v2396_v44 = vrot.slane %v7259_v43, 1  ;;  %v8432_v7 = vld [vmem:[#allocation16_spill] sm:$0xff]  ;;  %v2490_v63 = vadd.f32 %v2474_v45, %v2378_v39  ;;  %v8439_v39 = vld [vmem:[#allocation61_spill] sm:$0xff] }
 0x45d   : > { %v1663_v60 = vadd.f32 %v1647_v46, %v1535_v1  ;;  %v7255_v11 = vpop.permute.xlu0 %3261  ;;  %v2078_v3 = vadd.f32 %v2062_v20, %v1966_v5  ;;  %v8430_v1 = vld [vmem:[#allocation52_spill] sm:$0xff]  ;;  %v2379_v5 = vmul.f32 %v8432_v7, %v7242_v30  ;;  %v2380_v45 = vmul.f32 %v8439_v39, %v7259_v43 }
 0x45e   : > { %8422 = vst [vmem:[#allocation36_spill] sm:$0xff] %v7255_v11  ;;  %3685 = vperm.xlu0 %5253, %v8424_v35   ;;  %v2475_v23 = vmul.f32 %v8430_v1, %v2395_v37  ;;  %v2713_v37 = vadd.f32 %v2697_v34, %v2601_v31  ;;  %v8436_v1 = vld [vmem:[#allocation70_spill] sm:$0xff]  ;;  %v8482_v11 = vmov 17  }
 0x45f   : > { %v1775_v55 = vadd.f32 %v1759_v47, %v1663_v60  ;;  %v2658_v17 = vpop.permute.xlu1 %2657  ;;  %3481 = vperm.xlu1 %5246, %v6800_v0   ;;  %v8431_v47 = vld [vmem:[#allocation67_spill] sm:$0xff]  ;;  %v8437_v31 = vld [vmem:[#allocation62_spill] sm:$0xff] }
 0x460   : > { %v2696_v48 = vmul.f32 %v2658_v17, %v2616_v50  ;;  %v2174_v60 = vmul.f32 %v8431_v47, %v2094_v57  ;;  %v2397_v50 = vrot.slane %v7266_v42, 1  ;;  %v8434_v17 = vld [vmem:[#allocation9_spill] sm:$0xff]  ;;  %v2476_v47 = vmul.f32 %v8436_v1, %v2396_v44 }
 0x461   : > { %v1887_v8 = vadd.f32 %v1871_v15, %v1775_v55  ;;  %v7274_v46 = vpop.permute.xlu0 %3269  ;;  %v8433_v15 = vmov 15   ;;  %v2286_v55 = vmul.f32 %v7127_v53, %v2206_v16  ;;  %v2587_v34 = vmul.f32 %v8437_v31, %v2507_v22 }
 0x462   : > { %8428 = vst [vmem:[#allocation53_spill] sm:$0xff] %v7274_v46  ;;  %v2712_v24 = vadd.f32 %v2696_v48, %v2600_v28  ;;  %5254 = vset.pattern.permute.xlu0 %v8277_v54  ;;  %v2190_v10 = vadd.f32 %v2174_v60, %v2078_v3  ;;  %v2618_v28 = vrot.slane %v7229_v2, 4  ;;  %v2619_v3 = vrot.slane %v7242_v30, 4  ;;  %v8479_v46 = vld [vmem:[#allocation43_spill] sm:$0xff] }
 0x463   : > { %3725 = vperm.xlu0 %5254, %v6026_v27   ;;  %v1983_v20 = vrot.slane %v1887_v8, 1  ;;  %v2095_v40 = vrot.slane %v1887_v8, 2  ;;  %5249 = vset.pattern.permute.xlu1 %v8433_v15  ;;  %v2207_v49 = vrot.slane %v1887_v8, 4  ;;  %v2491_v2 = vadd.f32 %v2475_v23, %v2379_v5 }
 0x464   : > { %v1950_v57 = vpop.permute.xlu1 %1949  ;;  %4854 = vmatprep.mubr.msk.f32.mxu1 %vm389_vm0, %v2712_v24  ;;  %3537 = vperm.xlu1 %5249, %v8434_v17   ;;  %v8438_v24 = vld [vmem:[#allocation66_spill] sm:$0xff]  ;;  %v2381_v22 = vmul.f32 %v7041_v25, %v7266_v42  ;;  %v2509_v30 = vrot.slane %v7266_v42, 2  ;;  %v2699_v44 = vmul.f32 %v7094_v38, %v2619_v3  ;;  %v7308_v23 = vadd.f32 %v2286_v55, %v2190_v10  ;;  %v8441_v10 = vld [vmem:[#allocation56_spill] sm:$0xff]  ;;  %v8442_v3 = vld [vmem:[#allocation73_spill] sm:$0xff] }
 0x465   : > { %v1967_v56 = vmul.f32 %v1950_v57, %v1887_v8  ;;  %v2063_v48 = vmul.f32 %v8435_v14, %v1983_v20  ;;  %4855 = vmatmul.mubr.msk.f32.gmra.mrb[46].mxu1 %vm389_vm0, %v2713_v37  ;;  %v2477_v53 = vmul.f32 %v8438_v24, %v2397_v50  ;;  %v2175_v7 = vmul.f32 %v7193_v32, %v2095_v40  ;;  %v8440_v20 = vld [vmem:[#allocation20_spill] sm:$0xff] }
 0x466   : > { %v7296_v60 = vpop.permute.xlu0 %3309  ;;  %v2508_v8 = vrot.slane %v7259_v43, 2  ;;  %v2287_v5 = vmul.f32 %v8440_v20, %v2207_v49  ;;  %v2492_v40 = vadd.f32 %v2476_v47, %v2380_v45  ;;  %v2602_v37 = vadd.f32 %v2586_v9, %v2490_v63  ;;  %v8443_v63 = vld [vmem:[#allocation11_spill] sm:$0xff]  ;;  %v8446_v20 = vld [vmem:[#allocation72_spill] sm:$0xff] }
 0x467   : > { %v2079_v16 = vadd.f32 %v2063_v48, %v1967_v56  ;;  %3737 = vperm.xlu0 %5254, %v6119_v12   ;;  %v2493_v25 = vadd.f32 %v2477_v53, %v2381_v22  ;;  %v2603_v14 = vadd.f32 %v2587_v34, %v2491_v2  ;;  %v2621_v48 = vrot.slane %v7266_v42, 4 }
 0x468   : > { %3541 = vperm.xlu1 %5249, %v8380_v29   ;;  %v2588_v55 = vmul.f32 %v8441_v10, %v2508_v8  ;;  %v2620_v49 = vrot.slane %v7259_v43, 4  ;;  %v2589_v24 = vmul.f32 %v8442_v3, %v2509_v30 }
 0x469   : > { %v2191_v50 = vadd.f32 %v2175_v7, %v2079_v16  ;;  %v2666_v32 = vpop.permute.xlu1 %2665  ;;  %v2715_v31 = vadd.f32 %v2699_v44, %v2603_v14  ;;  %v2701_v9 = vmul.f32 %v7121_v19, %v2621_v48  ;;  %v8444_v7 = vld [vmem:[#allocation44_spill] sm:$0xff]  ;;  %v8448_v14 = vld [vmem:[#allocation26_spill] sm:$0xff] }
 0x46a   : > { %v2698_v57 = vmul.f32 %v2666_v32, %v2618_v28  ;;  %v7312_v56 = vpop.permute.xlu0 %3321  ;;  %v2398_v28 = vrot.slane %v7308_v23, 1  ;;  %v2604_v34 = vadd.f32 %v2588_v55, %v2492_v40  ;;  %v2605_v16 = vadd.f32 %v2589_v24, %v2493_v25  ;;  %v8449_v55 = vld [vmem:[#allocation18_spill] sm:$0xff]  ;;  %v8451_v24 = vld [vmem:[#allocation69_spill] sm:$0xff] }
 0x46b   : > { %v2303_v1 = vadd.f32 %v2287_v5, %v2191_v50  ;;  %3745 = vperm.xlu0 %5254, %v6213_v36   ;;  %v8445_v50 = vld [vmem:[#allocation14_spill] sm:$0xff]  ;;  %v2382_v5 = vmul.f32 %v8446_v20, %v7308_v23 }
 0x46c   : > { %v2714_v38 = vadd.f32 %v2698_v57, %v2602_v37  ;;  %3549 = vperm.xlu1 %5249, %v8443_v63   ;;  %v2717_v30 = vadd.f32 %v2701_v9, %v2605_v16  ;;  %v2478_v8 = vmul.f32 %v7144_v41, %v2398_v28  ;;  %v2510_v41 = vrot.slane %v7308_v23, 2 }
 0x46d   : > { %v2674_v47 = vpop.permute.xlu1 %2673  ;;  %v2399_v19 = vrot.slane %v2303_v1, 1  ;;  %v2511_v57 = vrot.slane %v2303_v1, 2  ;;  %v2623_v3 = vrot.slane %v2303_v1, 4  ;;  %v2622_v28 = vrot.slane %v7308_v23, 4 }
 0x46e   : > { %v2700_v42 = vmul.f32 %v2674_v47, %v2620_v49  ;;  %v7322_v2 = vpop.permute.xlu0 %3329  ;;  %v4853_v53 = vpop.f32.mrb[44].mxu1  ;;  %4857 = vmatprep.mubr.msk.f32.mxu1 %vm389_vm0, %v2714_v38  ;;  %v2494_v38 = vadd.f32 %v2478_v8, %v2382_v5  ;;  %v2590_v9 = vmul.f32 %v8451_v24, %v2510_v41  ;;  %v8452_v16 = vmov 12  }
 0x46f   : > { %v2883_v43 = vadd.f32 %v4853_v53, %v8444_v7  ;;  %3753 = vperm.xlu0 %5254, %v8357_v62   ;;  %v2877_v39 = vpop.f32.mrb[45].mxu1  ;;  %4858 = vmatmul.mubr.msk.f32.gmra.mrb[48].mxu1 %vm389_vm0, %v2715_v31  ;;  %v2479_v48 = vmul.f32 %v8448_v14, %v2399_v19  ;;  %v2591_v49 = vmul.f32 %v7223_v33, %v2511_v57 }
 0x470   : > { %v2716_v45 = vadd.f32 %v2700_v42, %v2604_v34  ;;  %v2878_v22 = vadd.f32 %v8444_v7, %v2877_v39  ;;  %3557 = vperm.xlu1 %5249, %v8445_v50   ;;  %v2606_v42 = vadd.f32 %v2590_v9, %v2494_v38  ;;  %v8453_v7 = vld [vmem:[#allocation58_spill] sm:$0xff]  ;;  %v2703_v33 = vmul.f32 %v7136_v26, %v2623_v3  ;;  %v8456_v26 = vld [vmem:[#allocation23_spill] sm:$0xff]  ;;  %v8462_v3 = vld [vmem:[#allocation8_spill] sm:$0xff] }
 0x471   : > { %v2949_v44 = vmul.f32 0.70710677, %v2883_v43 }
 0x472   : > { %v2948_v32 = vmul.f32 0.70710677, %v2878_v22  ;;  %v7333_v40 = vpop.permute.xlu0 %3337  ;;  %v2366_v37 = vpop.permute.xlu1 %2365  ;;  %4860 = vmatprep.mubr.msk.f32.mxu1 %vm389_vm0, %v2716_v45  ;;  %v2932_v20 = vmul.f32 0.5, %v2878_v22 }
 0x473   : > { %8447 = vst [vmem:[#allocation35_spill] sm:$0xff] %v7333_v40  ;;  %5376 = verf.f32 %v2949_v44  ;;  %v2383_v25 = vmul.f32 %v2366_v37, %v2303_v1  ;;  %3761 = vperm.xlu0 %5254, %v6453_v58   ;;  %4861 = vmatmul.mubr.msk.f32.gmra.mrb[50].mxu1 %vm389_vm0, %v2717_v30  ;;  %v8510_v40 = vmov 19  }
 0x474   : > { %5378 = verf.f32 %v2948_v32  ;;  %3565 = vperm.xlu1 %5249, %v8449_v55   ;;  %v2933_v32 = vmul.f32 0.5, %v2883_v43  ;;  %v8460_v43 = vld [vmem:[#allocation34_spill] sm:$0xff] }
 0x475   : > { %v2495_v10 = vadd.f32 %v2479_v48, %v2383_v25  ;;  %v8459_v48 = vld [vmem:[#allocation28_spill] sm:$0xff] }
 0x476   : > { %v7342_v31 = vpop.permute.xlu0 %3345 }
 0x477   : > { %8450 = vst [vmem:[#allocation45_spill] sm:$0xff] %v7342_v31  ;;  %3769 = vperm.xlu0 %5254, %v6566_v52   ;;  %v2607_v47 = vadd.f32 %v2591_v49, %v2495_v10  ;;  %v2682_v34 = vpop.permute.xlu1 %2681  ;;  %v8461_v10 = vmov 16   ;;  %v8494_v31 = vmov 18  }
 0x478   : > { %v2702_v53 = vmul.f32 %v2682_v34, %v2622_v28  ;;  %5250 = vset.pattern.permute.xlu1 %v8452_v16  ;;  %v8468_v16 = vld [vmem:[#allocation13_spill] sm:$0xff] }
 0x479   : > { %3273 = vperm.xlu1 %5250, %v8453_v7   ;;  %v2719_v1 = vadd.f32 %v2703_v33, %v2607_v47  ;;  %v8465_v47 = vld [vmem:[#allocation12_spill] sm:$0xff] }
 0x47a   : > { %v7349_v39 = vpop.permute.xlu0 %3353  ;;  %v2718_v19 = vadd.f32 %v2702_v53, %v2606_v42 }
 0x47b   : > { %8454 = vst [vmem:[#allocation49_spill] sm:$0xff] %v7349_v39  ;;  %3777 = vperm.xlu0 %5254, %v6688_v51  }
 0x47c   : > { %v7353_v30 = vpop.permute.xlu1 %3213  ;;  %4863 = vmatprep.mubr.msk.f32.mxu1 %vm389_vm0, %v2718_v19 }
 0x47d   : > { %v5377_v45 = vpop.eup %5376  ;;  %5251 = vset.pattern.permute.xlu1 %v8433_v15  ;;  %4864 = vmatmul.mubr.msk.f32.gmra.mrb[52].mxu1 %vm389_vm0, %v2719_v1  ;;  %v8276_v15 = vmov 18   ;;  %v8471_v1 = vld [vmem:[#allocation17_spill] sm:$0xff] }
 0x47e   : > { %v5379_v23 = vpop.eup %5378  ;;  %v7358_v8 = vpop.permute.xlu0 %3361  ;;  %v2981_v44 = vadd.f32 1.0, %v5377_v45  ;;  %3573 = vperm.xlu1 %5251, %v8456_v26  }
 0x47f   : > { %8455 = vst [vmem:[#allocation15_spill] sm:$0xff] %v7358_v8  ;;  %v2980_v5 = vadd.f32 1.0, %v5379_v23  ;;  %3785 = vperm.xlu0 %5254, %v6800_v0  }
 0x480   : > { %v7362_v57 = vpop.permute.xlu1 %3221  ;;  %v2997_v14 = vmul.f32 %v2981_v44, %v2933_v32  ;;  %v8474_v44 = vld [vmem:[#allocation22_spill] sm:$0xff]  ;;  %v8476_v32 = vld [vmem:[#allocation27_spill] sm:$0xff] }
 0x481   : > { %v2996_v37 = vmul.f32 %v2980_v5, %v2932_v20  ;;  %8457 = vst [vmem:[#allocation63_spill] sm:$0xff] %v7362_v57 }
 0x482   : > { %v7364_v25 = vpop.permute.xlu0 %3369  ;;  %3581 = vperm.xlu1 %5251, %v8459_v48  }
 0x483   : > { %8458 = vst [vmem:[#allocation33_spill] sm:$0xff] %v7364_v25  ;;  %5257 = vset.pattern.permute.xlu0 %v8276_v15  ;;  %4883 = vmatprep.mubr.msk.f32.mxu0 %vm389_vm0, %v2996_v37  ;;  %v8278_v37 = vmov 19  }
 0x484   : > { %3841 = vperm.xlu0 %5257, %v8434_v17   ;;  %v7370_v22 = vpop.permute.xlu1 %3225  ;;  %4884 = vmatmul.mubr.msk.f32.gmra.mrb[64].mxu0 %vm389_vm0, %v2997_v14 }
 0x486   : > { %3589 = vperm.xlu1 %5251, %v8460_v43  }
 0x487   : > { %v7374_v41 = vpop.permute.xlu0 %3425 }
 0x488   : > { %3853 = vperm.xlu0 %5257, %v8443_v63   ;;  %v7377_v38 = vpop.permute.xlu1 %3233 }
 0x48a   : > { %5252 = vset.pattern.permute.xlu1 %v8461_v10  ;;  %v8478_v10 = vld [vmem:[#allocation32_spill] sm:$0xff] }
 0x48b   : > { %v7380_v49 = vpop.permute.xlu0 %3437  ;;  %3629 = vperm.xlu1 %5252, %v8462_v3  }
 0x48c   : > { %3861 = vperm.xlu0 %5257, %v8445_v50   ;;  %v7384_v24 = vpop.permute.xlu1 %3241 }
 0x48d   : > { %8463 = vst [vmem:[#allocation39_spill] sm:$0xff] %v7384_v24 }
 0x48f   : > { %v7386_v9 = vpop.permute.xlu0 %3445  ;;  %v7388_v28 = vpop.f32.mrb[58].mxu0  ;;  %3637 = vperm.xlu1 %5252, %v8465_v47  }
 0x490   : > { %8464 = vst [vmem:[#allocation42_spill] sm:$0xff] %v7386_v9  ;;  %3869 = vperm.xlu0 %5257, %v8449_v55   ;;  %v7392_v34 = vpop.f32.mrb[59].mxu0  ;;  %v7394_v42 = vpop.permute.xlu1 %3249 }
 0x491   : > { %8466 = vst [vmem:[#allocation38_spill] sm:$0xff] %v7394_v42 }
 0x493   : > { %v7396_v53 = vpop.permute.xlu0 %3453  ;;  %3641 = vperm.xlu1 %5252, %v8468_v16  }
 0x494   : > { %8467 = vst [vmem:[#allocation19_spill] sm:$0xff] %v7396_v53  ;;  %3877 = vperm.xlu0 %5257, %v8456_v26   ;;  %v7400_v33 = vpop.permute.xlu1 %3257 }
 0x495   : > { %8469 = vst [vmem:[#allocation55_spill] sm:$0xff] %v7400_v33 }
 0x497   : > { %v7402_v19 = vpop.permute.xlu0 %3461  ;;  %3649 = vperm.xlu1 %5252, %v8471_v1  }
 0x498   : > { %8470 = vst [vmem:[#allocation64_spill] sm:$0xff] %v7402_v19  ;;  %3885 = vperm.xlu0 %5257, %v8459_v48   ;;  %v7406_v45 = vpop.permute.xlu1 %3265 }
 0x499   : > { %8472 = vst [vmem:[#allocation60_spill] sm:$0xff] %v7406_v45 }
 0x49b   : > { %v7408_v23 = vpop.permute.xlu0 %3469  ;;  %3657 = vperm.xlu1 %5252, %v8474_v44  }
 0x49c   : > { %8473 = vst [vmem:[#allocation59_spill] sm:$0xff] %v7408_v23  ;;  %3893 = vperm.xlu0 %5257, %v8460_v43  }
 0x49d   : > { %v7412_v20 = vpop.permute.xlu1 %3313 }
 0x49f   : > { %v7414_v5 = vpop.permute.xlu0 %3477  ;;  %3665 = vperm.xlu1 %5252, %v8476_v32  }
 0x4a0   : > { %8475 = vst [vmem:[#allocation50_spill] sm:$0xff] %v7414_v5  ;;  %5258 = vset.pattern.permute.xlu0 %v8278_v37 }
 0x4a1   : > { %3949 = vperm.xlu0 %5258, %v6026_v27   ;;  %v7419_v14 = vpop.permute.xlu1 %3317 }
 0x4a2   : > { %8477 = vst [vmem:[#allocation24_spill] sm:$0xff] %v7419_v14 }
 0x4a3   : > { %3673 = vperm.xlu1 %5252, %v8478_v10  }
 0x4a4   : > { %v7422_v15 = vpop.permute.xlu0 %3533 }
 0x4a5   : > { %3961 = vperm.xlu0 %5258, %v6119_v12   ;;  %v7425_v54 = vpop.permute.xlu1 %3325 }
 0x4a7   : > { %3681 = vperm.xlu1 %5252, %v8479_v46  }
 0x4a8   : > { %v7428_v5 = vpop.permute.xlu0 %3545 }
 0x4a9   : > { %3969 = vperm.xlu0 %5258, %v6213_v36   ;;  %v7431_v25 = vpop.permute.xlu1 %3333 }
 0x4aa   : > { %8480 = vst [vmem:[#allocation51_spill] sm:$0xff] %v7431_v25 }
 0x4ab   : > { %3689 = vperm.xlu1 %5252, %v8453_v7  }
 0x4ac   : > { %v7434_v37 = vpop.permute.xlu0 %3553 }
 0x4ad   : > { %3977 = vperm.xlu0 %5258, %v8357_v62   ;;  %v7437_v23 = vpop.permute.xlu1 %3341 }
 0x4ae   : > { %8481 = vst [vmem:[#allocation54_spill] sm:$0xff] %v7437_v23 }
 0x4af   : > { %5255 = vset.pattern.permute.xlu1 %v8482_v11 }
 0x4b0   : > { %v7440_v8 = vpop.permute.xlu0 %3561  ;;  %3729 = vperm.xlu1 %5255, %v8434_v17  }
 0x4b1   : > { %8483 = vst [vmem:[#allocation31_spill] sm:$0xff] %v7440_v8  ;;  %3985 = vperm.xlu0 %5258, %v6453_v58   ;;  %v7444_v45 = vpop.permute.xlu1 %3349 }
 0x4b2   : > { %8484 = vst [vmem:[#allocation68_spill] sm:$0xff] %v7444_v45 }
 0x4b4   : > { %v7446_v19 = vpop.permute.xlu0 %3569  ;;  %3733 = vperm.xlu1 %5255, %v8380_v29  }
 0x4b5   : > { %8485 = vst [vmem:[#allocation48_spill] sm:$0xff] %v7446_v19  ;;  %3993 = vperm.xlu0 %5258, %v6566_v52   ;;  %v7450_v39 = vpop.permute.xlu1 %3357 }
 0x4b6   : > { %8486 = vst [vmem:[#allocation30_spill] sm:$0xff] %v7450_v39  ;;  %v8279_v39 = vmov 20  }
 0x4b8   : > { %v7452_v33 = vpop.permute.xlu0 %3577  ;;  %3741 = vperm.xlu1 %5255, %v8443_v63  }
 0x4b9   : > { %8487 = vst [vmem:[#allocation74_spill] sm:$0xff] %v7452_v33  ;;  %4001 = vperm.xlu0 %5258, %v6688_v51   ;;  %v7456_v11 = vpop.permute.xlu1 %3365 }
 0x4ba   : > { %8488 = vst [vmem:[#allocation65_spill] sm:$0xff] %v7456_v11 }
 0x4bc   : > { %v7458_v53 = vpop.permute.xlu0 %3585  ;;  %3749 = vperm.xlu1 %5255, %v8445_v50  }
 0x4bd   : > { %8489 = vst [vmem:[#allocation71_spill] sm:$0xff] %v7458_v53  ;;  %4009 = vperm.xlu0 %5258, %v6800_v0  }
 0x4be   : > { %v7462_v45 = vpop.permute.xlu1 %3421 }
 0x4c0   : > { %v7464_v19 = vpop.permute.xlu0 %3593  ;;  %3757 = vperm.xlu1 %5255, %v8449_v55  }
 0x4c1   : > { %8490 = vst [vmem:[#allocation37_spill] sm:$0xff] %v7464_v19  ;;  %5261 = vset.pattern.permute.xlu0 %v8279_v39 }
 0x4c2   : > { %4049 = vperm.xlu0 %5261, %v6087_v59   ;;  %v7469_v33 = vpop.permute.xlu1 %3429 }
 0x4c3   : > { %8491 = vst [vmem:[#allocation21_spill] sm:$0xff] %v7469_v33 }
 0x4c4   : > { %3765 = vperm.xlu1 %5255, %v8456_v26  }
 0x4c5   : > { %v7472_v11 = vpop.permute.xlu0 %3633 }
 0x4c6   : > { %4061 = vperm.xlu0 %5261, %v6195_v18   ;;  %v7475_v53 = vpop.permute.xlu1 %3433 }
 0x4c8   : > { %3773 = vperm.xlu1 %5255, %v8459_v48  }
 0x4c9   : > { %v7478_v19 = vpop.permute.xlu0 %3645 }
 0x4ca   : > { %4069 = vperm.xlu0 %5261, %v8398_v61   ;;  %v7481_v23 = vpop.permute.xlu1 %3441 }
 0x4cc   : > { %3781 = vperm.xlu1 %5255, %v8460_v43  }
 0x4cd   : > { %v7484_v59 = vpop.permute.xlu0 %3653 }
 0x4ce   : > { %8492 = vst [vmem:[#allocation47_spill] sm:$0xff] %v7484_v59  ;;  %4077 = vperm.xlu0 %5261, %v8405_v4   ;;  %v7487_v39 = vpop.permute.xlu1 %3449 }
 0x4cf   : > { %8493 = vst [vmem:[#allocation57_spill] sm:$0xff] %v7487_v39 }
 0x4d0   : > { %5256 = vset.pattern.permute.xlu1 %v8494_v31 }
 0x4d1   : > { %v7490_v18 = vpop.permute.xlu0 %3661  ;;  %3837 = vperm.xlu1 %5256, %v6026_v27  }
 0x4d2   : > { %8495 = vst [vmem:[#allocation41_spill] sm:$0xff] %v7490_v18  ;;  %4085 = vperm.xlu0 %5261, %v8412_v13   ;;  %v7494_v42 = vpop.permute.xlu1 %3457  ;;  %v8280_v13 = vmov 21  }
 0x4d3   : > { %8496 = vst [vmem:[#allocation52_spill] sm:$0xff] %v7494_v42 }
 0x4d5   : > { %v7496_v61 = vpop.permute.xlu0 %3669  ;;  %3845 = vperm.xlu1 %5256, %v8380_v29  }
 0x4d6   : > { %8497 = vst [vmem:[#allocation67_spill] sm:$0xff] %v7496_v61  ;;  %4093 = vperm.xlu0 %5261, %v8419_v21   ;;  %v7500_v59 = vpop.permute.xlu1 %3465 }
 0x4d7   : > { %8498 = vst [vmem:[#allocation16_spill] sm:$0xff] %v7500_v59 }
 0x4d9   : > { %v7502_v4 = vpop.permute.xlu0 %3677  ;;  %3849 = vperm.xlu1 %5256, %v6119_v12  }
 0x4da   : > { %8499 = vst [vmem:[#allocation9_spill] sm:$0xff] %v7502_v4  ;;  %4101 = vperm.xlu0 %5261, %v8424_v35   ;;  %v7506_v31 = vpop.permute.xlu1 %3473 }
 0x4db   : > { %8500 = vst [vmem:[#allocation10_spill] sm:$0xff] %v7506_v31  ;;  %v7533_v31 = vld [vmem:[%s8190_s8 + $0x1] ss:$0 sm:$0xff] }
 0x4dc   : > { %v3139_v9 = vadd.f32 %v7388_v28, %v7533_v31 }
 0x4dd   : > { %v7508_v18 = vpop.permute.xlu0 %3685  ;;  %3857 = vperm.xlu1 %5256, %v6213_v36  }
 0x4de   : > { %8501 = vst [vmem:[#allocation70_spill] sm:$0xff] %v7508_v18  ;;  %5262 = vset.pattern.permute.xlu0 %v8280_v13  ;;  %v7512_v61 = vpop.permute.xlu1 %3481  ;;  %v3293_v25 = vrot.slane %v3139_v9, 1  ;;  %v3405_v28 = vrot.slane %v3139_v9, 2  ;;  %v3277_v39 = vmul.f32 %v7155_v6, %v3139_v9  ;;  %v3517_v24 = vrot.slane %v3139_v9, 4 }
 0x4df   : > { %8502 = vst [vmem:[#allocation62_spill] sm:$0xff] %v7512_v61  ;;  %4141 = vperm.xlu0 %5262, %v6026_v27   ;;  %v4879_v21 = vpop.f32.mrb[60].mxu0 }
 0x4e0   : > { %v7515_v59 = vpop.f32.mrb[61].mxu0  ;;  %v3373_v8 = vmul.f32 %v7412_v20, %v3293_v25 }
 0x4e1   : > { %8503 = vst [vmem:[#allocation66_spill] sm:$0xff] %v7515_v59  ;;  %3865 = vperm.xlu1 %5256, %v8357_v62  }
 0x4e2   : > { %v7518_v4 = vpop.permute.xlu0 %3725 }
 0x4e3   : > { %4153 = vperm.xlu0 %5262, %v6119_v12   ;;  %v3538_v35 = vpop.permute.xlu1 %3537 }
 0x4e4   : > { %v3597_v25 = vmul.f32 %v3538_v35, %v3517_v24  ;;  %v3134_v35 = vadd.f32 %v7533_v31, %v7392_v34 }
 0x4e5   : > { %3873 = vperm.xlu1 %5256, %v6453_v58  }
 0x4e6   : > { %v7522_v18 = vpop.permute.xlu0 %3737 }
 0x4e7   : > { %4161 = vperm.xlu0 %5262, %v6213_v36   ;;  %v7525_v13 = vpop.permute.xlu1 %3541 }
 0x4e8   : > { %8504 = vst [vmem:[#allocation61_spill] sm:$0xff] %v7525_v13 }
 0x4e9   : > { %3881 = vperm.xlu1 %5256, %v6566_v52  }
 0x4ea   : > { %v7528_v61 = vpop.permute.xlu0 %3745 }
 0x4eb   : > { %8505 = vst [vmem:[#allocation20_spill] sm:$0xff] %v7528_v61  ;;  %4169 = vperm.xlu0 %5262, %v8357_v62   ;;  %v7536_v42 = vpop.permute.xlu1 %3549  ;;  %v3485_v61 = vmul.f32 %v7374_v41, %v3405_v28  ;;  %v3149_v28 = vadd.f32 %v4879_v21, %v7533_v31  ;;  %v3404_v21 = vrot.slane %v3134_v35, 2 }
 0x4ed   : > { %3889 = vperm.xlu1 %5256, %v6688_v51  }
 0x4ee   : > { %v7541_v33 = vpop.permute.xlu0 %3753 }
 0x4ef   : > { %8506 = vst [vmem:[#allocation56_spill] sm:$0xff] %v7541_v33  ;;  %4177 = vperm.xlu0 %5262, %v6453_v58   ;;  %v7544_v13 = vpop.permute.xlu1 %3557 }
 0x4f0   : > { %8507 = vst [vmem:[#allocation73_spill] sm:$0xff] %v7544_v13  ;;  %v3389_v13 = vadd.f32 %v3373_v8, %v3277_v39  ;;  %v8281_v39 = vmov 22  }
 0x4f1   : > { %3897 = vperm.xlu1 %5256, %v6800_v0  }
 0x4f2   : > { %v7547_v57 = vpop.permute.xlu0 %3761  ;;  %v3501_v6 = vadd.f32 %v3485_v61, %v3389_v13 }
 0x4f3   : > { %8508 = vst [vmem:[#allocation11_spill] sm:$0xff] %v7547_v57  ;;  %4185 = vperm.xlu0 %5262, %v6566_v52   ;;  %v7551_v14 = vpop.permute.xlu1 %3565 }
 0x4f4   : > { %8509 = vst [vmem:[#allocation44_spill] sm:$0xff] %v7551_v14 }
 0x4f5   : > { %5259 = vset.pattern.permute.xlu1 %v8510_v40  ;;  %v7566_v40 = vadd.f32 %v3597_v25, %v3501_v6 }
 0x4f6   : > { %v7555_v33 = vpop.permute.xlu0 %3769  ;;  %3953 = vperm.xlu1 %5259, %v8434_v17  }
 0x4f7   : > { %8511 = vst [vmem:[#allocation14_spill] sm:$0xff] %v7555_v33  ;;  %4193 = vperm.xlu0 %5262, %v6688_v51   ;;  %v3821_v41 = vrot.slane %v7566_v40, 2 }
 0x4f8   : > { %v7559_v57 = vpop.permute.xlu1 %3273 }
 0x4f9   : > { %8512 = vst [vmem:[#allocation72_spill] sm:$0xff] %v7559_v57  ;;  %v3484_v57 = vmul.f32 %v7462_v45, %v3404_v21 }
 0x4fa   : > { %v7562_v20 = vpop.permute.xlu0 %3777  ;;  %3957 = vperm.xlu1 %5259, %v8380_v29  }
 0x4fb   : > { %8513 = vst [vmem:[#allocation26_spill] sm:$0xff] %v7562_v20  ;;  %4201 = vperm.xlu0 %5262, %v6800_v0  }
 0x4fd   : > { %v7568_v33 = vpop.permute.xlu1 %3573 }
 0x4fe   : > { %8514 = vst [vmem:[#allocation18_spill] sm:$0xff] %v7568_v33  ;;  %v7570_v14 = vpop.permute.xlu0 %3785  ;;  %3965 = vperm.xlu1 %5259, %v8443_v63  }
 0x4ff   : > { %8515 = vst [vmem:[#allocation69_spill] sm:$0xff] %v7570_v14  ;;  %5265 = vset.pattern.permute.xlu0 %v8281_v39 }
 0x500   : > { %4257 = vperm.xlu0 %5265, %v8434_v17  }
 0x501   : > { %v7575_v8 = vpop.permute.xlu1 %3581 }
 0x502   : > { %8516 = vst [vmem:[#allocation58_spill] sm:$0xff] %v7575_v8  ;;  %3973 = vperm.xlu1 %5259, %v8445_v50  }
 0x503   : > { %v3842_v24 = vpop.permute.xlu0 %3841 }
 0x504   : > { %v7579_v9 = vmul.f32 %v3842_v24, %v3821_v41  ;;  %4269 = vperm.xlu0 %5265, %v8443_v63   ;;  %v3292_v41 = vrot.slane %v3134_v35, 1  ;;  %v3295_v24 = vrot.slane %v3149_v28, 1 }
 0x505   : > { %v7582_v61 = vpop.permute.xlu1 %3589 }
 0x506   : > { %8517 = vst [vmem:[#allocation23_spill] sm:$0xff] %v7582_v61  ;;  %3981 = vperm.xlu1 %5259, %v8449_v55   ;;  %v3372_v34 = vmul.f32 %v7296_v60, %v3292_v41  ;;  %v3276_v61 = vmul.f32 %v7353_v30, %v3134_v35  ;;  %v3375_v8 = vmul.f32 %v7312_v56, %v3295_v24  ;;  %v3516_v60 = vrot.slane %v3134_v35, 4 }
 0x507   : > { %v7585_v13 = vpop.permute.xlu0 %3853  ;;  %v8522_v30 = vmov 20  }
 0x508   : > { %4277 = vperm.xlu0 %5265, %v8445_v50   ;;  %v3596_v24 = vmul.f32 %v7422_v15, %v3516_v60 }
 0x50a   : > { %3989 = vperm.xlu1 %5259, %v8456_v26   ;;  %v7592_v25 = vpop.permute.xlu1 %3629 }
 0x50b   : > { %v7594_v6 = vpop.permute.xlu0 %3861 }
 0x50c   : > { %8518 = vst [vmem:[#allocation28_spill] sm:$0xff] %v7594_v6  ;;  %4285 = vperm.xlu0 %5265, %v8449_v55   ;;  %v3279_v6 = vmul.f32 %v7370_v22, %v3149_v28 }
 0x50e   : > { %3997 = vperm.xlu1 %5259, %v8459_v48   ;;  %v7598_v39 = vpop.permute.xlu1 %3637  ;;  %v3391_v59 = vadd.f32 %v3375_v8, %v3279_v6  ;;  %v8282_v6 = vmov 23  }
 0x50f   : > { %8519 = vst [vmem:[#allocation34_spill] sm:$0xff] %v7598_v39  ;;  %v7600_v14 = vpop.permute.xlu0 %3869  ;;  %v3407_v39 = vrot.slane %v3149_v28, 2 }
 0x510   : > { %8520 = vst [vmem:[#allocation8_spill] sm:$0xff] %v7600_v14  ;;  %4293 = vperm.xlu0 %5265, %v8456_v26   ;;  %v3388_v14 = vadd.f32 %v3372_v34, %v3276_v61  ;;  %v3519_v34 = vrot.slane %v3149_v28, 4 }
 0x511   : > { %v3487_v61 = vmul.f32 %v7475_v53, %v3407_v39 }
 0x512   : > { %4005 = vperm.xlu1 %5259, %v8460_v43   ;;  %v7608_v20 = vpop.permute.xlu1 %3641  ;;  %v3500_v41 = vadd.f32 %v3484_v57, %v3388_v14 }
 0x513   : > { %v7610_v33 = vpop.permute.xlu0 %3877  ;;  %v3503_v35 = vadd.f32 %v3487_v61, %v3391_v59 }
 0x514   : > { %8521 = vst [vmem:[#allocation12_spill] sm:$0xff] %v7610_v33  ;;  %4301 = vperm.xlu0 %5265, %v8459_v48   ;;  %v7623_v22 = vadd.f32 %v3596_v24, %v3500_v41 }
 0x516   : > { %5260 = vset.pattern.permute.xlu1 %v8522_v30  ;;  %v7615_v45 = vpop.permute.xlu1 %3649 }
 0x517   : > { %v7617_v56 = vpop.permute.xlu0 %3885  ;;  %4045 = vperm.xlu1 %5260, %v8462_v3   ;;  %v3599_v3 = vmul.f32 %v7428_v5, %v3519_v34 }
 0x518   : > { %8523 = vst [vmem:[#allocation13_spill] sm:$0xff] %v7617_v56  ;;  %4309 = vperm.xlu0 %5265, %v8460_v43  }
 0x519   : > { %v7635_v59 = vadd.f32 %v3599_v3, %v3503_v35  ;;  %v8525_v35 = vld [vmem:[#allocation25_spill] sm:$0xff] }
 0x51a   : > { %v7625_v57 = vpop.permute.xlu1 %3657 }
 0x51b   : > { %v7627_v14 = vpop.permute.xlu0 %3893  ;;  %4053 = vperm.xlu1 %5260, %v8465_v47   ;;  %v4882_v8 = vpop.f32.mrb[62].mxu0  ;;  %v3932_v47 = vrot.slane %v7623_v22, 4 }
 0x51c   : > { %8524 = vst [vmem:[#allocation17_spill] sm:$0xff] %v7627_v14  ;;  %5266 = vset.pattern.permute.xlu0 %v8282_v6  ;;  %v3159_v15 = vadd.f32 %v4882_v8, %v7533_v31  ;;  %v3153_v21 = vpop.f32.mrb[63].mxu0 }
 0x51d   : > { %4365 = vperm.xlu0 %5266, %v6026_v27   ;;  %v3154_v53 = vadd.f32 %v7533_v31, %v3153_v21 }
 0x51e   : > { %v3297_v39 = vrot.slane %v3159_v15, 1  ;;  %v3409_v28 = vrot.slane %v3159_v15, 2  ;;  %v7637_v60 = vpop.permute.xlu1 %3665  ;;  %v3281_v24 = vmul.f32 %v7377_v38, %v3159_v15  ;;  %v3521_v34 = vrot.slane %v3159_v15, 4 }
 0x51f   : > { %v3296_v41 = vrot.slane %v3154_v53, 1  ;;  %v3408_v30 = vrot.slane %v3154_v53, 2  ;;  %4057 = vperm.xlu1 %5260, %v8468_v16   ;;  %v3280_v3 = vmul.f32 %v8525_v35, %v3154_v53  ;;  %v3520_v6 = vrot.slane %v3154_v53, 4 }
 0x520   : > { %v3950_v5 = vpop.permute.xlu0 %3949  ;;  %v3377_v61 = vmul.f32 %v7322_v2, %v3297_v39  ;;  %v3489_v56 = vmul.f32 %v7481_v23, %v3409_v28  ;;  %v3935_v16 = vrot.slane %v7635_v59, 4  ;;  %v3601_v39 = vmul.f32 %v7434_v37, %v3521_v34 }
 0x521   : > { %v7643_v8 = vmul.f32 %v3950_v5, %v3932_v47  ;;  %4377 = vperm.xlu0 %5266, %v6119_v12   ;;  %v3376_v21 = vmul.f32 %v7425_v54, %v3296_v41  ;;  %v3488_v2 = vmul.f32 %v7380_v49, %v3408_v30  ;;  %v3600_v23 = vmul.f32 %v7536_v42, %v3520_v6 }
 0x522   : > { %v3393_v14 = vadd.f32 %v3377_v61, %v3281_v24  ;;  %v7649_v33 = vpop.permute.xlu1 %3673  ;;  %v3693_v61 = vmul.f32 %v7472_v11, %v7566_v40 }
 0x523   : > { %8526 = vst [vmem:[#allocation22_spill] sm:$0xff] %v7649_v33  ;;  %v3392_v38 = vadd.f32 %v3376_v21, %v3280_v3  ;;  %4065 = vperm.xlu1 %5260, %v8471_v1  }
 0x524   : > { %v3962_v15 = vpop.permute.xlu0 %3961  ;;  %v3505_v54 = vadd.f32 %v3489_v56, %v3393_v14 }
 0x525   : > { %v7655_v47 = vmul.f32 %v3962_v15, %v3935_v16  ;;  %4385 = vperm.xlu0 %5266, %v6213_v36   ;;  %v3504_v53 = vadd.f32 %v3488_v2, %v3392_v38  ;;  %v7704_v2 = vld [vmem:[%s8188_s6 + $0x1] ss:$0 sm:$0xff] }
 0x526   : > { %v7659_v28 = vpop.permute.xlu1 %3681  ;;  %v7661_v41 = vadd.f32 %v3601_v39, %v3505_v54 }
 0x527   : > { %8527 = vst [vmem:[#allocation27_spill] sm:$0xff] %v7659_v28  ;;  %4073 = vperm.xlu1 %5260, %v8474_v44   ;;  %v7664_v30 = vadd.f32 %v3600_v23, %v3504_v53  ;;  %v3709_v44 = vrot.slane %v7566_v40, 1  ;;  %v8531_v53 = vmov 21  }
 0x528   : > { %v3970_v49 = vpop.permute.xlu0 %3969  ;;  %v3937_v1 = vrot.slane %v7661_v41, 4 }
 0x529   : > { %4393 = vperm.xlu0 %5266, %v8357_v62   ;;  %v3824_v37 = vrot.slane %v7664_v30, 2  ;;  %v3712_v3 = vrot.slane %v7664_v30, 1  ;;  %v3696_v16 = vmul.f32 %v7478_v19, %v7664_v30 }
 0x52a   : > { %v7669_v5 = vmul.f32 %v3970_v49, %v3937_v1  ;;  %v7671_v56 = vpop.permute.xlu1 %3689 }
 0x52b   : > { %8528 = vst [vmem:[#allocation32_spill] sm:$0xff] %v7671_v56  ;;  %4081 = vperm.xlu1 %5260, %v8476_v32   ;;  %v3904_v14 = vmul.f32 %v7585_v13, %v3824_v37 }
 0x52c   : > { %v7674_v42 = vpop.permute.xlu0 %3977 }
 0x52d   : > { %4401 = vperm.xlu0 %5266, %v6453_v58  }
 0x52f   : > { %4089 = vperm.xlu1 %5260, %v8478_v10   ;;  %v3730_v6 = vpop.permute.xlu1 %3729 }
 0x530   : > { %v7680_v24 = vpop.permute.xlu0 %3985  ;;  %v3789_v34 = vmul.f32 %v3730_v6, %v3709_v44 }
 0x531   : > { %4409 = vperm.xlu0 %5266, %v6566_v52  }
 0x532   : > { %v3805_v32 = vadd.f32 %v3789_v34, %v3693_v61 }
 0x533   : > { %4097 = vperm.xlu1 %5260, %v8479_v46   ;;  %v7686_v35 = vpop.permute.xlu1 %3733 }
 0x534   : > { %v7688_v13 = vpop.permute.xlu0 %3993  ;;  %v7692_v10 = vadd.f32 %v7579_v9, %v3805_v32 }
 0x535   : > { %8529 = vst [vmem:[#allocation43_spill] sm:$0xff] %v7688_v13  ;;  %4417 = vperm.xlu0 %5266, %v6688_v51  }
 0x537   : > { %4105 = vperm.xlu1 %5260, %v8453_v7   ;;  %v3742_v11 = vpop.permute.xlu1 %3741 }
 0x538   : > { %v7696_v21 = vpop.permute.xlu0 %4001  ;;  %v3792_v46 = vmul.f32 %v3742_v11, %v3712_v3  ;;  %v4856_v38 = vpop.f32.mrb[46].mxu1 }
 0x539   : > { %8530 = vst [vmem:[#allocation25_spill] sm:$0xff] %v7696_v21  ;;  %4425 = vperm.xlu0 %5266, %v6800_v0   ;;  %v2893_v9 = vadd.f32 %v7704_v2, %v4856_v38  ;;  %v2887_v15 = vpop.f32.mrb[47].mxu1 }
 0x53a   : > { %v3808_v39 = vadd.f32 %v3792_v46, %v3696_v16  ;;  %v2888_v7 = vadd.f32 %v7704_v2, %v2887_v15 }
 0x53b   : > { %v2951_v54 = vmul.f32 0.70710677, %v2893_v9  ;;  %5263 = vset.pattern.permute.xlu1 %v8531_v53  ;;  %v7709_v23 = vpop.permute.xlu1 %3749 }
 0x53c   : > { %v7711_v19 = vpop.permute.xlu0 %4009  ;;  %v2950_v49 = vmul.f32 0.70710677, %v2888_v7  ;;  %4145 = vperm.xlu1 %5263, %v8434_v17   ;;  %v7714_v1 = vadd.f32 %v3904_v14, %v3808_v39  ;;  %v2934_v56 = vmul.f32 0.5, %v2888_v7 }
 0x53d   : > { %8532 = vst [vmem:[#allocation75_spill] sm:$0xff] %v7711_v19  ;;  %5380 = verf.f32 %v2951_v54 }
 0x53e   : > { %5382 = verf.f32 %v2950_v49 }
 0x53f   : > { %v7716_v37 = vpop.permute.xlu1 %3757 }
 0x540   : > { %8533 = vst [vmem:[#allocation76_spill] sm:$0xff] %v7716_v37  ;;  %4149 = vperm.xlu1 %5263, %v8380_v29  }
 0x541   : > { %v7719_v44 = vpop.permute.xlu0 %4049 }
 0x542   : > { %v4859_v6 = vpop.f32.mrb[48].mxu1 }
 0x543   : > { %v2903_v61 = vadd.f32 %v7704_v2, %v4859_v6  ;;  %v2897_v34 = vpop.f32.mrb[49].mxu1  ;;  %v7722_v32 = vpop.permute.xlu1 %3765 }
 0x544   : > { %8534 = vst [vmem:[#allocation77_spill] sm:$0xff] %v7722_v32  ;;  %v2898_v3 = vadd.f32 %v7704_v2, %v2897_v34  ;;  %4157 = vperm.xlu1 %5263, %v8443_v63   ;;  %v3692_v32 = vmul.f32 %v7592_v25, %v7623_v22 }
 0x545   : > { %v2953_v11 = vmul.f32 0.70710677, %v2903_v61  ;;  %v7726_v14 = vpop.permute.xlu0 %4061 }
 0x546   : > { %v2952_v16 = vmul.f32 0.70710677, %v2898_v3  ;;  %v4862_v46 = vpop.f32.mrb[50].mxu1 }
 0x547   : > { %5384 = verf.f32 %v2953_v11  ;;  %v7729_v38 = vadd.f32 %v7704_v2, %v4862_v46  ;;  %v2907_v15 = vpop.f32.mrb[51].mxu1  ;;  %v5381_v39 = vpop.eup %5380  ;;  %v2935_v46 = vmul.f32 0.5, %v2893_v9 }
 0x548   : > { %5386 = verf.f32 %v2952_v16  ;;  %v7731_v54 = vpop.permute.xlu1 %3773  ;;  %v2908_v53 = vadd.f32 %v7704_v2, %v2907_v15  ;;  %v5383_v49 = vpop.eup %5382  ;;  %v2983_v6 = vadd.f32 1.0, %v5381_v39  ;;  %4165 = vperm.xlu1 %5263, %v8445_v50   ;;  %v3708_v39 = vrot.slane %v7623_v22, 1 }
 0x549   : > { %8535 = vst [vmem:[#allocation78_spill] sm:$0xff] %v7731_v54  ;;  %v2955_v34 = vmul.f32 0.70710677, %v7729_v38  ;;  %v7736_v19 = vpop.permute.xlu0 %4069  ;;  %v2982_v11 = vadd.f32 1.0, %v5383_v49 }
 0x54a   : > { %v2954_v21 = vmul.f32 0.70710677, %v2908_v53  ;;  %v2999_v54 = vmul.f32 %v2983_v6, %v2935_v46  ;;  %v3788_v9 = vmul.f32 %v7518_v4, %v3708_v39  ;;  %v2937_v39 = vmul.f32 0.5, %v2903_v61 }
 0x54b   : > { %5388 = verf.f32 %v2955_v34  ;;  %v2998_v28 = vmul.f32 %v2982_v11, %v2934_v56  ;;  %v3820_v56 = vrot.slane %v7623_v22, 2  ;;  %v3711_v22 = vrot.slane %v7635_v59, 1 }
 0x54c   : > { %5390 = verf.f32 %v2954_v21  ;;  %v7738_v16 = vpop.permute.xlu1 %3781  ;;  %4173 = vperm.xlu1 %5263, %v8449_v55   ;;  %v3804_v34 = vadd.f32 %v3788_v9, %v3692_v32  ;;  %v3695_v9 = vmul.f32 %v7608_v20, %v7635_v59 }
 0x54d   : > { %8536 = vst [vmem:[#allocation79_spill] sm:$0xff] %v7738_v16  ;;  %v7741_v15 = vpop.permute.xlu0 %4077  ;;  %4886 = vmatprep.mubr.msk.f32.mxu0 %vm389_vm0, %v2998_v28 }
 0x54e   : > { %8537 = vst [vmem:[#allocation80_spill] sm:$0xff] %v7741_v15  ;;  %4887 = vmatmul.mubr.msk.f32.gmra.mrb[66].mxu0 %vm389_vm0, %v2999_v54  ;;  %v2936_v54 = vmul.f32 0.5, %v2898_v3 }
 0x550   : > { %4181 = vperm.xlu1 %5263, %v8456_v26   ;;  %v3838_v7 = vpop.permute.xlu1 %3837  ;;  %v4865_v49 = vpop.f32.mrb[52].mxu1 }
 0x551   : > { %v5385_v21 = vpop.eup %5384  ;;  %v3900_v46 = vmul.f32 %v3838_v7, %v3820_v56  ;;  %v7752_v16 = vadd.f32 %v7704_v2, %v4865_v49  ;;  %v7754_v25 = vpop.permute.xlu0 %4085 }
 0x552   : > { %v5387_v6 = vpop.eup %5386  ;;  %v2985_v11 = vadd.f32 1.0, %v5385_v21  ;;  %8538 = vst [vmem:[#allocation81_spill] sm:$0xff] %v7754_v25  ;;  %v2917_v28 = vpop.f32.mrb[53].mxu1  ;;  %v3823_v25 = vrot.slane %v7635_v59, 2 }
 0x553   : > { %v2984_v13 = vadd.f32 1.0, %v5387_v6  ;;  %v7757_v4 = vadd.f32 %v7704_v2, %v2917_v28  ;;  %v3916_v33 = vadd.f32 %v3900_v46, %v3804_v34  ;;  %v2957_v15 = vmul.f32 0.70710677, %v7752_v16 }
 0x554   : > { %4189 = vperm.xlu1 %5263, %v8459_v48   ;;  %v7765_v3 = vpop.permute.xlu1 %3845  ;;  %v3713_v2 = vrot.slane %v7661_v41, 1  ;;  %v3001_v49 = vmul.f32 %v2985_v11, %v2937_v39  ;;  %v2938_v46 = vmul.f32 0.5, %v2908_v53  ;;  %v2939_v28 = vmul.f32 0.5, %v7729_v38  ;;  %v8540_v11 = vld [vmem:[#allocation66_spill] sm:$0xff] }
 0x555   : > { %v5389_v32 = vpop.eup %5388  ;;  %v3000_v56 = vmul.f32 %v2984_v13, %v2936_v54  ;;  %v2956_v21 = vmul.f32 0.70710677, %v7757_v4  ;;  %v7769_v61 = vadd.f32 %v7643_v8, %v3916_v33  ;;  %5392 = verf.f32 %v2957_v15  ;;  %v7771_v34 = vpop.permute.xlu0 %4093 }
 0x556   : > { %v5391_v7 = vpop.eup %5390  ;;  %v2987_v6 = vadd.f32 1.0, %v5389_v32  ;;  %8539 = vst [vmem:[#allocation82_spill] sm:$0xff] %v7771_v34  ;;  %v3791_v13 = vmul.f32 %v7522_v18, %v3711_v22  ;;  %v7780_v33 = vadd.f32 %v7533_v31, %v8540_v11  ;;  %v8548_v34 = vld [vmem:[#allocation31_spill] sm:$0xff] }
 0x557   : > { %v2986_v20 = vadd.f32 1.0, %v5391_v7  ;;  %5394 = verf.f32 %v2956_v21  ;;  %4889 = vmatprep.mubr.msk.f32.mxu0 %vm389_vm0, %v3000_v56  ;;  %v4885_v54 = vpop.f32.mrb[64].mxu0  ;;  %v8542_v56 = vld [vmem:[#allocation20_spill] sm:$0xff] }
 0x558   : > { %4890 = vmatmul.mubr.msk.f32.gmra.mrb[68].mxu0 %vm389_vm0, %v3001_v49  ;;  %v3169_v53 = vadd.f32 %v4885_v54, %v7533_v31  ;;  %4197 = vperm.xlu1 %5263, %v8460_v43   ;;  %v3850_v15 = vpop.permute.xlu1 %3849  ;;  %v3163_v39 = vpop.f32.mrb[65].mxu0  ;;  %v3807_v32 = vadd.f32 %v3791_v13, %v3695_v9  ;;  %v3003_v18 = vmul.f32 %v2987_v6, %v2939_v28  ;;  %v3294_v9 = vrot.slane %v7780_v33, 1  ;;  %v8543_v6 = vld [vmem:[#allocation39_spill] sm:$0xff] }
 0x559   : > { %v3002_v8 = vmul.f32 %v2986_v20, %v2938_v46  ;;  %v3903_v22 = vmul.f32 %v3850_v15, %v3823_v25  ;;  %v7784_v38 = vpop.permute.xlu0 %4101  ;;  %v3793_v59 = vmul.f32 %v8542_v56, %v3713_v2  ;;  %v3697_v46 = vmul.f32 %v7615_v45, %v7661_v41  ;;  %v8544_v13 = vld [vmem:[#allocation35_spill] sm:$0xff] }
 0x55a   : > { %8541 = vst [vmem:[#allocation66_spill] sm:$0xff] %v7784_v38  ;;  %v3299_v21 = vrot.slane %v3169_v53, 1  ;;  %v3411_v7 = vrot.slane %v3169_v53, 2  ;;  %v3825_v20 = vrot.slane %v7661_v41, 2  ;;  %v3283_v25 = vmul.f32 %v8543_v6, %v3169_v53 }
 0x55b   : > { %4892 = vmatprep.mubr.msk.f32.mxu0 %vm389_vm0, %v3002_v8  ;;  %v3919_v49 = vadd.f32 %v3903_v22, %v3807_v32  ;;  %v3523_v54 = vrot.slane %v3169_v53, 4  ;;  %v8545_v2 = vmov 22   ;;  %v3164_v15 = vadd.f32 %v7533_v31, %v3163_v39  ;;  %v8546_v22 = vld [vmem:[#allocation57_spill] sm:$0xff] }
 0x55c   : > { %4893 = vmatmul.mubr.msk.f32.gmra.mrb[70].mxu0 %vm389_vm0, %v3003_v18  ;;  %v3379_v28 = vmul.f32 %v8544_v13, %v3299_v21  ;;  %5264 = vset.pattern.permute.xlu1 %v8545_v2  ;;  %v3858_v11 = vpop.permute.xlu1 %3857  ;;  %v3809_v45 = vadd.f32 %v3793_v59, %v3697_v46  ;;  %v3491_v56 = vmul.f32 %v8546_v22, %v3411_v7  ;;  %v8547_v13 = vld [vmem:[#allocation24_spill] sm:$0xff]  ;;  %v2940_v31 = vmul.f32 0.5, %v7757_v4 }
 0x55d   : > { %v7797_v8 = vadd.f32 %v7655_v47, %v3919_v49  ;;  %v3905_v32 = vmul.f32 %v3858_v11, %v3825_v20  ;;  %4253 = vperm.xlu1 %5264, %v6026_v27   ;;  %v3374_v2 = vmul.f32 %v8547_v13, %v3294_v9  ;;  %v3603_v47 = vmul.f32 %v8548_v34, %v3523_v54  ;;  %v8549_v9 = vld [vmem:[#allocation63_spill] sm:$0xff]  ;;  %v8552_v13 = vld [vmem:[#allocation21_spill] sm:$0xff] }
 0x55e   : > { %v7801_v41 = vpop.permute.xlu0 %4141  ;;  %v3395_v18 = vadd.f32 %v3379_v28, %v3283_v25  ;;  %v3298_v59 = vrot.slane %v3164_v15, 1  ;;  %v2941_v46 = vmul.f32 0.5, %v7752_v16  ;;  %v3278_v25 = vmul.f32 %v8549_v9, %v7780_v33 }
 0x55f   : > { %v5393_v6 = vpop.eup %5392  ;;  %v3921_v21 = vadd.f32 %v3905_v32, %v3809_v45  ;;  %v3406_v34 = vrot.slane %v7780_v33, 2 }
 0x560   : > { %v2989_v38 = vadd.f32 1.0, %v5393_v6  ;;  %v3866_v49 = vpop.permute.xlu1 %3865  ;;  %v3507_v37 = vadd.f32 %v3491_v56, %v3395_v18  ;;  %v8550_v18 = vld [vmem:[#allocation51_spill] sm:$0xff]  ;;  %v8551_v56 = vld [vmem:[#allocation56_spill] sm:$0xff] }
 0x561   : > { %v5395_v53 = vpop.eup %5394  ;;  %v7808_v27 = vadd.f32 %v7669_v5, %v3921_v21  ;;  %4261 = vperm.xlu1 %5264, %v8380_v29   ;;  %v3390_v5 = vadd.f32 %v3374_v2, %v3278_v25  ;;  %v3378_v22 = vmul.f32 %v8550_v18, %v3298_v59  ;;  %v3486_v2 = vmul.f32 %v8552_v13, %v3406_v34  ;;  %v8555_v25 = vld [vmem:[#allocation42_spill] sm:$0xff] }
 0x562   : > { %v2988_v39 = vadd.f32 1.0, %v5395_v53  ;;  %v7811_v7 = vpop.permute.xlu0 %4153  ;;  %v3619_v20 = vadd.f32 %v3603_v47, %v3507_v37  ;;  %v3005_v54 = vmul.f32 %v2989_v38, %v2941_v46  ;;  %v3518_v53 = vrot.slane %v7780_v33, 4  ;;  %v8553_v47 = vld [vmem:[#allocation29_spill] sm:$0xff] }
 0x563   : > { %v3502_v46 = vadd.f32 %v3486_v2, %v3390_v5  ;;  %v3522_v33 = vrot.slane %v3164_v15, 4 }
 0x564   : > { %v3004_v28 = vmul.f32 %v2988_v39, %v2940_v31  ;;  %v3715_v4 = vrot.slane %v3619_v20, 1  ;;  %v3827_v11 = vrot.slane %v3619_v20, 2  ;;  %v3939_v45 = vrot.slane %v3619_v20, 4  ;;  %v7817_v32 = vpop.permute.xlu1 %3873 }
 0x565   : > { %4265 = vperm.xlu1 %5264, %v6119_v12   ;;  %v3699_v16 = vmul.f32 %v7625_v57, %v3619_v20  ;;  %v3282_v31 = vmul.f32 %v8553_v47, %v3164_v15  ;;  %v3410_v12 = vrot.slane %v3164_v15, 2 }
 0x566   : > { %4895 = vmatprep.mubr.msk.f32.mxu0 %vm389_vm0, %v3004_v28  ;;  %v7822_v37 = vpop.permute.xlu0 %4161  ;;  %v3795_v6 = vmul.f32 %v8551_v56, %v3715_v4  ;;  %v3907_v21 = vmul.f32 %v3866_v49, %v3827_v11  ;;  %v4019_v38 = vmul.f32 %v7674_v42, %v3939_v45  ;;  %v8554_v49 = vld [vmem:[#allocation61_spill] sm:$0xff] }
 0x567   : > { %4896 = vmatmul.mubr.msk.f32.gmra.mrb[72].mxu0 %vm389_vm0, %v3005_v54  ;;  %v3598_v20 = vmul.f32 %v8554_v49, %v3518_v53  ;;  %v3394_v42 = vadd.f32 %v3378_v22, %v3282_v31  ;;  %v3490_v28 = vmul.f32 %v8555_v25, %v3410_v12  ;;  %v8556_v45 = vld [vmem:[#allocation73_spill] sm:$0xff]  ;;  %v8557_v53 = vld [vmem:[#allocation34_spill] sm:$0xff] }
 0x568   : > { %v3811_v39 = vadd.f32 %v3795_v6, %v3699_v16  ;;  %v7831_v59 = vpop.permute.xlu1 %3881  ;;  %v3602_v18 = vmul.f32 %v8556_v45, %v3522_v33 }
 0x569   : > { %4273 = vperm.xlu1 %5264, %v6213_v36   ;;  %v3614_v11 = vadd.f32 %v3598_v20, %v3502_v46  ;;  %v3506_v36 = vadd.f32 %v3490_v28, %v3394_v42  ;;  %v3936_v42 = vrot.slane %v7664_v30, 4 }
 0x56a   : > { %v7834_v57 = vpop.permute.xlu0 %4169  ;;  %v3923_v9 = vadd.f32 %v3907_v21, %v3811_v39  ;;  %v3933_v21 = vrot.slane %v7566_v40, 4 }
 0x56b   : > { %v3710_v16 = vrot.slane %v3614_v11, 1  ;;  %v3618_v15 = vadd.f32 %v3602_v18, %v3506_v36  ;;  %v3822_v6 = vrot.slane %v3614_v11, 2  ;;  %v3694_v13 = vmul.f32 %v8557_v53, %v3614_v11 }
 0x56c   : > { %v7838_v54 = vadd.f32 %v4019_v38, %v3923_v9  ;;  %v7840_v34 = vpop.permute.xlu1 %3889  ;;  %v3934_v39 = vrot.slane %v3614_v11, 4  ;;  %v8560_v18 = vmov 23  }
 0x56d   : > { %4281 = vperm.xlu1 %5264, %v8357_v62   ;;  %v3790_v56 = vmul.f32 %v7686_v35, %v3710_v16  ;;  %v3902_v2 = vmul.f32 %v7765_v3, %v3822_v6  ;;  %v3826_v25 = vrot.slane %v3618_v15, 2 }
 0x56e   : > { %v7843_v4 = vpop.permute.xlu0 %4177 }
 0x56f   : > { %v3806_v31 = vadd.f32 %v3790_v56, %v3694_v13 }
 0x570   : > { %v7846_v5 = vpop.permute.xlu1 %3897 }
 0x571   : > { %4289 = vperm.xlu1 %5264, %v6453_v58   ;;  %v3714_v58 = vrot.slane %v3618_v15, 1 }
 0x572   : > { %v7849_v22 = vpop.permute.xlu0 %4185 }
 0x573   : > { %v3794_v49 = vmul.f32 %v7709_v23, %v3714_v58  ;;  %v8559_v23 = vld [vmem:[#allocation28_spill] sm:$0xff] }
 0x574   : > { %v3906_v45 = vmul.f32 %v8559_v23, %v3826_v25 }
 0x575   : > { %4297 = vperm.xlu1 %5264, %v6566_v52   ;;  %v3954_v62 = vpop.permute.xlu1 %3953  ;;  %v3918_v52 = vadd.f32 %v3902_v2, %v3806_v31 }
 0x576   : > { %v7854_v38 = vpop.permute.xlu0 %4193  ;;  %v4013_v47 = vmul.f32 %v3954_v62, %v3933_v21 }
 0x578   : > { %v7859_v12 = vadd.f32 %v4013_v47, %v7692_v10  ;;  %v8558_v10 = vld [vmem:[#allocation47_spill] sm:$0xff] }
 0x579   : > { %4305 = vperm.xlu1 %5264, %v6688_v51   ;;  %v3958_v35 = vpop.permute.xlu1 %3957  ;;  %v3698_v9 = vmul.f32 %v8558_v10, %v3618_v15 }
 0x57a   : > { %v7862_v40 = vpop.permute.xlu0 %4201  ;;  %v4014_v46 = vmul.f32 %v3958_v35, %v3934_v39  ;;  %v7867_v20 = vmul.f32 %v7719_v44, %v7859_v12  ;;  %v3938_v44 = vrot.slane %v3618_v15, 4 }
 0x57b   : > { %v3810_v11 = vadd.f32 %v3794_v49, %v3698_v9 }
 0x57c   : > { %v7869_v3 = vadd.f32 %v4014_v46, %v3918_v52  ;;  %v4127_v52 = vrot.slane %v7797_v8, 1 }
 0x57d   : > { %4313 = vperm.xlu1 %5264, %v6800_v0   ;;  %v3966_v51 = vpop.permute.xlu1 %3965  ;;  %v3922_v56 = vadd.f32 %v3906_v45, %v3810_v11 }
 0x57e   : > { %v4016_v28 = vmul.f32 %v3966_v51, %v3936_v42  ;;  %v4207_v46 = vmul.f32 %v7811_v7, %v4127_v52 }
 0x57f   : > { %v4258_v33 = vpop.permute.xlu0 %4257 }
 0x580   : > { %v7875_v36 = vadd.f32 %v4016_v28, %v7714_v1 }
 0x581   : > { %5267 = vset.pattern.permute.xlu1 %v8560_v18  ;;  %v3974_v16 = vpop.permute.xlu1 %3973 }
 0x582   : > { %v4018_v30 = vmul.f32 %v3974_v16, %v3938_v44  ;;  %4369 = vperm.xlu1 %5267, %v8434_v17   ;;  %v4240_v6 = vrot.slane %v7875_v36, 2  ;;  %v4112_v21 = vmul.f32 %v7726_v14, %v7875_v36  ;;  %v4125_v44 = vrot.slane %v7859_v12, 1 }
 0x583   : > { %v4270_v0 = vpop.permute.xlu0 %4269  ;;  %v4237_v16 = vrot.slane %v7859_v12, 2 }
 0x584   : > { %v7883_v62 = vadd.f32 %v4018_v30, %v3922_v56  ;;  %v4320_v1 = vmul.f32 %v4270_v0, %v4240_v6  ;;  %v4126_v6 = vrot.slane %v7869_v3, 1 }
 0x585   : > { %v7885_v53 = vpop.permute.xlu1 %3981  ;;  %v4317_v30 = vmul.f32 %v4258_v33, %v4237_v16  ;;  %v4238_v16 = vrot.slane %v7869_v3, 2 }
 0x586   : > { %4373 = vperm.xlu1 %5267, %v8380_v29   ;;  %v4242_v15 = vrot.slane %v7883_v62, 2  ;;  %v4114_v2 = vmul.f32 %v7736_v19, %v7883_v62  ;;  %v4124_v29 = vrot.slane %v7769_v61, 1 }
 0x587   : > { %v4278_v13 = vpop.permute.xlu0 %4277 }
 0x588   : > { %v4322_v17 = vmul.f32 %v4278_v13, %v4242_v15  ;;  %v4204_v19 = vmul.f32 %v7801_v41, %v4124_v29 }
 0x589   : > { %v7891_v47 = vpop.permute.xlu1 %3989 }
 0x58a   : > { %4381 = vperm.xlu1 %5267, %v8443_v63  }
 0x58b   : > { %v7936_v29 = vpop.permute.xlu0 %4285 }
 0x58d   : > { %v7894_v58 = vpop.permute.xlu1 %3997 }
 0x58e   : > { %4389 = vperm.xlu1 %5267, %v8445_v50  }
 0x58f   : > { %v7940_v33 = vpop.permute.xlu0 %4293 }
 0x591   : > { %v7897_v14 = vpop.permute.xlu1 %4005 }
 0x592   : > { %4397 = vperm.xlu1 %5267, %v8449_v55  }
 0x596   : > { %4405 = vperm.xlu1 %5267, %v8456_v26   ;;  %v4046_v31 = vpop.permute.xlu1 %4045  ;;  %v4129_v26 = vrot.slane %v7808_v27, 1 }
 0x597   : > { %v4108_v39 = vmul.f32 %v4046_v31, %v7769_v61 }
 0x598   : > { %v4209_v10 = vmul.f32 %v7822_v37, %v4129_v26 }
 0x599   : > { %v4220_v35 = vadd.f32 %v4204_v19, %v4108_v39  ;;  %v4128_v19 = vrot.slane %v7875_v36, 1 }
 0x59a   : > { %4413 = vperm.xlu1 %5267, %v8459_v48   ;;  %v4054_v63 = vpop.permute.xlu1 %4053  ;;  %v4131_v48 = vrot.slane %v7838_v54, 1 }
 0x59b   : > { %v4110_v50 = vmul.f32 %v4054_v63, %v7869_v3 }
 0x59e   : > { %4421 = vperm.xlu1 %5267, %v8460_v43   ;;  %v4058_v55 = vpop.permute.xlu1 %4057  ;;  %v4211_v43 = vmul.f32 %v7834_v57, %v4131_v48  ;;  %v7948_v48 = vpop.permute.xlu0 %4301 }
 0x59f   : > { %v4111_v49 = vmul.f32 %v4058_v55, %v7797_v8  ;;  %v4130_v55 = vrot.slane %v7883_v62, 1 }
 0x5a1   : > { %v7911_v41 = vadd.f32 %v4207_v46, %v4111_v49 }
 0x5a2   : > { %v4066_v42 = vpop.permute.xlu1 %4065 }
 0x5a3   : > { %v4113_v9 = vmul.f32 %v4066_v42, %v7808_v27 }
 0x5a5   : > { %v7916_v25 = vadd.f32 %v4209_v10, %v4113_v9 }
 0x5a6   : > { %v4074_v51 = vpop.permute.xlu1 %4073 }
 0x5a7   : > { %v4115_v7 = vmul.f32 %v4074_v51, %v7838_v54 }
 0x5a9   : > { %v7920_v28 = vadd.f32 %v4211_v43, %v4115_v7 }
 0x5aa   : > { %v7922_v11 = vpop.permute.xlu1 %4081 }
 0x5ae   : > { %v7924_v23 = vpop.permute.xlu1 %4089 }
 0x5b2   : > { %v7926_v45 = vpop.permute.xlu1 %4097 }
 0x5b6   : > { %v7928_v37 = vpop.permute.xlu1 %4105 }
 0x5bb   : > { %v4146_v18 = vpop.permute.xlu1 %4145 }
 0x5bc   : > { %v4205_v56 = vmul.f32 %v4146_v18, %v4125_v44 }
 0x5be   : > { %v4221_v57 = vadd.f32 %v4205_v56, %v7867_v20 }
 0x5bf   : > { %v4150_v0 = vpop.permute.xlu1 %4149 }
 0x5c0   : > { %v4206_v15 = vmul.f32 %v4150_v0, %v4126_v6  ;;  %v7934_v13 = vadd.f32 %v4317_v30, %v4221_v57 }
 0x5c2   : > { %v4222_v31 = vadd.f32 %v4206_v15, %v4110_v50  ;;  %v4239_v15 = vrot.slane %v7797_v8, 2 }
 0x5c3   : > { %v4158_v39 = vpop.permute.xlu1 %4157 }
 0x5c4   : > { %v4208_v63 = vmul.f32 %v4158_v39, %v4128_v19  ;;  %v4351_v19 = vrot.slane %v7797_v8, 4  ;;  %v4243_v8 = vrot.slane %v7838_v54, 2 }
 0x5c6   : > { %v4224_v52 = vadd.f32 %v4208_v63, %v4112_v21  ;;  %v7954_v21 = vpop.permute.xlu0 %4309 }
 0x5c7   : > { %v4166_v46 = vpop.permute.xlu1 %4165 }
 0x5c8   : > { %v4210_v20 = vmul.f32 %v4166_v46, %v4130_v55  ;;  %v7942_v26 = vadd.f32 %v4320_v1, %v4224_v52  ;;  %v4236_v1 = vrot.slane %v7769_v61, 2  ;;  %v4241_v55 = vrot.slane %v7808_v27, 2 }
 0x5ca   : > { %v4226_v49 = vadd.f32 %v4210_v20, %v4114_v2  ;;  %v4366_v43 = vpop.permute.xlu0 %4365  ;;  %v4348_v2 = vrot.slane %v7769_v61, 4  ;;  %v4353_v20 = vrot.slane %v7808_v27, 4 }
 0x5cb   : > { %v7944_v42 = vpop.permute.xlu1 %4173 }
 0x5cc   : > { %v7946_v10 = vadd.f32 %v4322_v17, %v4226_v49  ;;  %v4428_v17 = vmul.f32 %v4366_v43, %v4348_v2 }
 0x5ce   : > { %v4378_v56 = vpop.permute.xlu0 %4377 }
 0x5cf   : > { %v7950_v50 = vpop.permute.xlu1 %4181  ;;  %v4431_v63 = vmul.f32 %v4378_v56, %v4351_v19 }
 0x5d2   : > { %v4386_v39 = vpop.permute.xlu0 %4385 }
 0x5d3   : > { %v7952_v9 = vpop.permute.xlu1 %4189 }
 0x5d7   : > { %v7956_v51 = vpop.permute.xlu1 %4197 }
 0x5dc   : > { %v4254_v7 = vpop.permute.xlu1 %4253 }
 0x5dd   : > { %v4316_v44 = vmul.f32 %v4254_v7, %v4236_v1  ;;  %v4394_v7 = vpop.permute.xlu0 %4393 }
 0x5df   : > { %v4332_v18 = vadd.f32 %v4316_v44, %v4220_v35 }
 0x5e0   : > { %v4262_v30 = vpop.permute.xlu1 %4261 }
 0x5e1   : > { %v4444_v57 = vadd.f32 %v4428_v17, %v4332_v18  ;;  %v4318_v6 = vmul.f32 %v4262_v30, %v4238_v16 }
 0x5e3   : > { %4460 = vst.msk [vmem:[%s7963_s24] sm:$0xff] %vm389_vm0, %v4444_v57  ;;  %v4334_v0 = vadd.f32 %v4318_v6, %v4222_v31  ;;  %v4433_v31 = vmul.f32 %v4386_v39, %v4353_v20 }
 0x5e4   : > { %v4266_v61 = vpop.permute.xlu1 %4265 }
 0x5e5   : > { %v4319_v35 = vmul.f32 %v4266_v61, %v4239_v15 }
 0x5e7   : > { %v4335_v52 = vadd.f32 %v4319_v35, %v7911_v41  ;;  %v4355_v41 = vrot.slane %v7838_v54, 4  ;;  %v4349_v54 = vrot.slane %v7859_v12, 4 }
 0x5e8   : > { %v4274_v46 = vpop.permute.xlu1 %4273 }
 0x5e9   : > { %v4447_v49 = vadd.f32 %v4431_v63, %v4335_v52  ;;  %v4321_v43 = vmul.f32 %v4274_v46, %v4241_v55  ;;  %v4435_v18 = vmul.f32 %v4394_v7, %v4355_v41  ;;  %v4352_v63 = vrot.slane %v7875_v36, 4  ;;  %v8008_v36 = vld [vmem:[%s8190_s8 + $0x1] ss:$0 sm:$0xff]  ;;  %v8562_v7 = vld [vmem:[#allocation38_spill] sm:$0xff] }
 0x5ea   : > { %v4354_v46 = vrot.slane %v7883_v62, 4 }
 0x5eb   : > { %4463 = vst.msk [vmem:[%s7963_s24 + $0x18] sm:$0xff] %vm389_vm0, %v4447_v49  ;;  %v4337_v1 = vadd.f32 %v4321_v43, %v7916_v25 }
 0x5ec   : > { %v4282_v2 = vpop.permute.xlu1 %4281 }
 0x5ed   : > { %v4449_v44 = vadd.f32 %v4433_v31, %v4337_v1  ;;  %v4323_v17 = vmul.f32 %v4282_v2, %v4243_v8 }
 0x5ef   : > { %4465 = vst.msk [vmem:[%s7963_s24 + $0x28] sm:$0xff] %vm389_vm0, %v4449_v44  ;;  %v4339_v27 = vadd.f32 %v4323_v17, %v7920_v28  ;;  %v4350_v28 = vrot.slane %v7869_v3, 4  ;;  %v8564_v17 = vld [vmem:[#allocation46_spill] sm:$0xff] }
 0x5f0   : > { %v7980_v16 = vpop.permute.xlu1 %4289 }
 0x5f1   : > { %v4451_v56 = vadd.f32 %v4435_v18, %v4339_v27  ;;  %v8565_v27 = vld [vmem:[#allocation54_spill] sm:$0xff] }
 0x5f3   : > { %4467 = vst.msk [vmem:[%s7963_s24 + $0x38] sm:$0xff] %vm389_vm0, %v4451_v56 }
 0x5f4   : > { %v7984_v25 = vpop.permute.xlu1 %4297 }
 0x5f8   : > { %v7986_v30 = vpop.permute.xlu1 %4305 }
 0x5fc   : > { %v7988_v57 = vpop.permute.xlu1 %4313 }
 0x601   : > { %v4370_v6 = vpop.permute.xlu1 %4369 }
 0x602   : > { %v4429_v15 = vmul.f32 %v4370_v6, %v4349_v54 }
 0x604   : > { %v4445_v61 = vadd.f32 %v4429_v15, %v7934_v13  ;;  %v8566_v15 = vld [vmem:[#allocation52_spill] sm:$0xff] }
 0x605   : > { %v4374_v19 = vpop.permute.xlu1 %4373 }
 0x606   : > { %4461 = vst.msk [vmem:[%s7963_s24 + $0x8] sm:$0xff] %vm389_vm0, %v4445_v61  ;;  %v4430_v35 = vmul.f32 %v4374_v19, %v4350_v28  ;;  %v8567_v19 = vld [vmem:[#allocation19_spill] sm:$0xff] }
 0x608   : > { %v4446_v39 = vadd.f32 %v4430_v35, %v4334_v0 }
 0x609   : > { %v4382_v52 = vpop.permute.xlu1 %4381 }
 0x60a   : > { %4462 = vst.msk [vmem:[%s7963_s24 + $0x10] sm:$0xff] %vm389_vm0, %v4446_v39  ;;  %v4432_v55 = vmul.f32 %v4382_v52, %v4352_v63  ;;  %v8568_v63 = vld [vmem:[#allocation48_spill] sm:$0xff] }
 0x60c   : > { %v4448_v12 = vadd.f32 %v4432_v55, %v7942_v26 }
 0x60d   : > { %v4390_v20 = vpop.permute.xlu1 %4389 }
 0x60e   : > { %4464 = vst.msk [vmem:[%s7963_s24 + $0x20] sm:$0xff] %vm389_vm0, %v4448_v12  ;;  %v4434_v13 = vmul.f32 %v4390_v20, %v4354_v46  ;;  %v8569_v46 = vld [vmem:[#allocation44_spill] sm:$0xff] }
 0x610   : > { %v4450_v3 = vadd.f32 %v4434_v13, %v7946_v10  ;;  %v8563_v10 = vld [vmem:[#allocation45_spill] sm:$0xff] }
 0x612   : > { %4466 = vst.msk [vmem:[%s7963_s24 + $0x30] sm:$0xff] %vm389_vm0, %v4450_v3 }
 0x621   : > { %v4888_v49 = vpop.f32.mrb[66].mxu0 }
 0x622   : > { %v3179_v0 = vadd.f32 %v8008_v36, %v4888_v49  ;;  %v3173_v43 = vpop.f32.mrb[67].mxu0 }
 0x623   : > { %v3174_v26 = vadd.f32 %v8008_v36, %v3173_v43  ;;  %v8570_v43 = vld [vmem:[#allocation55_spill] sm:$0xff] }
 0x624   : > { %v3301_v62 = vrot.slane %v3179_v0, 1  ;;  %v3413_v31 = vrot.slane %v3179_v0, 2  ;;  %v3285_v2 = vmul.f32 %v8562_v7, %v3179_v0  ;;  %v3525_v44 = vrot.slane %v3179_v0, 4 }
 0x625   : > { %v3300_v1 = vrot.slane %v3174_v26, 1  ;;  %v3412_v8 = vrot.slane %v3174_v26, 2  ;;  %v3284_v18 = vmul.f32 %v8564_v17, %v3174_v26  ;;  %v3524_v54 = vrot.slane %v3174_v26, 4 }
 0x626   : > { %v3381_v41 = vmul.f32 %v8563_v10, %v3301_v62  ;;  %v3493_v61 = vmul.f32 %v8566_v15, %v3413_v31  ;;  %v3605_v52 = vmul.f32 %v8568_v63, %v3525_v44  ;;  %v8572_v15 = vld [vmem:[#allocation41_spill] sm:$0xff] }
 0x627   : > { %v3380_v56 = vmul.f32 %v8565_v27, %v3300_v1  ;;  %v3492_v35 = vmul.f32 %v8567_v19, %v3412_v8  ;;  %v3604_v20 = vmul.f32 %v8569_v46, %v3524_v54 }
 0x628   : > { %v3397_v6 = vadd.f32 %v3381_v41, %v3285_v2 }
 0x629   : > { %v3396_v28 = vadd.f32 %v3380_v56, %v3284_v18  ;;  %v8571_v56 = vld [vmem:[#allocation11_spill] sm:$0xff] }
 0x62a   : > { %v3509_v39 = vadd.f32 %v3493_v61, %v3397_v6 }
 0x62b   : > { %v4891_v55 = vpop.f32.mrb[68].mxu0  ;;  %v3508_v12 = vadd.f32 %v3492_v35, %v3396_v28  ;;  %v8573_v28 = vld [vmem:[#allocation49_spill] sm:$0xff] }
 0x62c   : > { %v3189_v13 = vadd.f32 %v8008_v36, %v4891_v55  ;;  %v3183_v3 = vpop.f32.mrb[69].mxu0  ;;  %v3621_v49 = vadd.f32 %v3605_v52, %v3509_v39  ;;  %v8574_v39 = vld [vmem:[#allocation76_spill] sm:$0xff] }
 0x62d   : > { %v3620_v0 = vadd.f32 %v3604_v20, %v3508_v12  ;;  %v3184_v31 = vadd.f32 %v8008_v36, %v3183_v3  ;;  %v8575_v52 = vld [vmem:[#allocation8_spill] sm:$0xff] }
 0x62e   : > { %v3287_v26 = vmul.f32 %v8570_v43, %v3189_v13  ;;  %v3303_v62 = vrot.slane %v3189_v13, 1  ;;  %v3717_v1 = vrot.slane %v3621_v49, 1  ;;  %v3829_v7 = vrot.slane %v3621_v49, 2  ;;  %v8576_v20 = vld [vmem:[#allocation16_spill] sm:$0xff] }
 0x62f   : > { %v3941_v8 = vrot.slane %v3621_v49, 4  ;;  %v3415_v2 = vrot.slane %v3189_v13, 2  ;;  %v4894_v10 = vpop.f32.mrb[70].mxu0  ;;  %v3701_v41 = vmul.f32 %v7637_v60, %v3621_v49  ;;  %v3716_v44 = vrot.slane %v3620_v0, 1 }
 0x630   : > { %v3828_v17 = vrot.slane %v3620_v0, 2  ;;  %v3940_v18 = vrot.slane %v3620_v0, 4  ;;  %v8024_v27 = vpop.f32.mrb[71].mxu0  ;;  %v3797_v54 = vmul.f32 %v8571_v56, %v3717_v1  ;;  %v3909_v6 = vmul.f32 %v7817_v32, %v3829_v7 }
 0x631   : > { %v3700_v61 = vmul.f32 %v8572_v15, %v3620_v0  ;;  %v3383_v19 = vmul.f32 %v8573_v28, %v3303_v62  ;;  %v4021_v35 = vmul.f32 %v7680_v24, %v3941_v8  ;;  %v3796_v63 = vmul.f32 %v8574_v39, %v3716_v44  ;;  %v8577_v62 = vld [vmem:[#allocation74_spill] sm:$0xff]  ;;  %v8578_v44 = vld [vmem:[#allocation40_spill] sm:$0xff] }
 0x632   : > { %v3908_v55 = vmul.f32 %v8575_v52, %v3828_v17  ;;  %v4020_v60 = vmul.f32 %v7885_v53, %v3940_v18  ;;  %v3813_v12 = vadd.f32 %v3797_v54, %v3701_v41  ;;  %v3495_v3 = vmul.f32 %v8576_v20, %v3415_v2  ;;  %v8579_v28 = vld [vmem:[#allocation68_spill] sm:$0xff]  ;;  %v4402_v20 = vpop.permute.xlu0 %4401 }
 0x633   : > { %v3399_v46 = vadd.f32 %v3383_v19, %v3287_v26  ;;  %v3527_v49 = vrot.slane %v3189_v13, 4  ;;  %v3812_v43 = vadd.f32 %v3796_v63, %v3700_v61  ;;  %v3302_v1 = vrot.slane %v3184_v31, 1  ;;  %v8580_v41 = vld [vmem:[#allocation64_spill] sm:$0xff]  ;;  %v8581_v13 = vld [vmem:[#allocation18_spill] sm:$0xff] }
 0x634   : > { %v3414_v32 = vrot.slane %v3184_v31, 2  ;;  %v3526_v7 = vrot.slane %v3184_v31, 4  ;;  %v3925_v0 = vadd.f32 %v3909_v6, %v3813_v12  ;;  %v3199_v24 = vadd.f32 %v8008_v36, %v4894_v10  ;;  %v8582_v61 = vld [vmem:[#allocation60_spill] sm:$0xff] }
 0x635   : > { %v3511_v56 = vadd.f32 %v3495_v3, %v3399_v46  ;;  %v3607_v15 = vmul.f32 %v8577_v62, %v3527_v49  ;;  %v3924_v8 = vadd.f32 %v3908_v55, %v3812_v43  ;;  %v3286_v17 = vmul.f32 %v8578_v44, %v3184_v31 }
 0x636   : > { %v3382_v53 = vmul.f32 %v8579_v28, %v3302_v1  ;;  %v3494_v26 = vmul.f32 %v8580_v41, %v3414_v32  ;;  %v4037_v18 = vadd.f32 %v4021_v35, %v3925_v0  ;;  %v3606_v54 = vmul.f32 %v8581_v13, %v3526_v7  ;;  %v8585_v13 = vld [vmem:[#allocation14_spill] sm:$0xff] }
 0x637   : > { %v3623_v2 = vadd.f32 %v3607_v15, %v3511_v56  ;;  %v3289_v19 = vmul.f32 %v8582_v61, %v3199_v24  ;;  %v4036_v39 = vadd.f32 %v4020_v60, %v3924_v8  ;;  %v3305_v63 = vrot.slane %v3199_v24, 1  ;;  %v8583_v60 = vld [vmem:[#allocation80_spill] sm:$0xff]  ;;  %v8586_v61 = vld [vmem:[#allocation15_spill] sm:$0xff] }
 0x638   : > { %v3398_v6 = vadd.f32 %v3382_v53, %v3286_v17  ;;  %v3417_v52 = vrot.slane %v3199_v24, 2  ;;  %v4133_v12 = vrot.slane %v4037_v18, 1  ;;  %v4245_v46 = vrot.slane %v4037_v18, 2 }
 0x639   : > { %v4357_v10 = vrot.slane %v4037_v18, 4  ;;  %v3529_v55 = vrot.slane %v3199_v24, 4  ;;  %v4117_v31 = vmul.f32 %v7922_v11, %v4037_v18  ;;  %v4132_v3 = vrot.slane %v4036_v39, 1  ;;  %v8584_v24 = vld [vmem:[#allocation22_spill] sm:$0xff]  ;;  %v4398_v11 = vpop.permute.xlu1 %4397 }
 0x63a   : > { %v4244_v49 = vrot.slane %v4036_v39, 2  ;;  %v4356_v43 = vrot.slane %v4036_v39, 4  ;;  %v4897_v35 = vpop.f32.mrb[72].mxu0  ;;  %v4213_v1 = vmul.f32 %v7843_v4, %v4133_v12  ;;  %v4325_v32 = vmul.f32 %v7980_v16, %v4245_v46 }
 0x63b   : > { %v4437_v7 = vmul.f32 %v4402_v20, %v4357_v10  ;;  %v4116_v0 = vmul.f32 %v8583_v60, %v4036_v39  ;;  %v3203_v56 = vpop.f32.mrb[73].mxu0  ;;  %v4212_v62 = vmul.f32 %v7944_v42, %v4132_v3  ;;  %v3703_v8 = vmul.f32 %v8584_v24, %v3623_v2 }
 0x63c   : > { %v4324_v15 = vmul.f32 %v7936_v29, %v4244_v49  ;;  %v3719_v44 = vrot.slane %v3623_v2, 1  ;;  %v4229_v17 = vadd.f32 %v4213_v1, %v4117_v31  ;;  %v3831_v28 = vrot.slane %v3623_v2, 2  ;;  %v8587_v29 = vld [vmem:[#allocation10_spill] sm:$0xff]  ;;  %v8588_v31 = vld [vmem:[#allocation43_spill] sm:$0xff] }
 0x63d   : > { %v3943_v53 = vrot.slane %v3623_v2, 4  ;;  %v3510_v41 = vadd.f32 %v3494_v26, %v3398_v6  ;;  %v4228_v18 = vadd.f32 %v4212_v62, %v4116_v0  ;;  %v4436_v4 = vmul.f32 %v4398_v11, %v4356_v43  ;;  %v8589_v1 = vld [vmem:[#allocation71_spill] sm:$0xff] }
 0x63e   : > { %v3799_v16 = vmul.f32 %v8585_v13, %v3719_v44  ;;  %v3385_v12 = vmul.f32 %v8586_v61, %v3305_v63  ;;  %v4341_v39 = vadd.f32 %v4325_v32, %v4229_v17  ;;  %v3911_v42 = vmul.f32 %v7831_v59, %v3831_v28  ;;  %v8590_v59 = vld [vmem:[#allocation67_spill] sm:$0xff] }
 0x63f   : > { %v3622_v46 = vadd.f32 %v3606_v54, %v3510_v41  ;;  %v3497_v10 = vmul.f32 %v8587_v29, %v3417_v52  ;;  %v4340_v20 = vadd.f32 %v4324_v15, %v4228_v18  ;;  %v4023_v49 = vmul.f32 %v8588_v31, %v3943_v53  ;;  %v8591_v52 = vld [vmem:[#allocation77_spill] sm:$0xff] }
 0x640   : > { %v3815_v3 = vadd.f32 %v3799_v16, %v3703_v8  ;;  %v3401_v2 = vadd.f32 %v3385_v12, %v3289_v19  ;;  %v4453_v26 = vadd.f32 %v4437_v7, %v4341_v39  ;;  %v3609_v60 = vmul.f32 %v8589_v1, %v3529_v55  ;;  %v8592_v7 = vld [vmem:[#allocation12_spill] sm:$0xff]  ;;  %v8597_v1 = vld [vmem:[#allocation59_spill] sm:$0xff] }
 0x641   : > { %v3718_v6 = vrot.slane %v3622_v46, 1  ;;  %v3830_v43 = vrot.slane %v3622_v46, 2  ;;  %v4452_v0 = vadd.f32 %v4436_v4, %v4340_v20  ;;  %v3942_v32 = vrot.slane %v3622_v46, 4  ;;  %v8595_v20 = vld [vmem:[#allocation26_spill] sm:$0xff] }
 0x642   : > { %v3927_v63 = vadd.f32 %v3911_v42, %v3815_v3  ;;  %v3513_v62 = vadd.f32 %v3497_v10, %v3401_v2  ;;  %4469 = vst.msk [vmem:[%s7963_s24 + $0x48] sm:$0xff] %vm389_vm0, %v4453_v26  ;;  %v3702_v54 = vmul.f32 %v8590_v59, %v3622_v46  ;;  %v3194_v24 = vadd.f32 %v8008_v36, %v8024_v27  ;;  %v8593_v42 = vld [vmem:[#allocation27_spill] sm:$0xff]  ;;  %v4410_v10 = vpop.permute.xlu0 %4409  ;;  %v8598_v59 = vld [vmem:[#allocation81_spill] sm:$0xff] }
 0x643   : > { %v3798_v15 = vmul.f32 %v8591_v52, %v3718_v6  ;;  %4468 = vst.msk [vmem:[%s7963_s24 + $0x40] sm:$0xff] %vm389_vm0, %v4452_v0  ;;  %v3910_v8 = vmul.f32 %v8592_v7, %v3830_v43  ;;  %v4022_v11 = vmul.f32 %v7891_v47, %v3942_v32  ;;  %v3209_v28 = vadd.f32 %v8008_v36, %v4897_v35  ;;  %v8594_v47 = vld [vmem:[#allocation36_spill] sm:$0xff] }
 0x644   : > { %v4039_v19 = vadd.f32 %v4023_v49, %v3927_v63  ;;  %v3625_v44 = vadd.f32 %v3609_v60, %v3513_v62  ;;  %v3304_v17 = vrot.slane %v3194_v24, 1  ;;  %v8067_v4 = vadd.f32 %v8008_v36, %v3203_v56  ;;  %v8596_v49 = vld [vmem:[#allocation30_spill] sm:$0xff] }
 0x645   : > { %v3814_v55 = vadd.f32 %v3798_v15, %v3702_v54  ;;  %v3416_v61 = vrot.slane %v3194_v24, 2  ;;  %v3288_v29 = vmul.f32 %v8594_v47, %v3194_v24  ;;  %v3528_v6 = vrot.slane %v3194_v24, 4  ;;  %v8599_v15 = vld [vmem:[#allocation25_spill] sm:$0xff] }
 0x646   : > { %v4135_v53 = vrot.slane %v4039_v19, 1  ;;  %v4247_v41 = vrot.slane %v4039_v19, 2  ;;  %v4359_v18 = vrot.slane %v4039_v19, 4  ;;  %v3721_v27 = vrot.slane %v3625_v44, 1 }
 0x647   : > { %v3926_v13 = vadd.f32 %v3910_v8, %v3814_v55  ;;  %v3833_v16 = vrot.slane %v3625_v44, 2  ;;  %v4119_v12 = vmul.f32 %v7924_v23, %v4039_v19  ;;  %v3705_v46 = vmul.f32 %v8593_v42, %v3625_v44  ;;  %v8603_v42 = vld [vmem:[#allocation53_spill] sm:$0xff] }
 0x648   : > { %v4215_v39 = vmul.f32 %v7849_v22, %v4135_v53  ;;  %v3801_v3 = vmul.f32 %v8595_v20, %v3721_v27  ;;  %v3945_v31 = vrot.slane %v3625_v44, 4  ;;  %v3384_v36 = vmul.f32 %v8596_v49, %v3304_v17  ;;  %v8605_v20 = vld [vmem:[#allocation37_spill] sm:$0xff] }
 0x649   : > { %v4038_v35 = vadd.f32 %v4022_v11, %v3926_v13  ;;  %v4327_v2 = vmul.f32 %v7984_v25, %v4247_v41  ;;  %v4439_v26 = vmul.f32 %v4410_v10, %v4359_v18  ;;  %v3913_v22 = vmul.f32 %v7840_v34, %v3833_v16  ;;  %v8600_v25 = vld [vmem:[#allocation58_spill] sm:$0xff]  ;;  %v4406_v34 = vpop.permute.xlu1 %4405 }
 0x64a   : > { %v4231_v56 = vadd.f32 %v4215_v39, %v4119_v12  ;;  %v3496_v60 = vmul.f32 %v8597_v1, %v3416_v61  ;;  %v3817_v32 = vadd.f32 %v3801_v3, %v3705_v46  ;;  %v3400_v62 = vadd.f32 %v3384_v36, %v3288_v29  ;;  %v8602_v12 = vld [vmem:[#allocation33_spill] sm:$0xff]  ;;  %v8604_v10 = vld [vmem:[#allocation62_spill] sm:$0xff] }
 0x64b   : > { %v4134_v43 = vrot.slane %v4038_v35, 1  ;;  %v4246_v23 = vrot.slane %v4038_v35, 2  ;;  %v4358_v63 = vrot.slane %v4038_v35, 4  ;;  %v4118_v54 = vmul.f32 %v8598_v59, %v4038_v35  ;;  %v8609_v59 = vld [vmem:[#allocation13_spill] sm:$0xff] }
 0x64c   : > { %v4343_v0 = vadd.f32 %v4327_v2, %v4231_v56  ;;  %v4025_v19 = vmul.f32 %v8599_v15, %v3945_v31  ;;  %v3608_v7 = vmul.f32 %v8600_v25, %v3528_v6  ;;  %v3929_v8 = vadd.f32 %v3913_v22, %v3817_v32  ;;  %v8606_v6 = vld [vmem:[#allocation9_spill] sm:$0xff]  ;;  %v8610_v25 = vld [vmem:[#allocation50_spill] sm:$0xff] }
 0x64d   : > { %v4214_v52 = vmul.f32 %v7950_v50, %v4134_v43  ;;  %v3512_v44 = vadd.f32 %v3496_v60, %v3400_v62  ;;  %v3307_v55 = vrot.slane %v3209_v28, 1  ;;  %v4326_v17 = vmul.f32 %v7940_v33, %v4246_v23  ;;  %v8601_v50 = vld [vmem:[#allocation72_spill] sm:$0xff]  ;;  %v8607_v23 = vld [vmem:[#allocation78_spill] sm:$0xff] }
 0x64e   : > { %v4455_v24 = vadd.f32 %v4439_v26, %v4343_v0  ;;  %v3419_v53 = vrot.slane %v3209_v28, 2  ;;  %v3531_v41 = vrot.slane %v3209_v28, 4  ;;  %v4438_v18 = vmul.f32 %v4406_v34, %v4358_v63  ;;  %v8608_v0 = vld [vmem:[#allocation65_spill] sm:$0xff] }
 0x64f   : > { %v4230_v11 = vadd.f32 %v4214_v52, %v4118_v54  ;;  %v4041_v13 = vadd.f32 %v4025_v19, %v3929_v8  ;;  %v3624_v27 = vadd.f32 %v3608_v7, %v3512_v44  ;;  %v3291_v16 = vmul.f32 %v8601_v50, %v3209_v28 }
 0x650   : > { %4471 = vst.msk [vmem:[%s7963_s24 + $0x58] sm:$0xff] %vm389_vm0, %v4455_v24  ;;  %v3387_v39 = vmul.f32 %v8602_v12, %v3307_v55  ;;  %v3290_v46 = vmul.f32 %v8603_v42, %v8067_v4  ;;  %v3306_v47 = vrot.slane %v8067_v4, 1  ;;  %v3499_v35 = vmul.f32 %v8604_v10, %v3419_v53  ;;  %v8613_v12 = vld [vmem:[#allocation69_spill] sm:$0xff] }
 0x651   : > { %v4342_v61 = vadd.f32 %v4326_v17, %v4230_v11  ;;  %v4137_v29 = vrot.slane %v4041_v13, 1  ;;  %v4249_v33 = vrot.slane %v4041_v13, 2  ;;  %v3611_v3 = vmul.f32 %v8605_v20, %v3531_v41  ;;  %v8615_v20 = vld [vmem:[#allocation70_spill] sm:$0xff] }
 0x652   : > { %v3720_v49 = vrot.slane %v3624_v27, 1  ;;  %v3832_v36 = vrot.slane %v3624_v27, 2  ;;  %v3418_v28 = vrot.slane %v8067_v4, 2  ;;  %v4121_v56 = vmul.f32 %v7926_v45, %v4041_v13 }
 0x653   : > { %v4454_v31 = vadd.f32 %v4438_v18, %v4342_v61  ;;  %v4217_v2 = vmul.f32 %v7854_v38, %v4137_v29  ;;  %v4361_v26 = vrot.slane %v4041_v13, 4  ;;  %v3704_v43 = vmul.f32 %v8606_v6, %v3624_v27  ;;  %v4418_v38 = vpop.permute.xlu0 %4417 }
 0x654   : > { %v3800_v22 = vmul.f32 %v8607_v23, %v3720_v49  ;;  %v3944_v1 = vrot.slane %v3624_v27, 4  ;;  %v3403_v60 = vadd.f32 %v3387_v39, %v3291_v16  ;;  %v3386_v63 = vmul.f32 %v8608_v0, %v3306_v47  ;;  %v8612_v16 = vld [vmem:[#allocation32_spill] sm:$0xff] }
 0x655   : > { %4470 = vst.msk [vmem:[%s7963_s24 + $0x50] sm:$0xff] %vm389_vm0, %v4454_v31  ;;  %v4233_v32 = vadd.f32 %v4217_v2, %v4121_v56  ;;  %v4329_v62 = vmul.f32 %v7986_v30, %v4249_v33  ;;  %v3912_v54 = vmul.f32 %v8609_v59, %v3832_v36  ;;  %v3530_v45 = vrot.slane %v8067_v4, 4  ;;  %v8611_v30 = vld [vmem:[#allocation23_spill] sm:$0xff] }
 0x656   : > { %v3816_v52 = vadd.f32 %v3800_v22, %v3704_v43  ;;  %v3515_v15 = vadd.f32 %v3499_v35, %v3403_v60  ;;  %v3402_v19 = vadd.f32 %v3386_v63, %v3290_v46  ;;  %v3498_v7 = vmul.f32 %v8610_v25, %v3418_v28  ;;  %v8614_v46 = vld [vmem:[#allocation82_spill] sm:$0xff]  ;;  %v8616_v28 = vld [vmem:[#allocation79_spill] sm:$0xff]  ;;  %v8618_v60 = vld [vmem:[#allocation17_spill] sm:$0xff] }
 0x657   : > { %v4345_v24 = vadd.f32 %v4329_v62, %v4233_v32  ;;  %v4441_v8 = vmul.f32 %v4418_v38, %v4361_v26  ;;  %v4024_v55 = vmul.f32 %v7894_v58, %v3944_v1  ;;  %v3610_v53 = vmul.f32 %v8611_v30, %v3530_v45  ;;  %v4414_v26 = vpop.permute.xlu1 %4413  ;;  %v8617_v43 = vld [vmem:[#allocation75_spill] sm:$0xff] }
 0x658   : > { %v3928_v44 = vadd.f32 %v3912_v54, %v3816_v52  ;;  %v3627_v34 = vadd.f32 %v3611_v3, %v3515_v15  ;;  %v3514_v11 = vadd.f32 %v3498_v7, %v3402_v19 }
 0x659   : > { %v4457_v17 = vadd.f32 %v4441_v8, %v4345_v24  ;;  %v4426_v24 = vpop.permute.xlu0 %4425 }
 0x65a   : > { %v4040_v41 = vadd.f32 %v4024_v55, %v3928_v44  ;;  %v3723_v18 = vrot.slane %v3627_v34, 1  ;;  %v3835_v4 = vrot.slane %v3627_v34, 2  ;;  %v3626_v13 = vadd.f32 %v3610_v53, %v3514_v11 }
 0x65b   : > { %4473 = vst.msk [vmem:[%s7963_s24 + $0x68] sm:$0xff] %vm389_vm0, %v4457_v17  ;;  %v3707_v61 = vmul.f32 %v8612_v16, %v3627_v34  ;;  %v3947_v42 = vrot.slane %v3627_v34, 4  ;;  %v4422_v17 = vpop.permute.xlu1 %4421 }
 0x65c   : > { %v4136_v27 = vrot.slane %v4040_v41, 1  ;;  %v4248_v50 = vrot.slane %v4040_v41, 2  ;;  %v3803_v39 = vmul.f32 %v8613_v12, %v3723_v18  ;;  %v4120_v58 = vmul.f32 %v8614_v46, %v4040_v41 }
 0x65d   : > { %v4360_v29 = vrot.slane %v4040_v41, 4  ;;  %v3722_v33 = vrot.slane %v3626_v13, 1  ;;  %v3915_v35 = vmul.f32 %v7846_v5, %v3835_v4  ;;  %v3706_v3 = vmul.f32 %v8615_v20, %v3626_v13 }
 0x65e   : > { %v4216_v47 = vmul.f32 %v7952_v9, %v4136_v27  ;;  %v3819_v10 = vadd.f32 %v3803_v39, %v3707_v61  ;;  %v3834_v31 = vrot.slane %v3626_v13, 2  ;;  %v4328_v36 = vmul.f32 %v7948_v48, %v4248_v50 }
 0x65f   : > { %v3802_v56 = vmul.f32 %v8616_v28, %v3722_v33  ;;  %v3946_v2 = vrot.slane %v3626_v13, 4  ;;  %v4027_v23 = vmul.f32 %v8617_v43, %v3947_v42  ;;  %v4440_v22 = vmul.f32 %v4414_v26, %v4360_v29 }
 0x660   : > { %v4232_v49 = vadd.f32 %v4216_v47, %v4120_v58  ;;  %v3931_v6 = vadd.f32 %v3915_v35, %v3819_v10  ;;  %v3914_v0 = vmul.f32 %v8618_v60, %v3834_v31 }
 0x661   : > { %v3818_v1 = vadd.f32 %v3802_v56, %v3706_v3  ;;  %v4026_v62 = vmul.f32 %v7897_v14, %v3946_v2  ;;  %v8619_v14 = vld [vmem:[#allocation66_spill] sm:$0xff] }
 0x662   : > { %v4344_v9 = vadd.f32 %v4328_v36, %v4232_v49  ;;  %v4043_v5 = vadd.f32 %v4027_v23, %v3931_v6 }
 0x663   : > { %v3930_v32 = vadd.f32 %v3914_v0, %v3818_v1 }
 0x664   : > { %v4456_v63 = vadd.f32 %v4440_v22, %v4344_v9  ;;  %v4139_v59 = vrot.slane %v4043_v5, 1  ;;  %v4251_v48 = vrot.slane %v4043_v5, 2  ;;  %v4123_v45 = vmul.f32 %v7928_v37, %v4043_v5 }
 0x665   : > { %v4042_v54 = vadd.f32 %v4026_v62, %v3930_v32  ;;  %v4363_v52 = vrot.slane %v4043_v5, 4 }
 0x666   : > { %4472 = vst.msk [vmem:[%s7963_s24 + $0x60] sm:$0xff] %vm389_vm0, %v4456_v63  ;;  %v4219_v38 = vmul.f32 %v7862_v40, %v4139_v59  ;;  %v4331_v7 = vmul.f32 %v7988_v57, %v4251_v48 }
 0x667   : > { %v4138_v15 = vrot.slane %v4042_v54, 1  ;;  %v4250_v19 = vrot.slane %v4042_v54, 2  ;;  %v4122_v8 = vmul.f32 %v8619_v14, %v4042_v54  ;;  %v4362_v55 = vrot.slane %v4042_v54, 4 }
 0x668   : > { %v4235_v25 = vadd.f32 %v4219_v38, %v4123_v45  ;;  %v4443_v37 = vmul.f32 %v4426_v24, %v4363_v52 }
 0x669   : > { %v4218_v44 = vmul.f32 %v7956_v51, %v4138_v15  ;;  %v4330_v40 = vmul.f32 %v7954_v21, %v4250_v19  ;;  %v4442_v57 = vmul.f32 %v4422_v17, %v4362_v55 }
 0x66a   : > { %v4347_v34 = vadd.f32 %v4331_v7, %v4235_v25 }
 0x66b   : > { %v4234_v11 = vadd.f32 %v4218_v44, %v4122_v8 }
 0x66c   : > { %v4459_v30 = vadd.f32 %v4443_v37, %v4347_v34 }
 0x66d   : > { %v4346_v53 = vadd.f32 %v4330_v40, %v4234_v11 }
 0x66e   : > { %4475 = vst.msk [vmem:[%s7963_s24 + $0x78] sm:$0xff] %vm389_vm0, %v4459_v30 }
 0x66f   : > { %v4458_v51 = vadd.f32 %v4442_v57, %v4346_v53 }
 0x671   : > { %4474 = vst.msk [vmem:[%s7963_s24 + $0x70] sm:$0xff] %vm389_vm0, %v4458_v51 }
 0x672   : > { %5443 = shalt.err (!%p5440_p2)
}
 0x673   : > { %s5444_s24 = scalar_lea.hbm %s8134_s26, 2048  ;;  %s5448_s17 = scalar_lea.hbm %s8191_s9, 4096 }
 0x674   : > { %p5445_p4 = scmp.ne.s32.totalorder %s8134_s26, %s5444_s24  ;;  %p5449_p9 = scmp.lt.u32.totalorder %s8134_s26, %s8191_s9 }
 0x675   : > { %p5450_p1 = scmp.lt.u32.totalorder %s5448_s17, %s5444_s24  ;;  %p5452_p6 = scmp.lt.u32.totalorder %s5444_s24, %s8134_s26 }
 0x676   : > { %p5446_p5 = pnand %p5445_p4, %p8620_p11 }
 0x677   : > { %p5451_p3 = por %p5450_p1, %p5449_p9 }
 0x678   : > { %p5447_p7 = pneg %p5446_p5 }
 0x679   : > { %p5453_p12 = por %p5452_p6, %p5451_p3 }
 0x67b   : > { %p5454_p13 = pnand %p5453_p12, %p5447_p7 }
 0x67d   : > { %5457 = shalt.err (!%p5454_p13)
}
 0x67e   : > { %s5528_s23 = smov 128   ;;  %s5529_s25 = smov 8  }
 0x67f   : > { %4980 = dma.vmem_to_hbm [thread:$0]  (%p8620_p11), %s8136_s16, 2048, %s8134_s26, %s4477_s13, %s5528_s23, %s5528_s23, %s5529_s25  }
 0x680 PF: > { %s4505_s28 = sand.u32 1, %s5484_s30   ;;  %p8621_p8 = scmp.ne.s32.totalorder %s8286_s22, 0 }
 0x681   : > { %p8622_p10 = scmp.ge.s32.totalorder %s5496_s12, 2  ;;  %s4506_s24 = scalar_lea.sflag [#allocation4], %s4505_s28 }
 0x683   : > { %p4987_p0 = pnand %p8622_p10, %p8621_p8 }
 0x685   : > { %5479 = dma.done.wait (!%p4987_p0), %s4506_s24, 2048  }
 0x686   : > { %5481 = vsyncadd (!%p4987_p0), %s4506_s24, 4294965248  ;;  %p22_p2 = scmp.ge.s32.totalorder %s5605_s15, 4   ;;  %s8623_s30 = smov %s5488_s10 }
 0x687   : > { %s8624_s10 = smov %s5492_s11  ;;  %s8625_s11 = smov %s5617_s18 }
 0x688   : > { %s8626_s12 = smov %s5605_s15  ;;  %24 = sbr.rel (!%p22_p2) target bundleno = 5 (0x5), region = 105 }
 0x68f   :  { %4511 = vsyncpa [#allocation3], 1 }
 0x690   :  { %4513 = vsyncpa [#allocation3 + $0x1], 1 }
 0x691   :  { %4514 = vsyncpa [#allocation4], 1 }
 0x692   :  { %4516 = vsyncpa [#allocation4 + $0x1], 1 }

</bundles_post_ra>
